<compile_context>
chip_gen: v7x
topology: tpu7x:2x2x1
jax: 0.10.0
libtpu: 0.0.40
codegen_flags: <defaults>
</compile_context>

<pallas_src>
import functools
import math

import jax
import jax.numpy as jnp
from jax import lax
from jax.experimental import pallas as pl
from jax.experimental.pallas import tpu as pltpu


# ----------------------------------------------------------------------------
# helpers
# ----------------------------------------------------------------------------
def _pick_tile(dim, candidates):
    """Largest candidate that evenly divides `dim`, else the full dimension."""
    for c in candidates:
        if c <= dim and dim % c == 0:
            return c
    return dim


def _compiler_params(semantics, *block_shapes):
    """Dimension semantics + an explicit (generous, capped) VMEM limit."""
    elems = 0
    for s in block_shapes:
        n = 1
        for d in s:
            n *= int(d)
        elems += n
    # double-buffered inputs + accumulator + slack, clamped to a range that is
    # safe on v5e/v6e (128 MiB VMEM) and v7x (64 MiB VMEM).
    limit = int(min(max(elems * 4 * 3 + (4 << 20), 16 << 20), 48 << 20))
    return pltpu.CompilerParams(dimension_semantics=semantics,
                                vmem_limit_bytes=limit)


def _apply_ln(y, gamma, beta, eps):
    mu = jnp.mean(y, axis=-1, keepdims=True)
    var = jnp.mean((y - mu) ** 2, axis=-1, keepdims=True)
    return (y - mu) * lax.rsqrt(var + eps) * gamma + beta


# ----------------------------------------------------------------------------
# Tiled matmul with optional fused input-LN prologue and
# bias + residual + output-LN epilogue
# ----------------------------------------------------------------------------
def _matmul_kernel(*refs, has_ln_in, has_residual, has_ln_out, eps, single_k):
    it = iter(refs)
    x_ref, w_ref, b_ref = next(it), next(it), next(it)
    gin_ref = bin_ref = r_ref = gout_ref = bout_ref = None
    if has_ln_in:
        gin_ref, bin_ref = next(it), next(it)
    if has_residual:
        r_ref = next(it)
    if has_ln_out:
        gout_ref, bout_ref = next(it), next(it)
    o_ref = next(it)
    acc_ref = None if single_k else next(it)

    def x_block():
        x = x_ref[...].astype(jnp.float32)
        if has_ln_in:
            x = _apply_ln(x, gin_ref[...].astype(jnp.float32),
                          bin_ref[...].astype(jnp.float32), eps)
        return x

    def epilogue(acc):
        y = acc + b_ref[...].astype(jnp.float32)
        if has_residual:
            y = y + r_ref[...].astype(jnp.float32)
        if has_ln_out:
            y = _apply_ln(y, gout_ref[...].astype(jnp.float32),
                          bout_ref[...].astype(jnp.float32), eps)
        o_ref[...] = y.astype(o_ref.dtype)

    if single_k:
        epilogue(jnp.dot(x_block(), w_ref[...],
                         preferred_element_type=jnp.float32))
    else:
        k = pl.program_id(2)

        @pl.when(k == 0)
        def _init():
            acc_ref[...] = jnp.zeros_like(acc_ref)

        acc_ref[...] += jnp.dot(x_block(), w_ref[...],
                                preferred_element_type=jnp.float32)

        @pl.when(k == pl.num_programs(2) - 1)
        def _fin():
            epilogue(acc_ref[...])


def matmul(x, w, b, *, ln_in=None, residual=None, ln_out=None, eps=1e-5):
    """y = [LN(x)] @ w + b  [+ residual]  [-> LayerNorm over last dim].

    x: (M, K)   w: (K, N)   b: (N,)   residual: (M, N) or None
    ln_in / ln_out: (gamma, beta) pairs.  ln_in forces tk == K (full-row LN);
    ln_out forces tn == N.
    """
    m, kdim = x.shape
    n = w.shape[1]
    tm = _pick_tile(m, (256, 128))
    tn = n if ln_out is not None else _pick_tile(n, (256, 128))
    tk = kdim if ln_in is not None else _pick_tile(kdim, (512, 256, 128))
    nk = kdim // tk
    single_k = nk == 1
    grid = (m // tm, n // tn, nk)

    in_specs = [
        pl.BlockSpec((tm, tk), lambda i, j, k: (i, k)),
        pl.BlockSpec((tk, tn), lambda i, j, k: (k, j)),
        pl.BlockSpec((1, tn), lambda i, j, k: (0, j)),
    ]
    args = [x, w, b.reshape(1, n)]
    if ln_in is not None:
        gin, bin_ = ln_in
        in_specs += [pl.BlockSpec((1, tk), lambda i, j, k: (0, k))] * 2
        args += [gin.reshape(1, kdim), bin_.reshape(1, kdim)]
    if residual is not None:
        in_specs.append(pl.BlockSpec((tm, tn), lambda i, j, k: (i, j)))
        args.append(residual)
    if ln_out is not None:
        gamma, beta = ln_out
        in_specs += [pl.BlockSpec((1, tn), lambda i, j, k: (0, j))] * 2
        args += [gamma.reshape(1, n), beta.reshape(1, n)]

    kernel = functools.partial(_matmul_kernel,
                               has_ln_in=ln_in is not None,
                               has_residual=residual is not None,
                               has_ln_out=ln_out is not None,
                               eps=eps, single_k=single_k)
    scratch = [] if single_k else [pltpu.VMEM((tm, tn), jnp.float32)]
    return pl.pallas_call(
        kernel,
        out_shape=jax.ShapeDtypeStruct((m, n), x.dtype),
        grid=grid,
        in_specs=in_specs,
        out_specs=pl.BlockSpec((tm, tn), lambda i, j, k: (i, j)),
        scratch_shapes=scratch,
        compiler_params=_compiler_params(
            ("parallel", "parallel", "arbitrary"),
            (tm, tk), (tk, tn), (tm, tn), (tm, tn), (tm, tn)),
        cost_estimate=pl.CostEstimate(
            flops=2 * m * n * kdim, transcendentals=0,
            bytes_accessed=4 * (m * kdim + kdim * n + 2 * m * n)),
    )(*args)


# ----------------------------------------------------------------------------
# Fused FFN: [LN_in](x) @ W1 -> relu -> @ W2 + b2 + x  [-> LN_out]
# (tiled over d_ff; the (M, d_ff) intermediate never leaves VMEM; the
#  residual is the kernel's own x input, so no duplicate DMA)
# ----------------------------------------------------------------------------
def _ffn_kernel(*refs, has_ln_in, has_ln_out, eps, single_k):
    it = iter(refs)
    x_ref, w1_ref, b1_ref, w2_ref, b2_ref = (next(it) for _ in range(5))
    gin_ref = bin_ref = gout_ref = bout_ref = None
    if has_ln_in:
        gin_ref, bin_ref = next(it), next(it)
    if has_ln_out:
        gout_ref, bout_ref = next(it), next(it)
    o_ref = next(it)
    acc_ref = None if single_k else next(it)

    def partial_sum():
        x = x_ref[...].astype(jnp.float32)
        if has_ln_in:
            x = _apply_ln(x, gin_ref[...].astype(jnp.float32),
                          bin_ref[...].astype(jnp.float32), eps)
        h = jnp.dot(x, w1_ref[...], preferred_element_type=jnp.float32)
        h = jnp.maximum(h + b1_ref[...].astype(jnp.float32), 0.0)
        return jnp.dot(h, w2_ref[...], preferred_element_type=jnp.float32)

    def epilogue(acc):
        y = (acc + b2_ref[...].astype(jnp.float32)
             + x_ref[...].astype(jnp.float32))           # residual = raw input
        if has_ln_out:
            y = _apply_ln(y, gout_ref[...].astype(jnp.float32),
                          bout_ref[...].astype(jnp.float32), eps)
        o_ref[...] = y.astype(o_ref.dtype)

    if single_k:
        epilogue(partial_sum())
    else:
        k = pl.program_id(1)

        @pl.when(k == 0)
        def _init():
            acc_ref[...] = jnp.zeros_like(acc_ref)

        acc_ref[...] += partial_sum()

        @pl.when(k == pl.num_programs(1) - 1)
        def _fin():
            epilogue(acc_ref[...])


def ffn(x, w1, b1, w2, b2, *, ln_in=None, ln_out=None, eps=1e-5):
    m, d = x.shape
    dff = w1.shape[1]
    tm = _pick_tile(m, (256, 128))
    tk = _pick_tile(dff, (512, 256, 128))
    nk = dff // tk
    single_k = nk == 1
    grid = (m // tm, nk)

    in_specs = [
        pl.BlockSpec((tm, d), lambda i, k: (i, 0)),
        pl.BlockSpec((d, tk), lambda i, k: (0, k)),
        pl.BlockSpec((1, tk), lambda i, k: (0, k)),
        pl.BlockSpec((tk, d), lambda i, k: (k, 0)),
        pl.BlockSpec((1, d), lambda i, k: (0, 0)),
    ]
    args = [x, w1, b1.reshape(1, dff), w2, b2.reshape(1, d)]
    if ln_in is not None:
        gamma, beta = ln_in
        in_specs += [pl.BlockSpec((1, d), lambda i, k: (0, 0))] * 2
        args += [gamma.reshape(1, d), beta.reshape(1, d)]
    if ln_out is not None:
        gamma, beta = ln_out
        in_specs += [pl.BlockSpec((1, d), lambda i, k: (0, 0))] * 2
        args += [gamma.reshape(1, d), beta.reshape(1, d)]

    kernel = functools.partial(_ffn_kernel, has_ln_in=ln_in is not None,
                               has_ln_out=ln_out is not None,
                               eps=eps, single_k=single_k)
    scratch = [] if single_k else [pltpu.VMEM((tm, d), jnp.float32)]
    return pl.pallas_call(
        kernel,
        out_shape=jax.ShapeDtypeStruct((m, d), x.dtype),
        grid=grid,
        in_specs=in_specs,
        out_specs=pl.BlockSpec((tm, d), lambda i, k: (i, 0)),
        scratch_shapes=scratch,
        compiler_params=_compiler_params(
            ("parallel", "arbitrary"),
            (tm, d), (d, tk), (tk, d), (tm, d), (tm, d), (tm, d)),
        cost_estimate=pl.CostEstimate(
            flops=4 * m * dff * d, transcendentals=0,
            bytes_accessed=4 * (2 * m * d + 2 * d * dff)),
    )(*args)


# ----------------------------------------------------------------------------
# Multi-head self-attention: all heads per grid step, fused QKV slab input,
# lane-dense (S, D) output, in-kernel key-padding mask.
# ----------------------------------------------------------------------------
def _attn_kernel(*refs, n_head, scale, masked):
    if masked:
        qkv_ref, m_ref, o_ref = refs
    else:
        qkv_ref, o_ref = refs
        m_ref = None
    qkv = qkv_ref[...].astype(jnp.float32)          # (S, 3D)
    d = o_ref.shape[-1]
    dh = d // n_head

    if masked:
        # PyTorch: score += (1 - mask) * -1e9, mask 1 = valid key
        bias = (1.0 - m_ref[...].astype(jnp.float32)) * (-1e9)   # (1, S)

    outs = []
    for h in range(n_head):
        q_h = qkv[:, h * dh:(h + 1) * dh]
        k_h = qkv[:, d + h * dh:d + (h + 1) * dh]
        v_h = qkv[:, 2 * d + h * dh:2 * d + (h + 1) * dh]
        s = lax.dot_general(q_h, k_h, (((1,), (1,)), ((), ())),
                            preferred_element_type=jnp.float32) * scale
        if masked:
            s = s + bias
        m_max = jnp.max(s, axis=-1, keepdims=True)
        p = jnp.exp(s - m_max)
        denom = jnp.sum(p, axis=-1, keepdims=True)
        o = jnp.dot(p, v_h, preferred_element_type=jnp.float32)
        outs.append(o * pl.reciprocal(denom, approx=True))
    o_ref[...] = jnp.concatenate(outs, axis=-1).astype(o_ref.dtype)


def attention(qkv, mask, n_head):
    """qkv: (B, S, 3D) fused Q|K|V; mask: (B, S) float (1 = valid) or None."""
    b, s, d3 = qkv.shape
    d = d3 // 3
    scale = 1.0 / math.sqrt(d // n_head)
    masked = mask is not None

    in_specs = [pl.BlockSpec((None, s, d3), lambda bi: (bi, 0, 0))]
    args = [qkv]
    if masked:
        in_specs.append(pl.BlockSpec((None, 1, s), lambda bi: (bi, 0, 0)))
        args.append(mask.astype(jnp.float32).reshape(b, 1, s))

    kernel = functools.partial(_attn_kernel, n_head=n_head, scale=scale,
                               masked=masked)
    return pl.pallas_call(
        kernel,
        out_shape=jax.ShapeDtypeStruct((b, s, d), qkv.dtype),
        grid=(b,),
        in_specs=in_specs,
        out_specs=pl.BlockSpec((None, s, d), lambda bi: (bi, 0, 0)),
        compiler_params=_compiler_params(("parallel",), (s, d3), (s, d)),
    )(*args)


# ----------------------------------------------------------------------------
# Model glue (reshapes / gathers / parameter handling)
# ----------------------------------------------------------------------------
def encoder_layer(src, mask, p, n_head):
    """TransformerEncoderLayer (post-norm) with fused epilogues."""
    b, s, d = src.shape
    m = b * s
    src2d = src.reshape(m, d)
    qkv = matmul(src2d, p["w_qkv"], p["b_qkv"]).reshape(b, s, 3 * d)
    attn = attention(qkv, mask, n_head).reshape(m, d)
    # norm1(src + W_o(attn))   -- residual + LN fused into out-projection
    src2d = matmul(attn, p["w_o"], p["b_o"], residual=src2d,
                   ln_out=(p["ln1_g"], p["ln1_b"]))
    # norm2(src + FFN(src))    -- residual + LN fused into the FFN kernel
    src2d = ffn(src2d, p["w1"], p["b1"], p["w2"], p["b2"],
                ln_out=(p["ln2_g"], p["ln2_b"]))
    return src2d.reshape(b, s, d)


def decoder_layer(tgt, glob, p, n_head):
    """TransformerDecoderLayerGlobalImproved (pre-norm); pre-LNs fused into
    the QKV / FFN kernels, residuals fused into epilogues."""
    b, s, d = tgt.shape
    m = b * s
    tgt2d = tgt.reshape(m, d)

    # pre-norm self-attention (no mask): LN fused into the QKV matmul,
    # residual fused into the out-projection.
    qkv = matmul(tgt2d, p["w_qkv"], p["b_qkv"],
                 ln_in=(p["ln1_g"], p["ln1_b"])).reshape(b, s, 3 * d)
    attn = attention(qkv, None, n_head).reshape(m, d)
    tgt2d = matmul(attn, p["w_o"], p["b_o"], residual=tgt2d)

    # global memory injection: tgt += linear_global(z) (precomputed), bcast seq
    tgt2d = (tgt2d.reshape(b, s, d) + glob[:, None, :]).reshape(m, d)

    # pre-norm FFN: LN fused into the FFN kernel, residual = raw input
    tgt2d = ffn(tgt2d, p["w1"], p["b1"], p["w2"], p["b2"],
                ln_in=(p["ln2_g"], p["ln2_b"]))
    return tgt2d.reshape(b, s, d)


def cad_embedding(commands, args, p):
    """CADEmbedding with positional embedding (need_pos=True)."""
    b, s = commands.shape
    d = p["cmd_table"].shape[1]
    arg_num = args.shape[-1]
    # TODO(synk): embedding-table gathers stay in XLA (jnp.take); no clean
    # dense Pallas mapping for small-vocab gathers.
    cmd_emb = jnp.take(p["cmd_table"], commands, axis=0)          # (B,S,D)
    arg_e = jnp.take(p["arg_table"], args + 1, axis=0)            # (B,S,A,64)
    arg_flat = arg_e.reshape(b * s, arg_num * p["arg_table"].shape[1])
    pe = p["pos_table"][:s][None, :, :]                           # (1,S,D)
    res = (cmd_emb + pe).reshape(b * s, d)
    emb = matmul(arg_flat, p["w_embed"], p["b_embed"], residual=res)
    return emb.reshape(b, s, d)


def cmcad_forward(enc_command, enc_args, enc_mask, img, params, *,
                  n_head, arg_num):
    """CMCAD_Ablation.forward, mode='AE' (dropout = identity / eval)."""
    b = enc_command.shape[0]
    d = params["embed"]["cmd_table"].shape[1]

    # ---- image branch
    # TODO(synk): ResNet34 backbone not translated; stand-in = global average
    # pool over spatial dims, then the fc head (Linear -> d_model) in Pallas.
    img_feat = jnp.mean(img, axis=(2, 3))                         # (B, C)
    img_z = matmul(img_feat, params["w_img"], params["b_img"])    # (B, D)

    # ---- sequence encoder (4 layers, key-padding mask: 1 = valid)
    mask_f = enc_mask.astype(jnp.float32)
    src = cad_embedding(enc_command, enc_args, params["embed"])
    for lp in params["enc_layers"]:
        src = encoder_layer(src, mask_f, lp, n_head)

    # ---- masked mean pool over valid positions, fuse with image feature
    denom = jnp.sum(mask_f, axis=1, keepdims=True)[:, :, None]    # (B,1,1)
    z = jnp.sum(src * mask_f[:, :, None], axis=1, keepdims=True) / denom
    z = z + img_z[:, None, :]                                     # (B,1,D)
    z2d = z.reshape(b, d)

    # ---- linear_global(z) for ALL decoder layers in one matmul
    dec_layers = params["dec_layers"]
    w_g_all = jnp.concatenate([lp["w_g"] for lp in dec_layers], axis=1)
    b_g_all = jnp.concatenate([lp["b_g"] for lp in dec_layers], axis=0)
    glob_all = matmul(z2d, w_g_all, b_g_all)                      # (B, L*D)

    # ---- decoder: constant (positional) embedding, sliced [:-1]
    s_dec = params["const_pos_table"].shape[0] - 1
    dec = jnp.broadcast_to(params["const_pos_table"][None, :s_dec, :],
                           (b, s_dec, d))
    for li, lp in enumerate(dec_layers):
        glob = glob_all[:, li * d:(li + 1) * d]
        dec = decoder_layer(dec, glob, lp, n_head)

    # ---- CADFCN heads: both heads fused into a single matmul
    m = b * s_dec
    dec2d = dec.reshape(m, d)
    w_heads = jnp.concatenate([params["w_cmd"], params["w_args"]], axis=1)
    b_heads = jnp.concatenate([params["b_cmd"], params["b_args"]], axis=0)
    logits = matmul(dec2d, w_heads, b_heads)
    n_cmd = params["w_cmd"].shape[1]
    arg_dim = params["w_args"].shape[1] // arg_num
    cmd_logits = logits[:, :n_cmd]
    args_logits = logits[:, n_cmd:]
    return (cmd_logits.reshape(b, s_dec, n_cmd),
            args_logits.reshape(b, s_dec, arg_num, arg_dim))


# ----------------------------------------------------------------------------
# Deterministic parameter init
# ----------------------------------------------------------------------------
def _dense_init(key, shape, scale=0.02):
    return jax.random.normal(key, shape, jnp.float32) * scale


def init_params(key, *, d_model, max_path, cmd_types, arg_num, arg_dim,
                img_channels, dff_enc, dff_dec, n_enc_layer, n_dec_layer):
    keys = iter(jax.random.split(key, 256))
    nk = lambda: next(keys)

    def layer_block(dff):
        return {
            "w_qkv": _dense_init(nk(), (d_model, 3 * d_model)),   # W_q|W_k|W_v fused
            "b_qkv": jnp.zeros((3 * d_model,), jnp.float32),
            "w_o": _dense_init(nk(), (d_model, d_model)),
            "b_o": jnp.zeros((d_model,), jnp.float32),
            "w1": _dense_init(nk(), (d_model, dff)),
            "b1": jnp.zeros((dff,), jnp.float32),
            "w2": _dense_init(nk(), (dff, d_model)),
            "b2": jnp.zeros((d_model,), jnp.float32),
            "ln1_g": jnp.ones((d_model,), jnp.float32),
            "ln1_b": jnp.zeros((d_model,), jnp.float32),
            "ln2_g": jnp.ones((d_model,), jnp.float32),
            "ln2_b": jnp.zeros((d_model,), jnp.float32),
        }

    enc_layers = [layer_block(dff_enc) for _ in range(n_enc_layer)]
    dec_layers = []
    for _ in range(n_dec_layer):
        p = layer_block(dff_dec)
        p["w_g"] = _dense_init(nk(), (d_model, d_model))          # linear_global
        p["b_g"] = jnp.zeros((d_model,), jnp.float32)
        dec_layers.append(p)

    arg_table = _dense_init(nk(), (arg_dim + 1, 64))
    arg_table = arg_table.at[0].set(0.0)                          # padding_idx=0

    return {
        "embed": {
            "cmd_table": _dense_init(nk(), (cmd_types, d_model)),
            "arg_table": arg_table,
            "w_embed": _dense_init(nk(), (64 * arg_num, d_model)),
            "b_embed": jnp.zeros((d_model,), jnp.float32),
            "pos_table": _dense_init(nk(), (max_path, d_model)),
        },
        "const_pos_table": _dense_init(nk(), (max_path, d_model)),
        "w_img": _dense_init(nk(), (img_channels, d_model)),
        "b_img": jnp.zeros((d_model,), jnp.float32),
        "enc_layers": enc_layers,
        "dec_layers": dec_layers,
        "w_cmd": _dense_init(nk(), (d_model, cmd_types)),
        "b_cmd": jnp.zeros((cmd_types,), jnp.float32),
        "w_args": _dense_init(nk(), (d_model, arg_num * (arg_dim + 1))),
        "b_args": jnp.zeros((arg_num * (arg_dim + 1),), jnp.float32),
    }


if __name__ == "__main__":
    # Small, module-consistent test shapes.
    B = 2
    MAX_PATH = 8
    D_MODEL = 32
    N_HEAD = 4
    CMD_TYPES = 6
    ARG_NUM = 4
    ARG_DIM = 16
    IMG_C, IMG_HW = 4, 16
    N_ENC_LAYER = 4        # hard-coded n_layer=4 in CMCAD_Ablation's seq_encoder
    N_DEC_LAYER = 2
    DFF_ENC = 512          # TransformerEncoderLayer default dim_feedforward
    DFF_DEC = 2048         # TransformerDecoderLayerGlobalImproved default

    key = jax.random.PRNGKey(0)
    k_cmd, k_arg, k_img, k_par = jax.random.split(key, 4)

    enc_command = jax.random.randint(k_cmd, (B, MAX_PATH), 0, CMD_TYPES)
    enc_args = jax.random.randint(k_arg, (B, MAX_PATH, ARG_NUM), -1, ARG_DIM)
    valid_len = jnp.array([MAX_PATH, MAX_PATH - 2])
    enc_mask = (jnp.arange(MAX_PATH)[None, :] < valid_len[:, None]).astype(jnp.float32)
    img = jax.random.normal(k_img, (B, IMG_C, IMG_HW, IMG_HW), jnp.float32)

    params = init_params(
        k_par, d_model=D_MODEL, max_path=MAX_PATH, cmd_types=CMD_TYPES,
        arg_num=ARG_NUM, arg_dim=ARG_DIM, img_channels=IMG_C,
        dff_enc=DFF_ENC, dff_dec=DFF_DEC,
        n_enc_layer=N_ENC_LAYER, n_dec_layer=N_DEC_LAYER)

    fwd = jax.jit(functools.partial(cmcad_forward, n_head=N_HEAD, arg_num=ARG_NUM))
    cmd_logits, args_logits = fwd(enc_command, enc_args, enc_mask, img, params)
    cmd_logits, args_logits = jax.block_until_ready((cmd_logits, args_logits))

    assert cmd_logits.shape == (B, MAX_PATH - 1, CMD_TYPES)
    assert args_logits.shape == (B, MAX_PATH - 1, ARG_NUM, ARG_DIM + 1)
    assert bool(jnp.all(jnp.isfinite(cmd_logits)))
    assert bool(jnp.all(jnp.isfinite(args_logits)))
    print("KERNEL_OK")
</pallas_src>

<mosaic_0001>
module attributes {stable_mosaic.version = 11 : i64} {
  func.func @_matmul_kernel(%arg0: i32, %arg1: i32, %arg2: i32, %arg3: memref<16x256xf32, #tpu.memory_space<vmem>>, %arg4: memref<256x32xf32, #tpu.memory_space<vmem>>, %arg5: memref<1x32xf32, #tpu.memory_space<vmem>>, %arg6: memref<16x32xf32, #tpu.memory_space<vmem>>, %arg7: memref<16x32xf32, #tpu.memory_space<vmem>>) attributes {dimension_semantics = [#tpu.dimension_semantics<parallel>, #tpu.dimension_semantics<parallel>, #tpu.dimension_semantics<arbitrary>], iteration_bounds = array<i64: 1, 1, 1>, scalar_prefetch = 0 : i64, scratch_operands = 0 : i64, tpu.core_type = #tpu.core_type<tc>, window_params = [{transform_indices = @transform_0, window_bounds = array<i64: 16, 256>}, {transform_indices = @transform_1, window_bounds = array<i64: 256, 32>}, {transform_indices = @transform_2, window_bounds = array<i64: 1, 32>}, {transform_indices = @transform_3, window_bounds = array<i64: 16, 32>}, {transform_indices = @transform_4, window_bounds = array<i64: 16, 32>}]} {
    %c0 = arith.constant 0 : index
    %c0_0 = arith.constant 0 : index
    %0 = vector.load %arg3[%c0, %c0_0] : memref<16x256xf32, #tpu.memory_space<vmem>>, vector<16x256xf32>
    %c0_1 = arith.constant 0 : index
    %c0_2 = arith.constant 0 : index
    %1 = vector.load %arg4[%c0_1, %c0_2] : memref<256x32xf32, #tpu.memory_space<vmem>>, vector<256x32xf32>
    %cst = arith.constant dense<0.000000e+00> : vector<16x32xf32>
    %2 = tpu.matmul %0, %1, %cst {dimension_numbers = #tpu.dot_dimension_numbers<[1], [0], [0], [1], [0, 0, 1, 1], [], []>} : vector<16x256xf32>, vector<256x32xf32>, vector<16x32xf32> -> vector<16x32xf32>
    %c0_3 = arith.constant 0 : index
    %c0_4 = arith.constant 0 : index
    %3 = vector.load %arg5[%c0_3, %c0_4] : memref<1x32xf32, #tpu.memory_space<vmem>>, vector<1x32xf32>
    %4 = vector.broadcast %3 : vector<1x32xf32> to vector<16x32xf32>
    %5 = arith.addf %2, %4 : vector<16x32xf32>
    %c0_5 = arith.constant 0 : index
    %c0_6 = arith.constant 0 : index
    %6 = vector.load %arg6[%c0_5, %c0_6] : memref<16x32xf32, #tpu.memory_space<vmem>>, vector<16x32xf32>
    %7 = arith.addf %5, %6 : vector<16x32xf32>
    %c0_7 = arith.constant 0 : index
    %c0_8 = arith.constant 0 : index
    %8 = vector.load %arg7[%c0_7, %c0_8] : memref<16x32xf32, #tpu.memory_space<vmem>>, vector<16x32xf32>
    tpu.vector_store %arg7[%c0_7, %c0_8], %7 {strides = array<i32>} : memref<16x32xf32, #tpu.memory_space<vmem>>, vector<16x32xf32>,
    return
  }
  func.func @transform_0(%arg0: i32, %arg1: i32, %arg2: i32) -> (i32, i32) {
    %c0_i32 = arith.constant 0 : i32
    return %arg0, %arg2 : i32, i32
  }
  func.func @transform_1(%arg0: i32, %arg1: i32, %arg2: i32) -> (i32, i32) {
    %c0_i32 = arith.constant 0 : i32
    return %arg2, %arg1 : i32, i32
  }
  func.func @transform_2(%arg0: i32, %arg1: i32, %arg2: i32) -> (i32, i32) {
    %c0_i32 = arith.constant 0 : i32
    %c0_i32_0 = arith.constant 0 : i32
    return %c0_i32, %arg1 : i32, i32
  }
  func.func @transform_3(%arg0: i32, %arg1: i32, %arg2: i32) -> (i32, i32) {
    %c0_i32 = arith.constant 0 : i32
    return %arg0, %arg1 : i32, i32
  }
  func.func @transform_4(%arg0: i32, %arg1: i32, %arg2: i32) -> (i32, i32) {
    %c0_i32 = arith.constant 0 : i32
    return %arg0, %arg1 : i32, i32
  }
}

module attributes {stable_mosaic.version = 11 : i64} {
  func.func @_matmul_kernel(%arg0: i32, %arg1: i32, %arg2: i32, %arg3: memref<16x32xf32, #tpu.memory_space<vmem>>, %arg4: memref<32x96xf32, #tpu.memory_space<vmem>>, %arg5: memref<1x96xf32, #tpu.memory_space<vmem>>, %arg6: memref<16x96xf32, #tpu.memory_space<vmem>>) attributes {dimension_semantics = [#tpu.dimension_semantics<parallel>, #tpu.dimension_semantics<parallel>, #tpu.dimension_semantics<arbitrary>], iteration_bounds = array<i64: 1, 1, 1>, scalar_prefetch = 0 : i64, scratch_operands = 0 : i64, tpu.core_type = #tpu.core_type<tc>, window_params = [{transform_indices = @transform_0, window_bounds = array<i64: 16, 32>}, {transform_indices = @transform_1, window_bounds = array<i64: 32, 96>}, {transform_indices = @transform_2, window_bounds = array<i64: 1, 96>}, {transform_indices = @transform_3, window_bounds = array<i64: 16, 96>}]} {
    %c0 = arith.constant 0 : index
    %c0_0 = arith.constant 0 : index
    %0 = vector.load %arg3[%c0, %c0_0] : memref<16x32xf32, #tpu.memory_space<vmem>>, vector<16x32xf32>
    %c0_1 = arith.constant 0 : index
    %c0_2 = arith.constant 0 : index
    %1 = vector.load %arg4[%c0_1, %c0_2] : memref<32x96xf32, #tpu.memory_space<vmem>>, vector<32x96xf32>
    %cst = arith.constant dense<0.000000e+00> : vector<16x96xf32>
    %2 = tpu.matmul %0, %1, %cst {dimension_numbers = #tpu.dot_dimension_numbers<[1], [0], [0], [1], [0, 0, 1, 1], [], []>} : vector<16x32xf32>, vector<32x96xf32>, vector<16x96xf32> -> vector<16x96xf32>
    %c0_3 = arith.constant 0 : index
    %c0_4 = arith.constant 0 : index
    %3 = vector.load %arg5[%c0_3, %c0_4] : memref<1x96xf32, #tpu.memory_space<vmem>>, vector<1x96xf32>
    %4 = vector.broadcast %3 : vector<1x96xf32> to vector<16x96xf32>
    %5 = arith.addf %2, %4 : vector<16x96xf32>
    %c0_5 = arith.constant 0 : index
    %c0_6 = arith.constant 0 : index
    %6 = vector.load %arg6[%c0_5, %c0_6] : memref<16x96xf32, #tpu.memory_space<vmem>>, vector<16x96xf32>
    tpu.vector_store %arg6[%c0_5, %c0_6], %5 {strides = array<i32>} : memref<16x96xf32, #tpu.memory_space<vmem>>, vector<16x96xf32>,
    return
  }
  func.func @transform_0(%arg0: i32, %arg1: i32, %arg2: i32) -> (i32, i32) {
    %c0_i32 = arith.constant 0 : i32
    return %arg0, %arg2 : i32, i32
  }
  func.func @transform_1(%arg0: i32, %arg1: i32, %arg2: i32) -> (i32, i32) {
    %c0_i32 = arith.constant 0 : i32
    return %arg2, %arg1 : i32, i32
  }
  func.func @transform_2(%arg0: i32, %arg1: i32, %arg2: i32) -> (i32, i32) {
    %c0_i32 = arith.constant 0 : i32
    %c0_i32_0 = arith.constant 0 : i32
    return %c0_i32, %arg1 : i32, i32
  }
  func.func @transform_3(%arg0: i32, %arg1: i32, %arg2: i32) -> (i32, i32) {
    %c0_i32 = arith.constant 0 : i32
    return %arg0, %arg1 : i32, i32
  }
}

module attributes {stable_mosaic.version = 11 : i64} {
  func.func @_matmul_kernel(%arg0: i32, %arg1: i32, %arg2: i32, %arg3: memref<16x32xf32, #tpu.memory_space<vmem>>, %arg4: memref<32x32xf32, #tpu.memory_space<vmem>>, %arg5: memref<1x32xf32, #tpu.memory_space<vmem>>, %arg6: memref<16x32xf32, #tpu.memory_space<vmem>>, %arg7: memref<1x32xf32, #tpu.memory_space<vmem>>, %arg8: memref<1x32xf32, #tpu.memory_space<vmem>>, %arg9: memref<16x32xf32, #tpu.memory_space<vmem>>) attributes {dimension_semantics = [#tpu.dimension_semantics<parallel>, #tpu.dimension_semantics<parallel>, #tpu.dimension_semantics<arbitrary>], iteration_bounds = array<i64: 1, 1, 1>, scalar_prefetch = 0 : i64, scratch_operands = 0 : i64, tpu.core_type = #tpu.core_type<tc>, window_params = [{transform_indices = @transform_0, window_bounds = array<i64: 16, 32>}, {transform_indices = @transform_1, window_bounds = array<i64: 32, 32>}, {transform_indices = @transform_2, window_bounds = array<i64: 1, 32>}, {transform_indices = @transform_3, window_bounds = array<i64: 16, 32>}, {transform_indices = @transform_4, window_bounds = array<i64: 1, 32>}, {transform_indices = @transform_5, window_bounds = array<i64: 1, 32>}, {transform_indices = @transform_6, window_bounds = array<i64: 16, 32>}]} {
    %c0 = arith.constant 0 : index
    %c0_0 = arith.constant 0 : index
    %0 = vector.load %arg3[%c0, %c0_0] : memref<16x32xf32, #tpu.memory_space<vmem>>, vector<16x32xf32>
    %c0_1 = arith.constant 0 : index
    %c0_2 = arith.constant 0 : index
    %1 = vector.load %arg4[%c0_1, %c0_2] : memref<32x32xf32, #tpu.memory_space<vmem>>, vector<32x32xf32>
    %cst = arith.constant dense<0.000000e+00> : vector<16x32xf32>
    %2 = tpu.matmul %0, %1, %cst {dimension_numbers = #tpu.dot_dimension_numbers<[1], [0], [0], [1], [0, 0, 1, 1], [], []>} : vector<16x32xf32>, vector<32x32xf32>, vector<16x32xf32> -> vector<16x32xf32>
    %c0_3 = arith.constant 0 : index
    %c0_4 = arith.constant 0 : index
    %3 = vector.load %arg5[%c0_3, %c0_4] : memref<1x32xf32, #tpu.memory_space<vmem>>, vector<1x32xf32>
    %4 = vector.broadcast %3 : vector<1x32xf32> to vector<16x32xf32>
    %5 = arith.addf %2, %4 : vector<16x32xf32>
    %c0_5 = arith.constant 0 : index
    %c0_6 = arith.constant 0 : index
    %6 = vector.load %arg6[%c0_5, %c0_6] : memref<16x32xf32, #tpu.memory_space<vmem>>, vector<16x32xf32>
    %7 = arith.addf %5, %6 : vector<16x32xf32>
    %c0_7 = arith.constant 0 : index
    %c0_8 = arith.constant 0 : index
    %8 = vector.load %arg7[%c0_7, %c0_8] : memref<1x32xf32, #tpu.memory_space<vmem>>, vector<1x32xf32>
    %c0_9 = arith.constant 0 : index
    %c0_10 = arith.constant 0 : index
    %9 = vector.load %arg8[%c0_9, %c0_10] : memref<1x32xf32, #tpu.memory_space<vmem>>, vector<1x32xf32>
    %cst_11 = arith.constant dense<0.000000e+00> : vector<16xf32>
    %10 = vector.multi_reduction <add>, %7, %cst_11 [1] : vector<16x32xf32> to vector<16xf32>
    %11 = vector.shape_cast %10 : vector<16xf32> to vector<16x1xf32>
    %cst_12 = arith.constant 3.200000e+01 : f32
    %12 = vector.broadcast %cst_12 : f32 to vector<16x1xf32>
    %13 = arith.divf %11, %12 : vector<16x1xf32>
    %14 = vector.broadcast %13 : vector<16x1xf32> to vector<16x32xf32>
    %15 = arith.subf %7, %14 : vector<16x32xf32>
    %16 = arith.mulf %15, %15 : vector<16x32xf32>
    %cst_13 = arith.constant dense<0.000000e+00> : vector<16xf32>
    %17 = vector.multi_reduction <add>, %16, %cst_13 [1] : vector<16x32xf32> to vector<16xf32>
    %18 = vector.shape_cast %17 : vector<16xf32> to vector<16x1xf32>
    %cst_14 = arith.constant 3.200000e+01 : f32
    %19 = vector.broadcast %cst_14 : f32 to vector<16x1xf32>
    %20 = arith.divf %18, %19 : vector<16x1xf32>
    %21 = vector.broadcast %13 : vector<16x1xf32> to vector<16x32xf32>
    %22 = arith.subf %7, %21 : vector<16x32xf32>
    %cst_15 = arith.constant 9.99999974E-6 : f32
    %23 = vector.broadcast %cst_15 : f32 to vector<16x1xf32>
    %24 = arith.addf %20, %23 : vector<16x1xf32>
    %25 = math.rsqrt %24 : vector<16x1xf32>
    %26 = vector.broadcast %25 : vector<16x1xf32> to vector<16x32xf32>
    %27 = arith.mulf %22, %26 : vector<16x32xf32>
    %28 = vector.broadcast %8 : vector<1x32xf32> to vector<16x32xf32>
    %29 = arith.mulf %27, %28 : vector<16x32xf32>
    %30 = vector.broadcast %9 : vector<1x32xf32> to vector<16x32xf32>
    %31 = arith.addf %29, %30 : vector<16x32xf32>
    %c0_16 = arith.constant 0 : index
    %c0_17 = arith.constant 0 : index
    %32 = vector.load %arg9[%c0_16, %c0_17] : memref<16x32xf32, #tpu.memory_space<vmem>>, vector<16x32xf32>
    tpu.vector_store %arg9[%c0_16, %c0_17], %31 {strides = array<i32>} : memref<16x32xf32, #tpu.memory_space<vmem>>, vector<16x32xf32>,
    return
  }
  func.func @transform_0(%arg0: i32, %arg1: i32, %arg2: i32) -> (i32, i32) {
    %c0_i32 = arith.constant 0 : i32
    return %arg0, %arg2 : i32, i32
  }
  func.func @transform_1(%arg0: i32, %arg1: i32, %arg2: i32) -> (i32, i32) {
    %c0_i32 = arith.constant 0 : i32
    return %arg2, %arg1 : i32, i32
  }
  func.func @transform_2(%arg0: i32, %arg1: i32, %arg2: i32) -> (i32, i32) {
    %c0_i32 = arith.constant 0 : i32
    %c0_i32_0 = arith.constant 0 : i32
    return %c0_i32, %arg1 : i32, i32
  }
  func.func @transform_3(%arg0: i32, %arg1: i32, %arg2: i32) -> (i32, i32) {
    %c0_i32 = arith.constant 0 : i32
    return %arg0, %arg1 : i32, i32
  }
  func.func @transform_4(%arg0: i32, %arg1: i32, %arg2: i32) -> (i32, i32) {
    %c0_i32 = arith.constant 0 : i32
    %c0_i32_0 = arith.constant 0 : i32
    return %c0_i32, %arg1 : i32, i32
  }
  func.func @transform_5(%arg0: i32, %arg1: i32, %arg2: i32) -> (i32, i32) {
    %c0_i32 = arith.constant 0 : i32
    %c0_i32_0 = arith.constant 0 : i32
    return %c0_i32, %arg1 : i32, i32
  }
  func.func @transform_6(%arg0: i32, %arg1: i32, %arg2: i32) -> (i32, i32) {
    %c0_i32 = arith.constant 0 : i32
    return %arg0, %arg1 : i32, i32
  }
}

module attributes {stable_mosaic.version = 11 : i64} {
  func.func @_attn_kernel(%arg0: i32, %arg1: memref<1x8x96xf32, #tpu.memory_space<vmem>>, %arg2: memref<1x1x8xf32, #tpu.memory_space<vmem>>, %arg3: memref<1x8x32xf32, #tpu.memory_space<vmem>>) attributes {dimension_semantics = [#tpu.dimension_semantics<parallel>], iteration_bounds = array<i64: 2>, scalar_prefetch = 0 : i64, scratch_operands = 0 : i64, tpu.core_type = #tpu.core_type<tc>, window_params = [{transform_indices = @transform_0, window_bounds = array<i64: 1, 8, 96>}, {transform_indices = @transform_1, window_bounds = array<i64: 1, 1, 8>}, {transform_indices = @transform_2, window_bounds = array<i64: 1, 8, 32>}]} {
    %c0 = arith.constant 0 : index
    %c0_0 = arith.constant 0 : index
    %c0_1 = arith.constant 0 : index
    %0 = vector.load %arg1[%c0, %c0_0, %c0_1] : memref<1x8x96xf32, #tpu.memory_space<vmem>>, vector<1x8x96xf32>
    %1 = vector.shape_cast %0 : vector<1x8x96xf32> to vector<8x96xf32>
    %c0_2 = arith.constant 0 : index
    %c0_3 = arith.constant 0 : index
    %c0_4 = arith.constant 0 : index
    %2 = vector.load %arg2[%c0_2, %c0_3, %c0_4] : memref<1x1x8xf32, #tpu.memory_space<vmem>>, vector<1x1x8xf32>
    %3 = vector.shape_cast %2 : vector<1x1x8xf32> to vector<1x8xf32>
    %cst = arith.constant 1.000000e+00 : f32
    %4 = vector.broadcast %cst : f32 to vector<1x8xf32>
    %5 = arith.subf %4, %3 : vector<1x8xf32>
    %cst_5 = arith.constant -1.000000e+09 : f32
    %6 = vector.broadcast %cst_5 : f32 to vector<1x8xf32>
    %7 = arith.mulf %5, %6 : vector<1x8xf32>
    %8 = vector.extract_strided_slice %1 {offsets = [0, 0], sizes = [8, 8], strides = [1, 1]} : vector<8x96xf32> to vector<8x8xf32>
    %9 = vector.extract_strided_slice %1 {offsets = [0, 32], sizes = [8, 8], strides = [1, 1]} : vector<8x96xf32> to vector<8x8xf32>
    %10 = vector.extract_strided_slice %1 {offsets = [0, 64], sizes = [8, 8], strides = [1, 1]} : vector<8x96xf32> to vector<8x8xf32>
    %cst_6 = arith.constant dense<0.000000e+00> : vector<8x8xf32>
    %11 = tpu.matmul %8, %9, %cst_6 {dimension_numbers = #tpu.dot_dimension_numbers<[1], [1], [0], [0], [0, 0, 1, 0], [], []>} : vector<8x8xf32>, vector<8x8xf32>, vector<8x8xf32> -> vector<8x8xf32>
    %cst_7 = arith.constant 0.353553385 : f32
    %12 = vector.broadcast %cst_7 : f32 to vector<8x8xf32>
    %13 = arith.mulf %11, %12 : vector<8x8xf32>
    %14 = vector.broadcast %7 : vector<1x8xf32> to vector<8x8xf32>
    %15 = arith.addf %13, %14 : vector<8x8xf32>
    %cst_8 = arith.constant dense<0xFF800000> : vector<8xf32>
    %16 = vector.multi_reduction <maximumf>, %15, %cst_8 [1] : vector<8x8xf32> to vector<8xf32>
    %17 = vector.shape_cast %16 : vector<8xf32> to vector<8x1xf32>
    %18 = vector.broadcast %17 : vector<8x1xf32> to vector<8x8xf32>
    %19 = arith.subf %15, %18 : vector<8x8xf32>
    %20 = math.exp %19 : vector<8x8xf32>
    %cst_9 = arith.constant dense<0.000000e+00> : vector<8xf32>
    %21 = vector.multi_reduction <add>, %20, %cst_9 [1] : vector<8x8xf32> to vector<8xf32>
    %22 = vector.shape_cast %21 : vector<8xf32> to vector<8x1xf32>
    %cst_10 = arith.constant dense<0.000000e+00> : vector<8x8xf32>
    %23 = tpu.matmul %20, %10, %cst_10 {dimension_numbers = #tpu.dot_dimension_numbers<[1], [0], [0], [1], [0, 0, 1, 1], [], []>} : vector<8x8xf32>, vector<8x8xf32>, vector<8x8xf32> -> vector<8x8xf32>
    %24 = tpu.reciprocal %22 {approx = true} : vector<8x1xf32> -> vector<8x1xf32>
    %25 = vector.broadcast %24 : vector<8x1xf32> to vector<8x8xf32>
    %26 = arith.mulf %23, %25 : vector<8x8xf32>
    %27 = vector.extract_strided_slice %1 {offsets = [0, 8], sizes = [8, 8], strides = [1, 1]} : vector<8x96xf32> to vector<8x8xf32>
    %28 = vector.extract_strided_slice %1 {offsets = [0, 40], sizes = [8, 8], strides = [1, 1]} : vector<8x96xf32> to vector<8x8xf32>
    %29 = vector.extract_strided_slice %1 {offsets = [0, 72], sizes = [8, 8], strides = [1, 1]} : vector<8x96xf32> to vector<8x8xf32>
    %cst_11 = arith.constant dense<0.000000e+00> : vector<8x8xf32>
    %30 = tpu.matmul %27, %28, %cst_11 {dimension_numbers = #tpu.dot_dimension_numbers<[1], [1], [0], [0], [0, 0, 1, 0], [], []>} : vector<8x8xf32>, vector<8x8xf32>, vector<8x8xf32> -> vector<8x8xf32>
    %cst_12 = arith.constant 0.353553385 : f32
    %31 = vector.broadcast %cst_12 : f32 to vector<8x8xf32>
    %32 = arith.mulf %30, %31 : vector<8x8xf32>
    %33 = vector.broadcast %7 : vector<1x8xf32> to vector<8x8xf32>
    %34 = arith.addf %32, %33 : vector<8x8xf32>
    %cst_13 = arith.constant dense<0xFF800000> : vector<8xf32>
    %35 = vector.multi_reduction <maximumf>, %34, %cst_13 [1] : vector<8x8xf32> to vector<8xf32>
    %36 = vector.shape_cast %35 : vector<8xf32> to vector<8x1xf32>
    %37 = vector.broadcast %36 : vector<8x1xf32> to vector<8x8xf32>
    %38 = arith.subf %34, %37 : vector<8x8xf32>
    %39 = math.exp %38 : vector<8x8xf32>
    %cst_14 = arith.constant dense<0.000000e+00> : vector<8xf32>
    %40 = vector.multi_reduction <add>, %39, %cst_14 [1] : vector<8x8xf32> to vector<8xf32>
    %41 = vector.shape_cast %40 : vector<8xf32> to vector<8x1xf32>
    %cst_15 = arith.constant dense<0.000000e+00> : vector<8x8xf32>
    %42 = tpu.matmul %39, %29, %cst_15 {dimension_numbers = #tpu.dot_dimension_numbers<[1], [0], [0], [1], [0, 0, 1, 1], [], []>} : vector<8x8xf32>, vector<8x8xf32>, vector<8x8xf32> -> vector<8x8xf32>
    %43 = tpu.reciprocal %41 {approx = true} : vector<8x1xf32> -> vector<8x1xf32>
    %44 = vector.broadcast %43 : vector<8x1xf32> to vector<8x8xf32>
    %45 = arith.mulf %42, %44 : vector<8x8xf32>
    %46 = vector.extract_strided_slice %1 {offsets = [0, 16], sizes = [8, 8], strides = [1, 1]} : vector<8x96xf32> to vector<8x8xf32>
    %47 = vector.extract_strided_slice %1 {offsets = [0, 48], sizes = [8, 8], strides = [1, 1]} : vector<8x96xf32> to vector<8x8xf32>
    %48 = vector.extract_strided_slice %1 {offsets = [0, 80], sizes = [8, 8], strides = [1, 1]} : vector<8x96xf32> to vector<8x8xf32>
    %cst_16 = arith.constant dense<0.000000e+00> : vector<8x8xf32>
    %49 = tpu.matmul %46, %47, %cst_16 {dimension_numbers = #tpu.dot_dimension_numbers<[1], [1], [0], [0], [0, 0, 1, 0], [], []>} : vector<8x8xf32>, vector<8x8xf32>, vector<8x8xf32> -> vector<8x8xf32>
    %cst_17 = arith.constant 0.353553385 : f32
    %50 = vector.broadcast %cst_17 : f32 to vector<8x8xf32>
    %51 = arith.mulf %49, %50 : vector<8x8xf32>
    %52 = vector.broadcast %7 : vector<1x8xf32> to vector<8x8xf32>
    %53 = arith.addf %51, %52 : vector<8x8xf32>
    %cst_18 = arith.constant dense<0xFF800000> : vector<8xf32>
    %54 = vector.multi_reduction <maximumf>, %53, %cst_18 [1] : vector<8x8xf32> to vector<8xf32>
    %55 = vector.shape_cast %54 : vector<8xf32> to vector<8x1xf32>
    %56 = vector.broadcast %55 : vector<8x1xf32> to vector<8x8xf32>
    %57 = arith.subf %53, %56 : vector<8x8xf32>
    %58 = math.exp %57 : vector<8x8xf32>
    %cst_19 = arith.constant dense<0.000000e+00> : vector<8xf32>
    %59 = vector.multi_reduction <add>, %58, %cst_19 [1] : vector<8x8xf32> to vector<8xf32>
    %60 = vector.shape_cast %59 : vector<8xf32> to vector<8x1xf32>
    %cst_20 = arith.constant dense<0.000000e+00> : vector<8x8xf32>
    %61 = tpu.matmul %58, %48, %cst_20 {dimension_numbers = #tpu.dot_dimension_numbers<[1], [0], [0], [1], [0, 0, 1, 1], [], []>} : vector<8x8xf32>, vector<8x8xf32>, vector<8x8xf32> -> vector<8x8xf32>
    %62 = tpu.reciprocal %60 {approx = true} : vector<8x1xf32> -> vector<8x1xf32>
    %63 = vector.broadcast %62 : vector<8x1xf32> to vector<8x8xf32>
    %64 = arith.mulf %61, %63 : vector<8x8xf32>
    %65 = vector.extract_strided_slice %1 {offsets = [0, 24], sizes = [8, 8], strides = [1, 1]} : vector<8x96xf32> to vector<8x8xf32>
    %66 = vector.extract_strided_slice %1 {offsets = [0, 56], sizes = [8, 8], strides = [1, 1]} : vector<8x96xf32> to vector<8x8xf32>
    %67 = vector.extract_strided_slice %1 {offsets = [0, 88], sizes = [8, 8], strides = [1, 1]} : vector<8x96xf32> to vector<8x8xf32>
    %cst_21 = arith.constant dense<0.000000e+00> : vector<8x8xf32>
    %68 = tpu.matmul %65, %66, %cst_21 {dimension_numbers = #tpu.dot_dimension_numbers<[1], [1], [0], [0], [0, 0, 1, 0], [], []>} : vector<8x8xf32>, vector<8x8xf32>, vector<8x8xf32> -> vector<8x8xf32>
    %cst_22 = arith.constant 0.353553385 : f32
    %69 = vector.broadcast %cst_22 : f32 to vector<8x8xf32>
    %70 = arith.mulf %68, %69 : vector<8x8xf32>
    %71 = vector.broadcast %7 : vector<1x8xf32> to vector<8x8xf32>
    %72 = arith.addf %70, %71 : vector<8x8xf32>
    %cst_23 = arith.constant dense<0xFF800000> : vector<8xf32>
    %73 = vector.multi_reduction <maximumf>, %72, %cst_23 [1] : vector<8x8xf32> to vector<8xf32>
    %74 = vector.shape_cast %73 : vector<8xf32> to vector<8x1xf32>
    %75 = vector.broadcast %74 : vector<8x1xf32> to vector<8x8xf32>
    %76 = arith.subf %72, %75 : vector<8x8xf32>
    %77 = math.exp %76 : vector<8x8xf32>
    %cst_24 = arith.constant dense<0.000000e+00> : vector<8xf32>
    %78 = vector.multi_reduction <add>, %77, %cst_24 [1] : vector<8x8xf32> to vector<8xf32>
    %79 = vector.shape_cast %78 : vector<8xf32> to vector<8x1xf32>
    %cst_25 = arith.constant dense<0.000000e+00> : vector<8x8xf32>
    %80 = tpu.matmul %77, %67, %cst_25 {dimension_numbers = #tpu.dot_dimension_numbers<[1], [0], [0], [1], [0, 0, 1, 1], [], []>} : vector<8x8xf32>, vector<8x8xf32>, vector<8x8xf32> -> vector<8x8xf32>
    %81 = tpu.reciprocal %79 {approx = true} : vector<8x1xf32> -> vector<8x1xf32>
    %82 = vector.broadcast %81 : vector<8x1xf32> to vector<8x8xf32>
    %83 = arith.mulf %80, %82 : vector<8x8xf32>
    %84 = tpu.concatenate %26, %45, %64, %83 in 1 : vector<8x8xf32>, vector<8x8xf32>, vector<8x8xf32>, vector<8x8xf32> -> vector<8x32xf32>
    %c0_26 = arith.constant 0 : index
    %c0_27 = arith.constant 0 : index
    %c0_28 = arith.constant 0 : index
    %85 = vector.load %arg3[%c0_26, %c0_27, %c0_28] : memref<1x8x32xf32, #tpu.memory_space<vmem>>, vector<1x8x32xf32>
    %86 = vector.shape_cast %85 : vector<1x8x32xf32> to vector<8x32xf32>
    %87 = vector.shape_cast %84 : vector<8x32xf32> to vector<1x8x32xf32>
    tpu.vector_store %arg3[%c0_26, %c0_27, %c0_28], %87 {strides = array<i32>} : memref<1x8x32xf32, #tpu.memory_space<vmem>>, vector<1x8x32xf32>,
    return
  }
  func.func @transform_0(%arg0: i32) -> (i32, i32, i32) {
    %c0_i32 = arith.constant 0 : i32
    %c0_i32_0 = arith.constant 0 : i32
    %c0_i32_1 = arith.constant 0 : i32
    return %arg0, %c0_i32, %c0_i32_0 : i32, i32, i32
  }
  func.func @transform_1(%arg0: i32) -> (i32, i32, i32) {
    %c0_i32 = arith.constant 0 : i32
    %c0_i32_0 = arith.constant 0 : i32
    %c0_i32_1 = arith.constant 0 : i32
    return %arg0, %c0_i32, %c0_i32_0 : i32, i32, i32
  }
  func.func @transform_2(%arg0: i32) -> (i32, i32, i32) {
    %c0_i32 = arith.constant 0 : i32
    %c0_i32_0 = arith.constant 0 : i32
    %c0_i32_1 = arith.constant 0 : i32
    return %arg0, %c0_i32, %c0_i32_0 : i32, i32, i32
  }
}

module attributes {stable_mosaic.version = 11 : i64} {
  func.func @_ffn_kernel(%arg0: i32, %arg1: i32, %arg2: memref<16x32xf32, #tpu.memory_space<vmem>>, %arg3: memref<32x512xf32, #tpu.memory_space<vmem>>, %arg4: memref<1x512xf32, #tpu.memory_space<vmem>>, %arg5: memref<512x32xf32, #tpu.memory_space<vmem>>, %arg6: memref<1x32xf32, #tpu.memory_space<vmem>>, %arg7: memref<1x32xf32, #tpu.memory_space<vmem>>, %arg8: memref<1x32xf32, #tpu.memory_space<vmem>>, %arg9: memref<16x32xf32, #tpu.memory_space<vmem>>) attributes {dimension_semantics = [#tpu.dimension_semantics<parallel>, #tpu.dimension_semantics<arbitrary>], iteration_bounds = array<i64: 1, 1>, scalar_prefetch = 0 : i64, scratch_operands = 0 : i64, tpu.core_type = #tpu.core_type<tc>, window_params = [{transform_indices = @transform_0, window_bounds = array<i64: 16, 32>}, {transform_indices = @transform_1, window_bounds = array<i64: 32, 512>}, {transform_indices = @transform_2, window_bounds = array<i64: 1, 512>}, {transform_indices = @transform_3, window_bounds = array<i64: 512, 32>}, {pipeline_mode = #tpu.pipeline_mode<synchronous>, transform_indices = @transform_4, window_bounds = array<i64: 1, 32>}, {pipeline_mode = #tpu.pipeline_mode<synchronous>, transform_indices = @transform_5, window_bounds = array<i64: 1, 32>}, {pipeline_mode = #tpu.pipeline_mode<synchronous>, transform_indices = @transform_6, window_bounds = array<i64: 1, 32>}, {transform_indices = @transform_7, window_bounds = array<i64: 16, 32>}]} {
    %c0 = arith.constant 0 : index
    %c0_0 = arith.constant 0 : index
    %0 = vector.load %arg2[%c0, %c0_0] : memref<16x32xf32, #tpu.memory_space<vmem>>, vector<16x32xf32>
    %c0_1 = arith.constant 0 : index
    %c0_2 = arith.constant 0 : index
    %1 = vector.load %arg3[%c0_1, %c0_2] : memref<32x512xf32, #tpu.memory_space<vmem>>, vector<32x512xf32>
    %cst = arith.constant dense<0.000000e+00> : vector<16x512xf32>
    %2 = tpu.matmul %0, %1, %cst {dimension_numbers = #tpu.dot_dimension_numbers<[1], [0], [0], [1], [0, 0, 1, 1], [], []>} : vector<16x32xf32>, vector<32x512xf32>, vector<16x512xf32> -> vector<16x512xf32>
    %c0_3 = arith.constant 0 : index
    %c0_4 = arith.constant 0 : index
    %3 = vector.load %arg4[%c0_3, %c0_4] : memref<1x512xf32, #tpu.memory_space<vmem>>, vector<1x512xf32>
    %4 = vector.broadcast %3 : vector<1x512xf32> to vector<16x512xf32>
    %5 = arith.addf %2, %4 : vector<16x512xf32>
    %cst_5 = arith.constant 0.000000e+00 : f32
    %6 = vector.broadcast %cst_5 : f32 to vector<16x512xf32>
    %7 = arith.maximumf %5, %6 : vector<16x512xf32>
    %c0_6 = arith.constant 0 : index
    %c0_7 = arith.constant 0 : index
    %8 = vector.load %arg5[%c0_6, %c0_7] : memref<512x32xf32, #tpu.memory_space<vmem>>, vector<512x32xf32>
    %cst_8 = arith.constant dense<0.000000e+00> : vector<16x32xf32>
    %9 = tpu.matmul %7, %8, %cst_8 {dimension_numbers = #tpu.dot_dimension_numbers<[1], [0], [0], [1], [0, 0, 1, 1], [], []>} : vector<16x512xf32>, vector<512x32xf32>, vector<16x32xf32> -> vector<16x32xf32>
    %c0_9 = arith.constant 0 : index
    %c0_10 = arith.constant 0 : index
    %10 = vector.load %arg6[%c0_9, %c0_10] : memref<1x32xf32, #tpu.memory_space<vmem>>, vector<1x32xf32>
    %11 = vector.broadcast %10 : vector<1x32xf32> to vector<16x32xf32>
    %12 = arith.addf %9, %11 : vector<16x32xf32>
    %c0_11 = arith.constant 0 : index
    %c0_12 = arith.constant 0 : index
    %13 = vector.load %arg2[%c0_11, %c0_12] : memref<16x32xf32, #tpu.memory_space<vmem>>, vector<16x32xf32>
    %14 = arith.addf %12, %13 : vector<16x32xf32>
    %c0_13 = arith.constant 0 : index
    %c0_14 = arith.constant 0 : index
    %15 = vector.load %arg7[%c0_13, %c0_14] : memref<1x32xf32, #tpu.memory_space<vmem>>, vector<1x32xf32>
    %c0_15 = arith.constant 0 : index
    %c0_16 = arith.constant 0 : index
    %16 = vector.load %arg8[%c0_15, %c0_16] : memref<1x32xf32, #tpu.memory_space<vmem>>, vector<1x32xf32>
    %cst_17 = arith.constant dense<0.000000e+00> : vector<16xf32>
    %17 = vector.multi_reduction <add>, %14, %cst_17 [1] : vector<16x32xf32> to vector<16xf32>
    %18 = vector.shape_cast %17 : vector<16xf32> to vector<16x1xf32>
    %cst_18 = arith.constant 3.200000e+01 : f32
    %19 = vector.broadcast %cst_18 : f32 to vector<16x1xf32>
    %20 = arith.divf %18, %19 : vector<16x1xf32>
    %21 = vector.broadcast %20 : vector<16x1xf32> to vector<16x32xf32>
    %22 = arith.subf %14, %21 : vector<16x32xf32>
    %23 = arith.mulf %22, %22 : vector<16x32xf32>
    %cst_19 = arith.constant dense<0.000000e+00> : vector<16xf32>
    %24 = vector.multi_reduction <add>, %23, %cst_19 [1] : vector<16x32xf32> to vector<16xf32>
    %25 = vector.shape_cast %24 : vector<16xf32> to vector<16x1xf32>
    %cst_20 = arith.constant 3.200000e+01 : f32
    %26 = vector.broadcast %cst_20 : f32 to vector<16x1xf32>
    %27 = arith.divf %25, %26 : vector<16x1xf32>
    %28 = vector.broadcast %20 : vector<16x1xf32> to vector<16x32xf32>
    %29 = arith.subf %14, %28 : vector<16x32xf32>
    %cst_21 = arith.constant 9.99999974E-6 : f32
    %30 = vector.broadcast %cst_21 : f32 to vector<16x1xf32>
    %31 = arith.addf %27, %30 : vector<16x1xf32>
    %32 = math.rsqrt %31 : vector<16x1xf32>
    %33 = vector.broadcast %32 : vector<16x1xf32> to vector<16x32xf32>
    %34 = arith.mulf %29, %33 : vector<16x32xf32>
    %35 = vector.broadcast %15 : vector<1x32xf32> to vector<16x32xf32>
    %36 = arith.mulf %34, %35 : vector<16x32xf32>
    %37 = vector.broadcast %16 : vector<1x32xf32> to vector<16x32xf32>
    %38 = arith.addf %36, %37 : vector<16x32xf32>
    %c0_22 = arith.constant 0 : index
    %c0_23 = arith.constant 0 : index
    %39 = vector.load %arg9[%c0_22, %c0_23] : memref<16x32xf32, #tpu.memory_space<vmem>>, vector<16x32xf32>
    tpu.vector_store %arg9[%c0_22, %c0_23], %38 {strides = array<i32>} : memref<16x32xf32, #tpu.memory_space<vmem>>, vector<16x32xf32>,
    return
  }
  func.func @transform_0(%arg0: i32, %arg1: i32) -> (i32, i32) {
    %c0_i32 = arith.constant 0 : i32
    %c0_i32_0 = arith.constant 0 : i32
    return %arg0, %c0_i32 : i32, i32
  }
  func.func @transform_1(%arg0: i32, %arg1: i32) -> (i32, i32) {
    %c0_i32 = arith.constant 0 : i32
    %c0_i32_0 = arith.constant 0 : i32
    return %c0_i32, %arg1 : i32, i32
  }
  func.func @transform_2(%arg0: i32, %arg1: i32) -> (i32, i32) {
    %c0_i32 = arith.constant 0 : i32
    %c0_i32_0 = arith.constant 0 : i32
    return %c0_i32, %arg1 : i32, i32
  }
  func.func @transform_3(%arg0: i32, %arg1: i32) -> (i32, i32) {
    %c0_i32 = arith.constant 0 : i32
    %c0_i32_0 = arith.constant 0 : i32
    return %arg1, %c0_i32 : i32, i32
  }
  func.func @transform_4(%arg0: i32, %arg1: i32) -> (i32, i32) {
    %c0_i32 = arith.constant 0 : i32
    %c0_i32_0 = arith.constant 0 : i32
    %c0_i32_1 = arith.constant 0 : i32
    return %c0_i32, %c0_i32_0 : i32, i32
  }
  func.func @transform_5(%arg0: i32, %arg1: i32) -> (i32, i32) {
    %c0_i32 = arith.constant 0 : i32
    %c0_i32_0 = arith.constant 0 : i32
    %c0_i32_1 = arith.constant 0 : i32
    return %c0_i32, %c0_i32_0 : i32, i32
  }
  func.func @transform_6(%arg0: i32, %arg1: i32) -> (i32, i32) {
    %c0_i32 = arith.constant 0 : i32
    %c0_i32_0 = arith.constant 0 : i32
    %c0_i32_1 = arith.constant 0 : i32
    return %c0_i32, %c0_i32_0 : i32, i32
  }
  func.func @transform_7(%arg0: i32, %arg1: i32) -> (i32, i32) {
    %c0_i32 = arith.constant 0 : i32
    %c0_i32_0 = arith.constant 0 : i32
    return %arg0, %c0_i32 : i32, i32
  }
}

module attributes {stable_mosaic.version = 11 : i64} {
  func.func @_matmul_kernel(%arg0: i32, %arg1: i32, %arg2: i32, %arg3: memref<2x4xf32, #tpu.memory_space<vmem>>, %arg4: memref<4x32xf32, #tpu.memory_space<vmem>>, %arg5: memref<1x32xf32, #tpu.memory_space<vmem>>, %arg6: memref<2x32xf32, #tpu.memory_space<vmem>>) attributes {dimension_semantics = [#tpu.dimension_semantics<parallel>, #tpu.dimension_semantics<parallel>, #tpu.dimension_semantics<arbitrary>], iteration_bounds = array<i64: 1, 1, 1>, scalar_prefetch = 0 : i64, scratch_operands = 0 : i64, tpu.core_type = #tpu.core_type<tc>, window_params = [{transform_indices = @transform_0, window_bounds = array<i64: 2, 4>}, {transform_indices = @transform_1, window_bounds = array<i64: 4, 32>}, {transform_indices = @transform_2, window_bounds = array<i64: 1, 32>}, {transform_indices = @transform_3, window_bounds = array<i64: 2, 32>}]} {
    %c0 = arith.constant 0 : index
    %c0_0 = arith.constant 0 : index
    %0 = vector.load %arg3[%c0, %c0_0] : memref<2x4xf32, #tpu.memory_space<vmem>>, vector<2x4xf32>
    %c0_1 = arith.constant 0 : index
    %c0_2 = arith.constant 0 : index
    %1 = vector.load %arg4[%c0_1, %c0_2] : memref<4x32xf32, #tpu.memory_space<vmem>>, vector<4x32xf32>
    %cst = arith.constant dense<0.000000e+00> : vector<2x32xf32>
    %2 = tpu.matmul %0, %1, %cst {dimension_numbers = #tpu.dot_dimension_numbers<[1], [0], [0], [1], [0, 0, 1, 1], [], []>} : vector<2x4xf32>, vector<4x32xf32>, vector<2x32xf32> -> vector<2x32xf32>
    %c0_3 = arith.constant 0 : index
    %c0_4 = arith.constant 0 : index
    %3 = vector.load %arg5[%c0_3, %c0_4] : memref<1x32xf32, #tpu.memory_space<vmem>>, vector<1x32xf32>
    %4 = vector.broadcast %3 : vector<1x32xf32> to vector<2x32xf32>
    %5 = arith.addf %2, %4 : vector<2x32xf32>
    %c0_5 = arith.constant 0 : index
    %c0_6 = arith.constant 0 : index
    %6 = vector.load %arg6[%c0_5, %c0_6] : memref<2x32xf32, #tpu.memory_space<vmem>>, vector<2x32xf32>
    tpu.vector_store %arg6[%c0_5, %c0_6], %5 {strides = array<i32>} : memref<2x32xf32, #tpu.memory_space<vmem>>, vector<2x32xf32>,
    return
  }
  func.func @transform_0(%arg0: i32, %arg1: i32, %arg2: i32) -> (i32, i32) {
    %c0_i32 = arith.constant 0 : i32
    return %arg0, %arg2 : i32, i32
  }
  func.func @transform_1(%arg0: i32, %arg1: i32, %arg2: i32) -> (i32, i32) {
    %c0_i32 = arith.constant 0 : i32
    return %arg2, %arg1 : i32, i32
  }
  func.func @transform_2(%arg0: i32, %arg1: i32, %arg2: i32) -> (i32, i32) {
    %c0_i32 = arith.constant 0 : i32
    %c0_i32_0 = arith.constant 0 : i32
    return %c0_i32, %arg1 : i32, i32
  }
  func.func @transform_3(%arg0: i32, %arg1: i32, %arg2: i32) -> (i32, i32) {
    %c0_i32 = arith.constant 0 : i32
    return %arg0, %arg1 : i32, i32
  }
}

module attributes {stable_mosaic.version = 11 : i64} {
  func.func @_matmul_kernel(%arg0: i32, %arg1: i32, %arg2: i32, %arg3: memref<2x32xf32, #tpu.memory_space<vmem>>, %arg4: memref<32x64xf32, #tpu.memory_space<vmem>>, %arg5: memref<1x64xf32, #tpu.memory_space<vmem>>, %arg6: memref<2x64xf32, #tpu.memory_space<vmem>>) attributes {dimension_semantics = [#tpu.dimension_semantics<parallel>, #tpu.dimension_semantics<parallel>, #tpu.dimension_semantics<arbitrary>], iteration_bounds = array<i64: 1, 1, 1>, scalar_prefetch = 0 : i64, scratch_operands = 0 : i64, tpu.core_type = #tpu.core_type<tc>, window_params = [{transform_indices = @transform_0, window_bounds = array<i64: 2, 32>}, {transform_indices = @transform_1, window_bounds = array<i64: 32, 64>}, {transform_indices = @transform_2, window_bounds = array<i64: 1, 64>}, {transform_indices = @transform_3, window_bounds = array<i64: 2, 64>}]} {
    %c0 = arith.constant 0 : index
    %c0_0 = arith.constant 0 : index
    %0 = vector.load %arg3[%c0, %c0_0] : memref<2x32xf32, #tpu.memory_space<vmem>>, vector<2x32xf32>
    %c0_1 = arith.constant 0 : index
    %c0_2 = arith.constant 0 : index
    %1 = vector.load %arg4[%c0_1, %c0_2] : memref<32x64xf32, #tpu.memory_space<vmem>>, vector<32x64xf32>
    %cst = arith.constant dense<0.000000e+00> : vector<2x64xf32>
    %2 = tpu.matmul %0, %1, %cst {dimension_numbers = #tpu.dot_dimension_numbers<[1], [0], [0], [1], [0, 0, 1, 1], [], []>} : vector<2x32xf32>, vector<32x64xf32>, vector<2x64xf32> -> vector<2x64xf32>
    %c0_3 = arith.constant 0 : index
    %c0_4 = arith.constant 0 : index
    %3 = vector.load %arg5[%c0_3, %c0_4] : memref<1x64xf32, #tpu.memory_space<vmem>>, vector<1x64xf32>
    %4 = vector.broadcast %3 : vector<1x64xf32> to vector<2x64xf32>
    %5 = arith.addf %2, %4 : vector<2x64xf32>
    %c0_5 = arith.constant 0 : index
    %c0_6 = arith.constant 0 : index
    %6 = vector.load %arg6[%c0_5, %c0_6] : memref<2x64xf32, #tpu.memory_space<vmem>>, vector<2x64xf32>
    tpu.vector_store %arg6[%c0_5, %c0_6], %5 {strides = array<i32>} : memref<2x64xf32, #tpu.memory_space<vmem>>, vector<2x64xf32>,
    return
  }
  func.func @transform_0(%arg0: i32, %arg1: i32, %arg2: i32) -> (i32, i32) {
    %c0_i32 = arith.constant 0 : i32
    return %arg0, %arg2 : i32, i32
  }
  func.func @transform_1(%arg0: i32, %arg1: i32, %arg2: i32) -> (i32, i32) {
    %c0_i32 = arith.constant 0 : i32
    return %arg2, %arg1 : i32, i32
  }
  func.func @transform_2(%arg0: i32, %arg1: i32, %arg2: i32) -> (i32, i32) {
    %c0_i32 = arith.constant 0 : i32
    %c0_i32_0 = arith.constant 0 : i32
    return %c0_i32, %arg1 : i32, i32
  }
  func.func @transform_3(%arg0: i32, %arg1: i32, %arg2: i32) -> (i32, i32) {
    %c0_i32 = arith.constant 0 : i32
    return %arg0, %arg1 : i32, i32
  }
}

module attributes {stable_mosaic.version = 11 : i64} {
  func.func @_matmul_kernel(%arg0: i32, %arg1: i32, %arg2: i32, %arg3: memref<14x32xf32, #tpu.memory_space<vmem>>, %arg4: memref<32x96xf32, #tpu.memory_space<vmem>>, %arg5: memref<1x96xf32, #tpu.memory_space<vmem>>, %arg6: memref<1x32xf32, #tpu.memory_space<vmem>>, %arg7: memref<1x32xf32, #tpu.memory_space<vmem>>, %arg8: memref<14x96xf32, #tpu.memory_space<vmem>>) attributes {dimension_semantics = [#tpu.dimension_semantics<parallel>, #tpu.dimension_semantics<parallel>, #tpu.dimension_semantics<arbitrary>], iteration_bounds = array<i64: 1, 1, 1>, scalar_prefetch = 0 : i64, scratch_operands = 0 : i64, tpu.core_type = #tpu.core_type<tc>, window_params = [{transform_indices = @transform_0, window_bounds = array<i64: 14, 32>}, {transform_indices = @transform_1, window_bounds = array<i64: 32, 96>}, {transform_indices = @transform_2, window_bounds = array<i64: 1, 96>}, {transform_indices = @transform_3, window_bounds = array<i64: 1, 32>}, {transform_indices = @transform_4, window_bounds = array<i64: 1, 32>}, {transform_indices = @transform_5, window_bounds = array<i64: 14, 96>}]} {
    %c0 = arith.constant 0 : index
    %c0_0 = arith.constant 0 : index
    %0 = vector.load %arg3[%c0, %c0_0] : memref<14x32xf32, #tpu.memory_space<vmem>>, vector<14x32xf32>
    %c0_1 = arith.constant 0 : index
    %c0_2 = arith.constant 0 : index
    %1 = vector.load %arg6[%c0_1, %c0_2] : memref<1x32xf32, #tpu.memory_space<vmem>>, vector<1x32xf32>
    %c0_3 = arith.constant 0 : index
    %c0_4 = arith.constant 0 : index
    %2 = vector.load %arg7[%c0_3, %c0_4] : memref<1x32xf32, #tpu.memory_space<vmem>>, vector<1x32xf32>
    %cst = arith.constant dense<0.000000e+00> : vector<14xf32>
    %3 = vector.multi_reduction <add>, %0, %cst [1] : vector<14x32xf32> to vector<14xf32>
    %4 = vector.shape_cast %3 : vector<14xf32> to vector<14x1xf32>
    %cst_5 = arith.constant 3.200000e+01 : f32
    %5 = vector.broadcast %cst_5 : f32 to vector<14x1xf32>
    %6 = arith.divf %4, %5 : vector<14x1xf32>
    %7 = vector.broadcast %6 : vector<14x1xf32> to vector<14x32xf32>
    %8 = arith.subf %0, %7 : vector<14x32xf32>
    %9 = arith.mulf %8, %8 : vector<14x32xf32>
    %cst_6 = arith.constant dense<0.000000e+00> : vector<14xf32>
    %10 = vector.multi_reduction <add>, %9, %cst_6 [1] : vector<14x32xf32> to vector<14xf32>
    %11 = vector.shape_cast %10 : vector<14xf32> to vector<14x1xf32>
    %cst_7 = arith.constant 3.200000e+01 : f32
    %12 = vector.broadcast %cst_7 : f32 to vector<14x1xf32>
    %13 = arith.divf %11, %12 : vector<14x1xf32>
    %14 = vector.broadcast %6 : vector<14x1xf32> to vector<14x32xf32>
    %15 = arith.subf %0, %14 : vector<14x32xf32>
    %cst_8 = arith.constant 9.99999974E-6 : f32
    %16 = vector.broadcast %cst_8 : f32 to vector<14x1xf32>
    %17 = arith.addf %13, %16 : vector<14x1xf32>
    %18 = math.rsqrt %17 : vector<14x1xf32>
    %19 = vector.broadcast %18 : vector<14x1xf32> to vector<14x32xf32>
    %20 = arith.mulf %15, %19 : vector<14x32xf32>
    %21 = vector.broadcast %1 : vector<1x32xf32> to vector<14x32xf32>
    %22 = arith.mulf %20, %21 : vector<14x32xf32>
    %23 = vector.broadcast %2 : vector<1x32xf32> to vector<14x32xf32>
    %24 = arith.addf %22, %23 : vector<14x32xf32>
    %c0_9 = arith.constant 0 : index
    %c0_10 = arith.constant 0 : index
    %25 = vector.load %arg4[%c0_9, %c0_10] : memref<32x96xf32, #tpu.memory_space<vmem>>, vector<32x96xf32>
    %cst_11 = arith.constant dense<0.000000e+00> : vector<14x96xf32>
    %26 = tpu.matmul %24, %25, %cst_11 {dimension_numbers = #tpu.dot_dimension_numbers<[1], [0], [0], [1], [0, 0, 1, 1], [], []>} : vector<14x32xf32>, vector<32x96xf32>, vector<14x96xf32> -> vector<14x96xf32>
    %c0_12 = arith.constant 0 : index
    %c0_13 = arith.constant 0 : index
    %27 = vector.load %arg5[%c0_12, %c0_13] : memref<1x96xf32, #tpu.memory_space<vmem>>, vector<1x96xf32>
    %28 = vector.broadcast %27 : vector<1x96xf32> to vector<14x96xf32>
    %29 = arith.addf %26, %28 : vector<14x96xf32>
    %c0_14 = arith.constant 0 : index
    %c0_15 = arith.constant 0 : index
    %30 = vector.load %arg8[%c0_14, %c0_15] : memref<14x96xf32, #tpu.memory_space<vmem>>, vector<14x96xf32>
    tpu.vector_store %arg8[%c0_14, %c0_15], %29 {strides = array<i32>} : memref<14x96xf32, #tpu.memory_space<vmem>>, vector<14x96xf32>,
    return
  }
  func.func @transform_0(%arg0: i32, %arg1: i32, %arg2: i32) -> (i32, i32) {
    %c0_i32 = arith.constant 0 : i32
    return %arg0, %arg2 : i32, i32
  }
  func.func @transform_1(%arg0: i32, %arg1: i32, %arg2: i32) -> (i32, i32) {
    %c0_i32 = arith.constant 0 : i32
    return %arg2, %arg1 : i32, i32
  }
  func.func @transform_2(%arg0: i32, %arg1: i32, %arg2: i32) -> (i32, i32) {
    %c0_i32 = arith.constant 0 : i32
    %c0_i32_0 = arith.constant 0 : i32
    return %c0_i32, %arg1 : i32, i32
  }
  func.func @transform_3(%arg0: i32, %arg1: i32, %arg2: i32) -> (i32, i32) {
    %c0_i32 = arith.constant 0 : i32
    %c0_i32_0 = arith.constant 0 : i32
    return %c0_i32, %arg2 : i32, i32
  }
  func.func @transform_4(%arg0: i32, %arg1: i32, %arg2: i32) -> (i32, i32) {
    %c0_i32 = arith.constant 0 : i32
    %c0_i32_0 = arith.constant 0 : i32
    return %c0_i32, %arg2 : i32, i32
  }
  func.func @transform_5(%arg0: i32, %arg1: i32, %arg2: i32) -> (i32, i32) {
    %c0_i32 = arith.constant 0 : i32
    return %arg0, %arg1 : i32, i32
  }
}

module attributes {stable_mosaic.version = 11 : i64} {
  func.func @_attn_kernel(%arg0: i32, %arg1: memref<1x7x96xf32, #tpu.memory_space<vmem>>, %arg2: memref<1x7x32xf32, #tpu.memory_space<vmem>>) attributes {dimension_semantics = [#tpu.dimension_semantics<parallel>], iteration_bounds = array<i64: 2>, scalar_prefetch = 0 : i64, scratch_operands = 0 : i64, tpu.core_type = #tpu.core_type<tc>, window_params = [{transform_indices = @transform_0, window_bounds = array<i64: 1, 7, 96>}, {transform_indices = @transform_1, window_bounds = array<i64: 1, 7, 32>}]} {
    %c0 = arith.constant 0 : index
    %c0_0 = arith.constant 0 : index
    %c0_1 = arith.constant 0 : index
    %0 = vector.load %arg1[%c0, %c0_0, %c0_1] : memref<1x7x96xf32, #tpu.memory_space<vmem>>, vector<1x7x96xf32>
    %1 = vector.shape_cast %0 : vector<1x7x96xf32> to vector<7x96xf32>
    %2 = vector.extract_strided_slice %1 {offsets = [0, 0], sizes = [7, 8], strides = [1, 1]} : vector<7x96xf32> to vector<7x8xf32>
    %3 = vector.extract_strided_slice %1 {offsets = [0, 32], sizes = [7, 8], strides = [1, 1]} : vector<7x96xf32> to vector<7x8xf32>
    %4 = vector.extract_strided_slice %1 {offsets = [0, 64], sizes = [7, 8], strides = [1, 1]} : vector<7x96xf32> to vector<7x8xf32>
    %cst = arith.constant dense<0.000000e+00> : vector<7x7xf32>
    %5 = tpu.matmul %2, %3, %cst {dimension_numbers = #tpu.dot_dimension_numbers<[1], [1], [0], [0], [0, 0, 1, 0], [], []>} : vector<7x8xf32>, vector<7x8xf32>, vector<7x7xf32> -> vector<7x7xf32>
    %cst_2 = arith.constant 0.353553385 : f32
    %6 = vector.broadcast %cst_2 : f32 to vector<7x7xf32>
    %7 = arith.mulf %5, %6 : vector<7x7xf32>
    %cst_3 = arith.constant dense<0xFF800000> : vector<7xf32>
    %8 = vector.multi_reduction <maximumf>, %7, %cst_3 [1] : vector<7x7xf32> to vector<7xf32>
    %9 = vector.shape_cast %8 : vector<7xf32> to vector<7x1xf32>
    %10 = vector.broadcast %9 : vector<7x1xf32> to vector<7x7xf32>
    %11 = arith.subf %7, %10 : vector<7x7xf32>
    %12 = math.exp %11 : vector<7x7xf32>
    %cst_4 = arith.constant dense<0.000000e+00> : vector<7xf32>
    %13 = vector.multi_reduction <add>, %12, %cst_4 [1] : vector<7x7xf32> to vector<7xf32>
    %14 = vector.shape_cast %13 : vector<7xf32> to vector<7x1xf32>
    %cst_5 = arith.constant dense<0.000000e+00> : vector<7x8xf32>
    %15 = tpu.matmul %12, %4, %cst_5 {dimension_numbers = #tpu.dot_dimension_numbers<[1], [0], [0], [1], [0, 0, 1, 1], [], []>} : vector<7x7xf32>, vector<7x8xf32>, vector<7x8xf32> -> vector<7x8xf32>
    %16 = tpu.reciprocal %14 {approx = true} : vector<7x1xf32> -> vector<7x1xf32>
    %17 = vector.broadcast %16 : vector<7x1xf32> to vector<7x8xf32>
    %18 = arith.mulf %15, %17 : vector<7x8xf32>
    %19 = vector.extract_strided_slice %1 {offsets = [0, 8], sizes = [7, 8], strides = [1, 1]} : vector<7x96xf32> to vector<7x8xf32>
    %20 = vector.extract_strided_slice %1 {offsets = [0, 40], sizes = [7, 8], strides = [1, 1]} : vector<7x96xf32> to vector<7x8xf32>
    %21 = vector.extract_strided_slice %1 {offsets = [0, 72], sizes = [7, 8], strides = [1, 1]} : vector<7x96xf32> to vector<7x8xf32>
    %cst_6 = arith.constant dense<0.000000e+00> : vector<7x7xf32>
    %22 = tpu.matmul %19, %20, %cst_6 {dimension_numbers = #tpu.dot_dimension_numbers<[1], [1], [0], [0], [0, 0, 1, 0], [], []>} : vector<7x8xf32>, vector<7x8xf32>, vector<7x7xf32> -> vector<7x7xf32>
    %cst_7 = arith.constant 0.353553385 : f32
    %23 = vector.broadcast %cst_7 : f32 to vector<7x7xf32>
    %24 = arith.mulf %22, %23 : vector<7x7xf32>
    %cst_8 = arith.constant dense<0xFF800000> : vector<7xf32>
    %25 = vector.multi_reduction <maximumf>, %24, %cst_8 [1] : vector<7x7xf32> to vector<7xf32>
    %26 = vector.shape_cast %25 : vector<7xf32> to vector<7x1xf32>
    %27 = vector.broadcast %26 : vector<7x1xf32> to vector<7x7xf32>
    %28 = arith.subf %24, %27 : vector<7x7xf32>
    %29 = math.exp %28 : vector<7x7xf32>
    %cst_9 = arith.constant dense<0.000000e+00> : vector<7xf32>
    %30 = vector.multi_reduction <add>, %29, %cst_9 [1] : vector<7x7xf32> to vector<7xf32>
    %31 = vector.shape_cast %30 : vector<7xf32> to vector<7x1xf32>
    %cst_10 = arith.constant dense<0.000000e+00> : vector<7x8xf32>
    %32 = tpu.matmul %29, %21, %cst_10 {dimension_numbers = #tpu.dot_dimension_numbers<[1], [0], [0], [1], [0, 0, 1, 1], [], []>} : vector<7x7xf32>, vector<7x8xf32>, vector<7x8xf32> -> vector<7x8xf32>
    %33 = tpu.reciprocal %31 {approx = true} : vector<7x1xf32> -> vector<7x1xf32>
    %34 = vector.broadcast %33 : vector<7x1xf32> to vector<7x8xf32>
    %35 = arith.mulf %32, %34 : vector<7x8xf32>
    %36 = vector.extract_strided_slice %1 {offsets = [0, 16], sizes = [7, 8], strides = [1, 1]} : vector<7x96xf32> to vector<7x8xf32>
    %37 = vector.extract_strided_slice %1 {offsets = [0, 48], sizes = [7, 8], strides = [1, 1]} : vector<7x96xf32> to vector<7x8xf32>
    %38 = vector.extract_strided_slice %1 {offsets = [0, 80], sizes = [7, 8], strides = [1, 1]} : vector<7x96xf32> to vector<7x8xf32>
    %cst_11 = arith.constant dense<0.000000e+00> : vector<7x7xf32>
    %39 = tpu.matmul %36, %37, %cst_11 {dimension_numbers = #tpu.dot_dimension_numbers<[1], [1], [0], [0], [0, 0, 1, 0], [], []>} : vector<7x8xf32>, vector<7x8xf32>, vector<7x7xf32> -> vector<7x7xf32>
    %cst_12 = arith.constant 0.353553385 : f32
    %40 = vector.broadcast %cst_12 : f32 to vector<7x7xf32>
    %41 = arith.mulf %39, %40 : vector<7x7xf32>
    %cst_13 = arith.constant dense<0xFF800000> : vector<7xf32>
    %42 = vector.multi_reduction <maximumf>, %41, %cst_13 [1] : vector<7x7xf32> to vector<7xf32>
    %43 = vector.shape_cast %42 : vector<7xf32> to vector<7x1xf32>
    %44 = vector.broadcast %43 : vector<7x1xf32> to vector<7x7xf32>
    %45 = arith.subf %41, %44 : vector<7x7xf32>
    %46 = math.exp %45 : vector<7x7xf32>
    %cst_14 = arith.constant dense<0.000000e+00> : vector<7xf32>
    %47 = vector.multi_reduction <add>, %46, %cst_14 [1] : vector<7x7xf32> to vector<7xf32>
    %48 = vector.shape_cast %47 : vector<7xf32> to vector<7x1xf32>
    %cst_15 = arith.constant dense<0.000000e+00> : vector<7x8xf32>
    %49 = tpu.matmul %46, %38, %cst_15 {dimension_numbers = #tpu.dot_dimension_numbers<[1], [0], [0], [1], [0, 0, 1, 1], [], []>} : vector<7x7xf32>, vector<7x8xf32>, vector<7x8xf32> -> vector<7x8xf32>
    %50 = tpu.reciprocal %48 {approx = true} : vector<7x1xf32> -> vector<7x1xf32>
    %51 = vector.broadcast %50 : vector<7x1xf32> to vector<7x8xf32>
    %52 = arith.mulf %49, %51 : vector<7x8xf32>
    %53 = vector.extract_strided_slice %1 {offsets = [0, 24], sizes = [7, 8], strides = [1, 1]} : vector<7x96xf32> to vector<7x8xf32>
    %54 = vector.extract_strided_slice %1 {offsets = [0, 56], sizes = [7, 8], strides = [1, 1]} : vector<7x96xf32> to vector<7x8xf32>
    %55 = vector.extract_strided_slice %1 {offsets = [0, 88], sizes = [7, 8], strides = [1, 1]} : vector<7x96xf32> to vector<7x8xf32>
    %cst_16 = arith.constant dense<0.000000e+00> : vector<7x7xf32>
    %56 = tpu.matmul %53, %54, %cst_16 {dimension_numbers = #tpu.dot_dimension_numbers<[1], [1], [0], [0], [0, 0, 1, 0], [], []>} : vector<7x8xf32>, vector<7x8xf32>, vector<7x7xf32> -> vector<7x7xf32>
    %cst_17 = arith.constant 0.353553385 : f32
    %57 = vector.broadcast %cst_17 : f32 to vector<7x7xf32>
    %58 = arith.mulf %56, %57 : vector<7x7xf32>
    %cst_18 = arith.constant dense<0xFF800000> : vector<7xf32>
    %59 = vector.multi_reduction <maximumf>, %58, %cst_18 [1] : vector<7x7xf32> to vector<7xf32>
    %60 = vector.shape_cast %59 : vector<7xf32> to vector<7x1xf32>
    %61 = vector.broadcast %60 : vector<7x1xf32> to vector<7x7xf32>
    %62 = arith.subf %58, %61 : vector<7x7xf32>
    %63 = math.exp %62 : vector<7x7xf32>
    %cst_19 = arith.constant dense<0.000000e+00> : vector<7xf32>
    %64 = vector.multi_reduction <add>, %63, %cst_19 [1] : vector<7x7xf32> to vector<7xf32>
    %65 = vector.shape_cast %64 : vector<7xf32> to vector<7x1xf32>
    %cst_20 = arith.constant dense<0.000000e+00> : vector<7x8xf32>
    %66 = tpu.matmul %63, %55, %cst_20 {dimension_numbers = #tpu.dot_dimension_numbers<[1], [0], [0], [1], [0, 0, 1, 1], [], []>} : vector<7x7xf32>, vector<7x8xf32>, vector<7x8xf32> -> vector<7x8xf32>
    %67 = tpu.reciprocal %65 {approx = true} : vector<7x1xf32> -> vector<7x1xf32>
    %68 = vector.broadcast %67 : vector<7x1xf32> to vector<7x8xf32>
    %69 = arith.mulf %66, %68 : vector<7x8xf32>
    %70 = tpu.concatenate %18, %35, %52, %69 in 1 : vector<7x8xf32>, vector<7x8xf32>, vector<7x8xf32>, vector<7x8xf32> -> vector<7x32xf32>
    %c0_21 = arith.constant 0 : index
    %c0_22 = arith.constant 0 : index
    %c0_23 = arith.constant 0 : index
    %71 = vector.load %arg2[%c0_21, %c0_22, %c0_23] : memref<1x7x32xf32, #tpu.memory_space<vmem>>, vector<1x7x32xf32>
    %72 = vector.shape_cast %71 : vector<1x7x32xf32> to vector<7x32xf32>
    %73 = vector.shape_cast %70 : vector<7x32xf32> to vector<1x7x32xf32>
    tpu.vector_store %arg2[%c0_21, %c0_22, %c0_23], %73 {strides = array<i32>} : memref<1x7x32xf32, #tpu.memory_space<vmem>>, vector<1x7x32xf32>,
    return
  }
  func.func @transform_0(%arg0: i32) -> (i32, i32, i32) {
    %c0_i32 = arith.constant 0 : i32
    %c0_i32_0 = arith.constant 0 : i32
    %c0_i32_1 = arith.constant 0 : i32
    return %arg0, %c0_i32, %c0_i32_0 : i32, i32, i32
  }
  func.func @transform_1(%arg0: i32) -> (i32, i32, i32) {
    %c0_i32 = arith.constant 0 : i32
    %c0_i32_0 = arith.constant 0 : i32
    %c0_i32_1 = arith.constant 0 : i32
    return %arg0, %c0_i32, %c0_i32_0 : i32, i32, i32
  }
}

module attributes {stable_mosaic.version = 11 : i64} {
  func.func @_matmul_kernel(%arg0: i32, %arg1: i32, %arg2: i32, %arg3: memref<14x32xf32, #tpu.memory_space<vmem>>, %arg4: memref<32x32xf32, #tpu.memory_space<vmem>>, %arg5: memref<1x32xf32, #tpu.memory_space<vmem>>, %arg6: memref<14x32xf32, #tpu.memory_space<vmem>>, %arg7: memref<14x32xf32, #tpu.memory_space<vmem>>) attributes {dimension_semantics = [#tpu.dimension_semantics<parallel>, #tpu.dimension_semantics<parallel>, #tpu.dimension_semantics<arbitrary>], iteration_bounds = array<i64: 1, 1, 1>, scalar_prefetch = 0 : i64, scratch_operands = 0 : i64, tpu.core_type = #tpu.core_type<tc>, window_params = [{transform_indices = @transform_0, window_bounds = array<i64: 14, 32>}, {transform_indices = @transform_1, window_bounds = array<i64: 32, 32>}, {transform_indices = @transform_2, window_bounds = array<i64: 1, 32>}, {transform_indices = @transform_3, window_bounds = array<i64: 14, 32>}, {transform_indices = @transform_4, window_bounds = array<i64: 14, 32>}]} {
    %c0 = arith.constant 0 : index
    %c0_0 = arith.constant 0 : index
    %0 = vector.load %arg3[%c0, %c0_0] : memref<14x32xf32, #tpu.memory_space<vmem>>, vector<14x32xf32>
    %c0_1 = arith.constant 0 : index
    %c0_2 = arith.constant 0 : index
    %1 = vector.load %arg4[%c0_1, %c0_2] : memref<32x32xf32, #tpu.memory_space<vmem>>, vector<32x32xf32>
    %cst = arith.constant dense<0.000000e+00> : vector<14x32xf32>
    %2 = tpu.matmul %0, %1, %cst {dimension_numbers = #tpu.dot_dimension_numbers<[1], [0], [0], [1], [0, 0, 1, 1], [], []>} : vector<14x32xf32>, vector<32x32xf32>, vector<14x32xf32> -> vector<14x32xf32>
    %c0_3 = arith.constant 0 : index
    %c0_4 = arith.constant 0 : index
    %3 = vector.load %arg5[%c0_3, %c0_4] : memref<1x32xf32, #tpu.memory_space<vmem>>, vector<1x32xf32>
    %4 = vector.broadcast %3 : vector<1x32xf32> to vector<14x32xf32>
    %5 = arith.addf %2, %4 : vector<14x32xf32>
    %c0_5 = arith.constant 0 : index
    %c0_6 = arith.constant 0 : index
    %6 = vector.load %arg6[%c0_5, %c0_6] : memref<14x32xf32, #tpu.memory_space<vmem>>, vector<14x32xf32>
    %7 = arith.addf %5, %6 : vector<14x32xf32>
    %c0_7 = arith.constant 0 : index
    %c0_8 = arith.constant 0 : index
    %8 = vector.load %arg7[%c0_7, %c0_8] : memref<14x32xf32, #tpu.memory_space<vmem>>, vector<14x32xf32>
    tpu.vector_store %arg7[%c0_7, %c0_8], %7 {strides = array<i32>} : memref<14x32xf32, #tpu.memory_space<vmem>>, vector<14x32xf32>,
    return
  }
  func.func @transform_0(%arg0: i32, %arg1: i32, %arg2: i32) -> (i32, i32) {
    %c0_i32 = arith.constant 0 : i32
    return %arg0, %arg2 : i32, i32
  }
  func.func @transform_1(%arg0: i32, %arg1: i32, %arg2: i32) -> (i32, i32) {
    %c0_i32 = arith.constant 0 : i32
    return %arg2, %arg1 : i32, i32
  }
  func.func @transform_2(%arg0: i32, %arg1: i32, %arg2: i32) -> (i32, i32) {
    %c0_i32 = arith.constant 0 : i32
    %c0_i32_0 = arith.constant 0 : i32
    return %c0_i32, %arg1 : i32, i32
  }
  func.func @transform_3(%arg0: i32, %arg1: i32, %arg2: i32) -> (i32, i32) {
    %c0_i32 = arith.constant 0 : i32
    return %arg0, %arg1 : i32, i32
  }
  func.func @transform_4(%arg0: i32, %arg1: i32, %arg2: i32) -> (i32, i32) {
    %c0_i32 = arith.constant 0 : i32
    return %arg0, %arg1 : i32, i32
  }
}

module attributes {stable_mosaic.version = 11 : i64} {
  func.func @_ffn_kernel(%arg0: i32, %arg1: i32, %arg2: memref<14x32xf32, #tpu.memory_space<vmem>>, %arg3: memref<32x512xf32, #tpu.memory_space<vmem>>, %arg4: memref<1x512xf32, #tpu.memory_space<vmem>>, %arg5: memref<512x32xf32, #tpu.memory_space<vmem>>, %arg6: memref<1x32xf32, #tpu.memory_space<vmem>>, %arg7: memref<1x32xf32, #tpu.memory_space<vmem>>, %arg8: memref<1x32xf32, #tpu.memory_space<vmem>>, %arg9: memref<14x32xf32, #tpu.memory_space<vmem>>, %arg10: memref<14x32xf32, #tpu.memory_space<vmem>>) attributes {dimension_semantics = [#tpu.dimension_semantics<parallel>, #tpu.dimension_semantics<arbitrary>], iteration_bounds = array<i64: 1, 4>, scalar_prefetch = 0 : i64, scratch_operands = 1 : i64, tpu.core_type = #tpu.core_type<tc>, window_params = [{transform_indices = @transform_0, window_bounds = array<i64: 14, 32>}, {transform_indices = @transform_1, window_bounds = array<i64: 32, 512>}, {transform_indices = @transform_2, window_bounds = array<i64: 1, 512>}, {transform_indices = @transform_3, window_bounds = array<i64: 512, 32>}, {pipeline_mode = #tpu.pipeline_mode<synchronous>, transform_indices = @transform_4, window_bounds = array<i64: 1, 32>}, {pipeline_mode = #tpu.pipeline_mode<synchronous>, transform_indices = @transform_5, window_bounds = array<i64: 1, 32>}, {pipeline_mode = #tpu.pipeline_mode<synchronous>, transform_indices = @transform_6, window_bounds = array<i64: 1, 32>}, {transform_indices = @transform_7, window_bounds = array<i64: 14, 32>}]} {
    %c0_i32 = arith.constant 0 : i32
    %0 = arith.cmpi eq, %arg1, %c0_i32 : i32
    %1 = arith.extui %0 : i1 to i32
    %c0_i32_0 = arith.constant 0 : i32
    %2 = arith.cmpi ne, %1, %c0_i32_0 : i32
    scf.if %2 {
      %cst_24 = arith.constant 0.000000e+00 : f32
      %43 = vector.broadcast %cst_24 : f32 to vector<14x32xf32>
      %c0_25 = arith.constant 0 : index
      %c0_26 = arith.constant 0 : index
      %44 = vector.load %arg10[%c0_25, %c0_26] : memref<14x32xf32, #tpu.memory_space<vmem>>, vector<14x32xf32>
      tpu.vector_store %arg10[%c0_25, %c0_26], %43 {strides = array<i32>} : memref<14x32xf32, #tpu.memory_space<vmem>>, vector<14x32xf32>,
    } else {
    }
    %c0 = arith.constant 0 : index
    %c0_1 = arith.constant 0 : index
    %3 = vector.load %arg10[%c0, %c0_1] : memref<14x32xf32, #tpu.memory_space<vmem>>, vector<14x32xf32>
    %c0_2 = arith.constant 0 : index
    %c0_3 = arith.constant 0 : index
    %4 = vector.load %arg2[%c0_2, %c0_3] : memref<14x32xf32, #tpu.memory_space<vmem>>, vector<14x32xf32>
    %c0_4 = arith.constant 0 : index
    %c0_5 = arith.constant 0 : index
    %5 = vector.load %arg7[%c0_4, %c0_5] : memref<1x32xf32, #tpu.memory_space<vmem>>, vector<1x32xf32>
    %c0_6 = arith.constant 0 : index
    %c0_7 = arith.constant 0 : index
    %6 = vector.load %arg8[%c0_6, %c0_7] : memref<1x32xf32, #tpu.memory_space<vmem>>, vector<1x32xf32>
    %cst = arith.constant dense<0.000000e+00> : vector<14xf32>
    %7 = vector.multi_reduction <add>, %4, %cst [1] : vector<14x32xf32> to vector<14xf32>
    %8 = vector.shape_cast %7 : vector<14xf32> to vector<14x1xf32>
    %cst_8 = arith.constant 3.200000e+01 : f32
    %9 = vector.broadcast %cst_8 : f32 to vector<14x1xf32>
    %10 = arith.divf %8, %9 : vector<14x1xf32>
    %11 = vector.broadcast %10 : vector<14x1xf32> to vector<14x32xf32>
    %12 = arith.subf %4, %11 : vector<14x32xf32>
    %13 = arith.mulf %12, %12 : vector<14x32xf32>
    %cst_9 = arith.constant dense<0.000000e+00> : vector<14xf32>
    %14 = vector.multi_reduction <add>, %13, %cst_9 [1] : vector<14x32xf32> to vector<14xf32>
    %15 = vector.shape_cast %14 : vector<14xf32> to vector<14x1xf32>
    %cst_10 = arith.constant 3.200000e+01 : f32
    %16 = vector.broadcast %cst_10 : f32 to vector<14x1xf32>
    %17 = arith.divf %15, %16 : vector<14x1xf32>
    %18 = vector.broadcast %10 : vector<14x1xf32> to vector<14x32xf32>
    %19 = arith.subf %4, %18 : vector<14x32xf32>
    %cst_11 = arith.constant 9.99999974E-6 : f32
    %20 = vector.broadcast %cst_11 : f32 to vector<14x1xf32>
    %21 = arith.addf %17, %20 : vector<14x1xf32>
    %22 = math.rsqrt %21 : vector<14x1xf32>
    %23 = vector.broadcast %22 : vector<14x1xf32> to vector<14x32xf32>
    %24 = arith.mulf %19, %23 : vector<14x32xf32>
    %25 = vector.broadcast %5 : vector<1x32xf32> to vector<14x32xf32>
    %26 = arith.mulf %24, %25 : vector<14x32xf32>
    %27 = vector.broadcast %6 : vector<1x32xf32> to vector<14x32xf32>
    %28 = arith.addf %26, %27 : vector<14x32xf32>
    %c0_12 = arith.constant 0 : index
    %c0_13 = arith.constant 0 : index
    %29 = vector.load %arg3[%c0_12, %c0_13] : memref<32x512xf32, #tpu.memory_space<vmem>>, vector<32x512xf32>
    %cst_14 = arith.constant dense<0.000000e+00> : vector<14x512xf32>
    %30 = tpu.matmul %28, %29, %cst_14 {dimension_numbers = #tpu.dot_dimension_numbers<[1], [0], [0], [1], [0, 0, 1, 1], [], []>} : vector<14x32xf32>, vector<32x512xf32>, vector<14x512xf32> -> vector<14x512xf32>
    %c0_15 = arith.constant 0 : index
    %c0_16 = arith.constant 0 : index
    %31 = vector.load %arg4[%c0_15, %c0_16] : memref<1x512xf32, #tpu.memory_space<vmem>>, vector<1x512xf32>
    %32 = vector.broadcast %31 : vector<1x512xf32> to vector<14x512xf32>
    %33 = arith.addf %30, %32 : vector<14x512xf32>
    %cst_17 = arith.constant 0.000000e+00 : f32
    %34 = vector.broadcast %cst_17 : f32 to vector<14x512xf32>
    %35 = arith.maximumf %33, %34 : vector<14x512xf32>
    %c0_18 = arith.constant 0 : index
    %c0_19 = arith.constant 0 : index
    %36 = vector.load %arg5[%c0_18, %c0_19] : memref<512x32xf32, #tpu.memory_space<vmem>>, vector<512x32xf32>
    %cst_20 = arith.constant dense<0.000000e+00> : vector<14x32xf32>
    %37 = tpu.matmul %35, %36, %cst_20 {dimension_numbers = #tpu.dot_dimension_numbers<[1], [0], [0], [1], [0, 0, 1, 1], [], []>} : vector<14x512xf32>, vector<512x32xf32>, vector<14x32xf32> -> vector<14x32xf32>
    %38 = arith.addf %3, %37 : vector<14x32xf32>
    %c0_21 = arith.constant 0 : index
    %c0_22 = arith.constant 0 : index
    %39 = vector.load %arg10[%c0_21, %c0_22] : memref<14x32xf32, #tpu.memory_space<vmem>>, vector<14x32xf32>
    tpu.vector_store %arg10[%c0_21, %c0_22], %38 {strides = array<i32>} : memref<14x32xf32, #tpu.memory_space<vmem>>, vector<14x32xf32>,
    %c3_i32 = arith.constant 3 : i32
    %40 = arith.cmpi eq, %arg1, %c3_i32 : i32
    %41 = arith.extui %40 : i1 to i32
    %c0_i32_23 = arith.constant 0 : i32
    %42 = arith.cmpi ne, %41, %c0_i32_23 : i32
    scf.if %42 {
      %c0_24 = arith.constant 0 : index
      %c0_25 = arith.constant 0 : index
      %43 = vector.load %arg10[%c0_24, %c0_25] : memref<14x32xf32, #tpu.memory_space<vmem>>, vector<14x32xf32>
      %c0_26 = arith.constant 0 : index
      %c0_27 = arith.constant 0 : index
      %44 = vector.load %arg6[%c0_26, %c0_27] : memref<1x32xf32, #tpu.memory_space<vmem>>, vector<1x32xf32>
      %45 = vector.broadcast %44 : vector<1x32xf32> to vector<14x32xf32>
      %46 = arith.addf %43, %45 : vector<14x32xf32>
      %c0_28 = arith.constant 0 : index
      %c0_29 = arith.constant 0 : index
      %47 = vector.load %arg2[%c0_28, %c0_29] : memref<14x32xf32, #tpu.memory_space<vmem>>, vector<14x32xf32>
      %48 = arith.addf %46, %47 : vector<14x32xf32>
      %c0_30 = arith.constant 0 : index
      %c0_31 = arith.constant 0 : index
      %49 = vector.load %arg9[%c0_30, %c0_31] : memref<14x32xf32, #tpu.memory_space<vmem>>, vector<14x32xf32>
      tpu.vector_store %arg9[%c0_30, %c0_31], %48 {strides = array<i32>} : memref<14x32xf32, #tpu.memory_space<vmem>>, vector<14x32xf32>,
    } else {
    }
    return
  }
  func.func @transform_0(%arg0: i32, %arg1: i32) -> (i32, i32) {
    %c0_i32 = arith.constant 0 : i32
    %c0_i32_0 = arith.constant 0 : i32
    return %arg0, %c0_i32 : i32, i32
  }
  func.func @transform_1(%arg0: i32, %arg1: i32) -> (i32, i32) {
    %c0_i32 = arith.constant 0 : i32
    %c0_i32_0 = arith.constant 0 : i32
    return %c0_i32, %arg1 : i32, i32
  }
  func.func @transform_2(%arg0: i32, %arg1: i32) -> (i32, i32) {
    %c0_i32 = arith.constant 0 : i32
    %c0_i32_0 = arith.constant 0 : i32
    return %c0_i32, %arg1 : i32, i32
  }
  func.func @transform_3(%arg0: i32, %arg1: i32) -> (i32, i32) {
    %c0_i32 = arith.constant 0 : i32
    %c0_i32_0 = arith.constant 0 : i32
    return %arg1, %c0_i32 : i32, i32
  }
  func.func @transform_4(%arg0: i32, %arg1: i32) -> (i32, i32) {
    %c0_i32 = arith.constant 0 : i32
    %c0_i32_0 = arith.constant 0 : i32
    %c0_i32_1 = arith.constant 0 : i32
    return %c0_i32, %c0_i32_0 : i32, i32
  }
  func.func @transform_5(%arg0: i32, %arg1: i32) -> (i32, i32) {
    %c0_i32 = arith.constant 0 : i32
    %c0_i32_0 = arith.constant 0 : i32
    %c0_i32_1 = arith.constant 0 : i32
    return %c0_i32, %c0_i32_0 : i32, i32
  }
  func.func @transform_6(%arg0: i32, %arg1: i32) -> (i32, i32) {
    %c0_i32 = arith.constant 0 : i32
    %c0_i32_0 = arith.constant 0 : i32
    %c0_i32_1 = arith.constant 0 : i32
    return %c0_i32, %c0_i32_0 : i32, i32
  }
  func.func @transform_7(%arg0: i32, %arg1: i32) -> (i32, i32) {
    %c0_i32 = arith.constant 0 : i32
    %c0_i32_0 = arith.constant 0 : i32
    return %arg0, %c0_i32 : i32, i32
  }
}

module attributes {stable_mosaic.version = 11 : i64} {
  func.func @_matmul_kernel(%arg0: i32, %arg1: i32, %arg2: i32, %arg3: memref<14x32xf32, #tpu.memory_space<vmem>>, %arg4: memref<32x74xf32, #tpu.memory_space<vmem>>, %arg5: memref<1x74xf32, #tpu.memory_space<vmem>>, %arg6: memref<14x74xf32, #tpu.memory_space<vmem>>) attributes {dimension_semantics = [#tpu.dimension_semantics<parallel>, #tpu.dimension_semantics<parallel>, #tpu.dimension_semantics<arbitrary>], iteration_bounds = array<i64: 1, 1, 1>, scalar_prefetch = 0 : i64, scratch_operands = 0 : i64, tpu.core_type = #tpu.core_type<tc>, window_params = [{transform_indices = @transform_0, window_bounds = array<i64: 14, 32>}, {transform_indices = @transform_1, window_bounds = array<i64: 32, 74>}, {transform_indices = @transform_2, window_bounds = array<i64: 1, 74>}, {transform_indices = @transform_3, window_bounds = array<i64: 14, 74>}]} {
    %c0 = arith.constant 0 : index
    %c0_0 = arith.constant 0 : index
    %0 = vector.load %arg3[%c0, %c0_0] : memref<14x32xf32, #tpu.memory_space<vmem>>, vector<14x32xf32>
    %c0_1 = arith.constant 0 : index
    %c0_2 = arith.constant 0 : index
    %1 = vector.load %arg4[%c0_1, %c0_2] : memref<32x74xf32, #tpu.memory_space<vmem>>, vector<32x74xf32>
    %cst = arith.constant dense<0.000000e+00> : vector<14x74xf32>
    %2 = tpu.matmul %0, %1, %cst {dimension_numbers = #tpu.dot_dimension_numbers<[1], [0], [0], [1], [0, 0, 1, 1], [], []>} : vector<14x32xf32>, vector<32x74xf32>, vector<14x74xf32> -> vector<14x74xf32>
    %c0_3 = arith.constant 0 : index
    %c0_4 = arith.constant 0 : index
    %3 = vector.load %arg5[%c0_3, %c0_4] : memref<1x74xf32, #tpu.memory_space<vmem>>, vector<1x74xf32>
    %4 = vector.broadcast %3 : vector<1x74xf32> to vector<14x74xf32>
    %5 = arith.addf %2, %4 : vector<14x74xf32>
    %c0_5 = arith.constant 0 : index
    %c0_6 = arith.constant 0 : index
    %6 = vector.load %arg6[%c0_5, %c0_6] : memref<14x74xf32, #tpu.memory_space<vmem>>, vector<14x74xf32>
    tpu.vector_store %arg6[%c0_5, %c0_6], %5 {strides = array<i32>} : memref<14x74xf32, #tpu.memory_space<vmem>>, vector<14x74xf32>,
    return
  }
  func.func @transform_0(%arg0: i32, %arg1: i32, %arg2: i32) -> (i32, i32) {
    %c0_i32 = arith.constant 0 : i32
    return %arg0, %arg2 : i32, i32
  }
  func.func @transform_1(%arg0: i32, %arg1: i32, %arg2: i32) -> (i32, i32) {
    %c0_i32 = arith.constant 0 : i32
    return %arg2, %arg1 : i32, i32
  }
  func.func @transform_2(%arg0: i32, %arg1: i32, %arg2: i32) -> (i32, i32) {
    %c0_i32 = arith.constant 0 : i32
    %c0_i32_0 = arith.constant 0 : i32
    return %c0_i32, %arg1 : i32, i32
  }
  func.func @transform_3(%arg0: i32, %arg1: i32, %arg2: i32) -> (i32, i32) {
    %c0_i32 = arith.constant 0 : i32
    return %arg0, %arg1 : i32, i32
  }
}

</mosaic_0001>

<bundles_post_ra>
// kernel: cmcad_forward.29
= control target key start
LH: loop header
LB: loop body
LE: loop exit
PB: predicated region body
PF: predicated region fallthrough
CT: control target
= control target key end

     0   :  { %vm139_vm0 = vcmask 261120   ;;  %s381_s1 = inlined_call_operand.vmem [shape: f32[256,32], index: 1, kind: input, shape index: {}]   ;;  %s382_s0 = inlined_call_operand.vmem [shape: f32[16,256], index: 0, kind: input, shape index: {}]   ;;  %s383_s2 = inlined_call_operand.vmem [shape: f32[1,32], index: 2, kind: input, shape index: {}]   ;;  %s384_s3 = inlined_call_operand.vmem [shape: f32[16,32], index: 3, kind: input, shape index: {}]   ;;  %s385_s4 = inlined_call_operand.vmem [shape: f32[16,32], index: 4, kind: output, shape index: {}]  }
   0x1   :  { %v37_v0 = vld [vmem:[%s381_s1 + $0x80] sm:$0xff]  ;;  %v38_v1 = vld [vmem:[%s381_s1 + $0x88] sm:$0xff]  ;;  %v39_v5 = vld [vmem:[%s381_s1 + $0x90] sm:$0xff] }
   0x2   :  { %v21_v2 = vld [vmem:[%s381_s1] sm:$0xff]  ;;  %v185_v3 = vpack.c.bf16 %v38_v1, %v37_v0  ;;  %v22_v4 = vld [vmem:[%s381_s1 + $0x8] sm:$0xff]  ;;  %v40_v6 = vld [vmem:[%s381_s1 + $0x98] sm:$0xff] }
   0x3   :  { %v187_v7 = vpack.c.bf16 %v22_v4, %v21_v2  ;;  %v189_v8 = vpack.c.bf16 %v40_v6, %v39_v5  ;;  %v23_v9 = vld [vmem:[%s381_s1 + $0x10] sm:$0xff]  ;;  %v24_v10 = vld [vmem:[%s381_s1 + $0x18] sm:$0xff]  ;;  %v41_v11 = vld [vmem:[%s381_s1 + $0xa0] sm:$0xff] }
   0x4   :  { %186 = vmatprep.subr.bf16.mxu0 %v185_v3  ;;  %217 = vmatprep.subr.bf16.mxu1 %v185_v3  ;;  %v42_v12 = vld [vmem:[%s381_s1 + $0xa8] sm:$0xff]  ;;  %v191_v13 = vpack.c.bf16 %v24_v10, %v23_v9  ;;  %v25_v15 = vld [vmem:[%s381_s1 + $0x20] sm:$0xff]  ;;  %v43_v17 = vld [vmem:[%s381_s1 + $0xb0] sm:$0xff] }
   0x5   :  { %188 = vmatpush3.bf16.msra.mxu0 %v187_v7  ;;  %225 = vmatpush3.bf16.msra.mxu1 %v187_v7  ;;  %v193_v14 = vpack.c.bf16 %v42_v12, %v41_v11  ;;  %v26_v16 = vld [vmem:[%s381_s1 + $0x28] sm:$0xff]  ;;  %v44_v18 = vld [vmem:[%s381_s1 + $0xb8] sm:$0xff]  ;;  %v27_v21 = vld [vmem:[%s381_s1 + $0x30] sm:$0xff] }
   0x6   :  { %190 = vmatprep.subr.bf16.mxu0 %v189_v8  ;;  %218 = vmatprep.subr.bf16.mxu1 %v189_v8  ;;  %v195_v19 = vpack.c.bf16 %v26_v16, %v25_v15  ;;  %v197_v20 = vpack.c.bf16 %v44_v18, %v43_v17  ;;  %v28_v22 = vld [vmem:[%s381_s1 + $0x38] sm:$0xff]  ;;  %v45_v23 = vld [vmem:[%s381_s1 + $0xc0] sm:$0xff]  ;;  %v46_v24 = vld [vmem:[%s381_s1 + $0xc8] sm:$0xff] }
   0x7   :  { %v18_v25 = vld [vmem:[%s382_s0 + $0x8] sm:$0xff]  ;;  %v20_v26 = vld [vmem:[%s382_s0 + $0x18] sm:$0xff]  ;;  %v199_v27 = vpack.c.bf16 %v28_v22, %v27_v21  ;;  %v201_v28 = vpack.c.bf16 %v46_v24, %v45_v23  ;;  %v29_v29 = vld [vmem:[%s381_s1 + $0x40] sm:$0xff] }
   0x8   :  { %124 = vmatprep.mubr.f32.mxu0 %v18_v25  ;;  %v30_v30 = vld [vmem:[%s381_s1 + $0x48] sm:$0xff]  ;;  %v47_v31 = vld [vmem:[%s381_s1 + $0xd0] sm:$0xff]  ;;  %v48_v32 = vld [vmem:[%s381_s1 + $0xd8] sm:$0xff]  ;;  %129 = vmatprep.mubr.f32.mxu1 %v20_v26 }
   0x9   :  { %192 = vmatpush3.bf16.msra.mxu0 %v191_v13  ;;  %226 = vmatpush3.bf16.msra.mxu1 %v191_v13  ;;  %v203_v33 = vpack.c.bf16 %v30_v30, %v29_v29  ;;  %v205_v34 = vpack.c.bf16 %v48_v32, %v47_v31  ;;  %v31_v35 = vld [vmem:[%s381_s1 + $0x50] sm:$0xff]  ;;  %v32_v36 = vld [vmem:[%s381_s1 + $0x58] sm:$0xff]  ;;  %v49_v37 = vld [vmem:[%s381_s1 + $0xe0] sm:$0xff] }
   0xa   :  { %194 = vmatprep.subr.bf16.mxu0 %v193_v14  ;;  %219 = vmatprep.subr.bf16.mxu1 %v193_v14  ;;  %v50_v38 = vld [vmem:[%s381_s1 + $0xe8] sm:$0xff]  ;;  %v207_v39 = vpack.c.bf16 %v32_v36, %v31_v35  ;;  %v33_v41 = vld [vmem:[%s381_s1 + $0x60] sm:$0xff]  ;;  %v51_v43 = vld [vmem:[%s381_s1 + $0xf0] sm:$0xff] }
   0xb   :  { %v209_v40 = vpack.c.bf16 %v50_v38, %v49_v37  ;;  %v34_v42 = vld [vmem:[%s381_s1 + $0x68] sm:$0xff]  ;;  %v52_v44 = vld [vmem:[%s381_s1 + $0xf8] sm:$0xff]  ;;  %v35_v47 = vld [vmem:[%s381_s1 + $0x70] sm:$0xff] }
   0xc   :  { %v211_v45 = vpack.c.bf16 %v34_v42, %v33_v41  ;;  %v213_v46 = vpack.c.bf16 %v52_v44, %v51_v43  ;;  %v36_v48 = vld [vmem:[%s381_s1 + $0x78] sm:$0xff]  ;;  %v17_v50 = vld [vmem:[%s382_s0] sm:$0xff]  ;;  %v19_v51 = vld [vmem:[%s382_s0 + $0x10] sm:$0xff] }
   0xd   :  { %196 = vmatpush3.bf16.msra.mxu0 %v195_v19  ;;  %227 = vmatpush3.bf16.msra.mxu1 %v195_v19  ;;  %v215_v49 = vpack.c.bf16 %v36_v48, %v35_v47  ;;  %v146_v54 = vld [vmem:[%s383_s2] ss:$0 sm:$0xff]  ;;  %v136_v60 = vld [vmem:[%s384_s3 + $0x8] sm:$0xff] }
   0xe   :  { %198 = vmatprep.subr.bf16.mxu0 %v197_v20  ;;  %220 = vmatprep.subr.bf16.mxu1 %v197_v20  ;;  %v135_v59 = vld [vmem:[%s384_s3] sm:$0xff] }
  0x11   :  { %200 = vmatpush3.bf16.msra.mxu0 %v199_v27  ;;  %228 = vmatpush3.bf16.msra.mxu1 %v199_v27 }
  0x12   :  { %202 = vmatprep.subr.bf16.mxu0 %v201_v28  ;;  %221 = vmatprep.subr.bf16.mxu1 %v201_v28 }
  0x15   :  { %204 = vmatpush3.bf16.msra.mxu0 %v203_v33  ;;  %229 = vmatpush3.bf16.msra.mxu1 %v203_v33 }
  0x16   :  { %206 = vmatprep.subr.bf16.mxu0 %v205_v34  ;;  %222 = vmatprep.subr.bf16.mxu1 %v205_v34 }
  0x19   :  { %208 = vmatpush3.bf16.msra.mxu0 %v207_v39  ;;  %230 = vmatpush3.bf16.msra.mxu1 %v207_v39 }
  0x1a   :  { %210 = vmatprep.subr.bf16.mxu0 %v209_v40  ;;  %223 = vmatprep.subr.bf16.mxu1 %v209_v40 }
  0x1d   :  { %212 = vmatpush3.bf16.msra.mxu0 %v211_v45  ;;  %231 = vmatpush3.bf16.msra.mxu1 %v211_v45 }
  0x1e   :  { %214 = vmatprep.subr.bf16.mxu0 %v213_v46  ;;  %224 = vmatprep.subr.bf16.mxu1 %v213_v46 }
  0x21   :  { %216 = vmatpush3.bf16.msra.mxu0 %v215_v49  ;;  %232 = vmatpush3.bf16.msra.mxu1 %v215_v49 }
  0x24   :  { %125 = vmatmul.mubr.f32.vlgmr.msra.gmra.mrb[0].mxu0 %v17_v50  ;;  %130 = vmatmul.mubr.f32.vlgmr.msra.gmra.mrb[0].mxu1 %v19_v51 }
  0xf7   :  { %v179_v52 = vpop.f32.mrb[0].mxu0  ;;  %v182_v53 = vpop.f32.mrb[0].mxu1 }
  0xf8   :  { %v180_v55 = vpop.f32.mrb[1].mxu0  ;;  %v183_v56 = vpop.f32.mrb[1].mxu1 }
  0xf9   :  { %v181_v57 = vadd.f32 %v180_v55, %v179_v52  ;;  %v184_v58 = vadd.f32 %v183_v56, %v182_v53 }
  0xfb   :  { %v127_v61 = vadd.f32 %v181_v57, %v146_v54  ;;  %v132_v62 = vadd.f32 %v184_v58, %v146_v54 }
  0xfd   :  { %v137_v63 = vadd.f32 %v135_v59, %v127_v61  ;;  %v138_v0 = vadd.f32 %v136_v60, %v132_v62 }
  0xff   :  { %140 = vst.msk [vmem:[%s385_s4] sm:$0xff] %vm139_vm0, %v137_v63  ;;  %141 = vst.msk [vmem:[%s385_s4 + $0x8] sm:$0xff] %vm139_vm0, %v138_v0 }

// kernel: cmcad_forward.30
= control target key start
LH: loop header
LB: loop body
LE: loop exit
PB: predicated region body
PF: predicated region fallthrough
CT: control target
= control target key end

     0   :  { %vm27_vm0 = vcmask 261120   ;;  %vm109_vm1 = vcmask 785408   ;;  %s191_s1 = inlined_call_operand.vmem [shape: f32[32,96], index: 1, kind: input, shape index: {}]   ;;  %s192_s0 = inlined_call_operand.vmem [shape: f32[16,32], index: 0, kind: input, shape index: {}]   ;;  %s193_s2 = inlined_call_operand.vmem [shape: f32[1,96], index: 2, kind: input, shape index: {}]   ;;  %s194_s3 = inlined_call_operand.vmem [shape: f32[16,96], index: 3, kind: output, shape index: {}]  }
   0x1   :  { %v16_v0 = vld [vmem:[%s191_s1] sm:$0xff]  ;;  %v17_v1 = vld [vmem:[%s191_s1 + $0x8] sm:$0xff]  ;;  %v18_v2 = vld [vmem:[%s191_s1 + $0x10] sm:$0xff] }
   0x2   :  { %v136_v3 = vpack.c.bf16 %v17_v1, %v16_v0  ;;  %v19_v4 = vld [vmem:[%s191_s1 + $0x18] sm:$0xff]  ;;  %v14_v5 = vld [vmem:[%s192_s0] sm:$0xff]  ;;  %v15_v7 = vld [vmem:[%s192_s0 + $0x8] sm:$0xff] }
   0x3   :  { %v140_v6 = vpack.c.bf16 %v19_v4, %v18_v2  ;;  %133 = vmatprep.mubr.msk.f32.mxu0 %vm27_vm0, %v14_v5  ;;  %v116_v8 = vld [vmem:[%s193_s2] ss:$0 sm:$0xff] }
   0x4   :  { %137 = vmatprep.subr.bf16.mxu0 %v136_v3 }
   0x5   :  { %139 = vmatpush3.bf16.msra.mxu0 %v136_v3 }
   0x6   :  { %141 = vmatprep.subr.bf16.mxu0 %v140_v6 }
   0x9   :  { %143 = vmatpush3.bf16.msra.mxu0 %v140_v6 }
   0xc   :  { %134 = vmatmul.mubr.msk.f32.vlgmr.msra.gmra.mrb[0].mxu0 %vm27_vm0, %v15_v7 }
  0xdf   :  { %v135_v9 = vpop.f32.mrb[0].mxu0 }
  0xe0   :  { %v106_v10 = vadd.f32 %v135_v9, %v116_v8  ;;  %v100_v11 = vpop.f32.mrb[1].mxu0 }
  0xe1   :  { %v101_v12 = vadd.f32 %v116_v8, %v100_v11 }
  0xe2   :  { %111 = vst.msk [vmem:[%s194_s3 + $0x8] sm:$0xff] %vm109_vm1, %v106_v10 }
  0xe3   :  { %110 = vst.msk [vmem:[%s194_s3] sm:$0xff] %vm109_vm1, %v101_v12 }

// kernel: cmcad_forward.32
= control target key start
LH: loop header
LB: loop body
LE: loop exit
PB: predicated region body
PF: predicated region fallthrough
CT: control target
= control target key end

     0   :  { %vm36_vm0 = vcmask 261120   ;;  %s289_s1 = inlined_call_operand.vmem [shape: f32[32,32], index: 1, kind: input, shape index: {}]   ;;  %s290_s0 = inlined_call_operand.vmem [shape: f32[16,32], index: 0, kind: input, shape index: {}]   ;;  %s291_s2 = inlined_call_operand.vmem [shape: f32[1,32], index: 2, kind: input, shape index: {}]   ;;  %s292_s3 = inlined_call_operand.vmem [shape: f32[16,32], index: 3, kind: input, shape index: {}]   ;;  %s293_s4 = inlined_call_operand.vmem [shape: f32[1,32], index: 4, kind: input, shape index: {}]   ;;  %s294_s5 = inlined_call_operand.vmem [shape: f32[1,32], index: 5, kind: input, shape index: {}]   ;;  %s295_s6 = inlined_call_operand.vmem [shape: f32[16,32], index: 6, kind: output, shape index: {}]  }
   0x1   :  { %v25_v0 = vld [vmem:[%s289_s1] sm:$0xff]  ;;  %v26_v1 = vld [vmem:[%s289_s1 + $0x8] sm:$0xff]  ;;  %v27_v2 = vld [vmem:[%s289_s1 + $0x10] sm:$0xff] }
   0x2   :  { %v195_v3 = vpack.c.bf16 %v26_v1, %v25_v0  ;;  %v28_v4 = vld [vmem:[%s289_s1 + $0x18] sm:$0xff]  ;;  %v23_v5 = vld [vmem:[%s290_s0] sm:$0xff]  ;;  %v24_v7 = vld [vmem:[%s290_s0 + $0x8] sm:$0xff] }
   0x3   :  { %v199_v6 = vpack.c.bf16 %v28_v4, %v27_v2  ;;  %192 = vmatprep.mubr.msk.f32.mxu0 %vm36_vm0, %v23_v5  ;;  %v173_v8 = vld [vmem:[%s291_s2] ss:$0 sm:$0xff]  ;;  %v119_v14 = vld [vmem:[%s292_s3 + $0x8] sm:$0xff] }
   0x4   :  { %196 = vmatprep.subr.bf16.mxu0 %v195_v3  ;;  %v118_v11 = vld [vmem:[%s292_s3] sm:$0xff] }
   0x5   :  { %198 = vmatpush3.bf16.msra.mxu0 %v195_v3  ;;  %v176_v36 = vld [vmem:[%s293_s4] ss:$0 sm:$0xff] }
   0x6   :  { %200 = vmatprep.subr.bf16.mxu0 %v199_v6  ;;  %v177_v38 = vld [vmem:[%s294_s5] ss:$0 sm:$0xff] }
   0x9   :  { %202 = vmatpush3.bf16.msra.mxu0 %v199_v6 }
   0xc   :  { %193 = vmatmul.mubr.msk.f32.vlgmr.msra.gmra.mrb[0].mxu0 %vm36_vm0, %v24_v7 }
  0xdf   :  { %v194_v9 = vpop.f32.mrb[0].mxu0 }
  0xe0   :  { %v109_v10 = vpop.f32.mrb[1].mxu0  ;;  %v115_v12 = vadd.f32 %v194_v9, %v173_v8 }
  0xe1   :  { %v110_v13 = vadd.f32 %v173_v8, %v109_v10 }
  0xe2   :  { %v121_v17 = vadd.f32 %v119_v14, %v115_v12 }
  0xe3   :  { %v120_v15 = vadd.f32 %v118_v11, %v110_v13 }
  0xe4   :  { %v127_v18 = vsel %vm36_vm0, %v121_v17, 0.0 }
  0xe5   :  { %v124_v16 = vsel %vm36_vm0, %v120_v15, 0.0 }
  0xe6   :  { %125 = vadd.xlane.f32.xlu0 %v124_v16 }
  0xea   :  { %128 = vadd.xlane.f32.xlu0 %v127_v18 }
 0x173   :  { %v126_v19 = vpop.xlane.xlu0 %125 }
 0x174   :  { %v131_v20 = vmul.f32 0.03125, %v126_v19 }
 0x176   :  { %v133_v21 = vsub.f32 %v120_v15, %v131_v20 }
 0x177   :  { %v129_v22 = vpop.xlane.xlu0 %128 }
 0x178   :  { %v132_v23 = vmul.f32 0.03125, %v129_v22  ;;  %v135_v24 = vmul.f32 %v133_v21, %v133_v21 }
 0x17a   :  { %v134_v25 = vsub.f32 %v121_v17, %v132_v23  ;;  %v137_v26 = vsel %vm36_vm0, %v135_v24, 0.0 }
 0x17b   :  { %138 = vadd.xlane.f32.xlu1 %v137_v26 }
 0x17c   :  { %v136_v27 = vmul.f32 %v134_v25, %v134_v25 }
 0x17e   :  { %v140_v28 = vsel %vm36_vm0, %v136_v27, 0.0 }
 0x17f   :  { %141 = vadd.xlane.f32.xlu1 %v140_v28 }
 0x208   :  { %v139_v29 = vpop.xlane.xlu1 %138 }
 0x209   :  { %v143_v30 = vmul.f32 0.03125, %v139_v29 }
 0x20b   :  { %v145_v31 = vadd.f32 1e-05, %v143_v30 }
 0x20c   :  { %v142_v32 = vpop.xlane.xlu1 %141 }
 0x20d   :  { %203 = vrsqrt.f32 %v145_v31  ;;  %v144_v33 = vmul.f32 0.03125, %v142_v32 }
 0x20f   :  { %v146_v34 = vadd.f32 1e-05, %v144_v33 }
 0x211   :  { %205 = vrsqrt.f32 %v146_v34 }
 0x217   :  { %v204_v35 = vpop.eup %203 }
 0x218   :  { %v149_v37 = vmul.f32 %v204_v35, %v133_v21 }
 0x21a   :  { %v157_v39 = vmul.f32 %v176_v36, %v149_v37 }
 0x21b   :  { %v206_v40 = vpop.eup %205 }
 0x21c   :  { %v165_v41 = vadd.f32 %v177_v38, %v157_v39  ;;  %v150_v42 = vmul.f32 %v206_v40, %v134_v25 }
 0x21e   :  { %167 = vst.msk [vmem:[%s295_s6] sm:$0xff] %vm36_vm0, %v165_v41  ;;  %v158_v43 = vmul.f32 %v176_v36, %v150_v42 }
 0x220   :  { %v166_v44 = vadd.f32 %v177_v38, %v158_v43 }
 0x222   :  { %168 = vst.msk [vmem:[%s295_s6 + $0x8] sm:$0xff] %vm36_vm0, %v166_v44 }

// kernel: cmcad_forward.31
= control target key start
LH: loop header
LB: loop body
LE: loop exit
PB: predicated region body
PF: predicated region fallthrough
CT: control target
= control target key end

     0   :  { %s1068_s9 = smov 0   ;;  %s1162_s0 = inlined_call_operand.vmem [shape: f32[2,8,96], index: 0, kind: input, shape index: {}]   ;;  %s1163_s1 = inlined_call_operand.vmem [shape: f32[2,1,8], index: 1, kind: input, shape index: {}]   ;;  %s1164_s2 = inlined_call_operand.vmem [shape: f32[2,8,32], index: 2, kind: output, shape index: {}]  }
   0x1 LB: > { %s912_s10 = sadd.s32 4294967295, %s1035_s9   ;;  %p916_p0 = scmp.ge.s32.totalorder %s1035_s9, 1  ;;  %s1035_s9 = sphi %s1068_s9, %s12_s9  }
   0x2   : > { %p119_p1 = scmp.lt.s32.totalorder %s1035_s9, 3 }
   0x4   : > { %p120_p2 = pnand %p916_p0, %p119_p1 }
   0x5   : > { %p142_p3 = scmp.lt.s32.totalorder (!%p120_p2), %s912_s10, 1  ;;  %v1037_v0 = vmov (!%p120_p2), 0.0   ;;  %vm1038_vm0 = vmmov (!%p120_p2), 0   ;;  %s1039_s15 = smov (!%p120_p2), 96   ;;  %vm160_vm1 = vcmask (!%p120_p2), 64512   ;;  %v237_v3 = vlaneseq (!%p120_p2) }
   0x6   : > { %123 = sbr.rel (%p120_p2) target bundleno = 1226 (0x4ca), region = 28  ;;  %949 = vmatprep.subr.mxu0 (!%p120_p2), %v1037_v0  ;;  %951 = vmatprep.mubr.msk.f32.mxu0 (!%p120_p2), %vm1038_vm0, %v1037_v0  ;;  %s1040_s16 = smov (!%p120_p2), 64   ;;  %vm844_vm2 = vcmask (!%p120_p2), 130048   ;;  %vm846_vm3 = vcmask (!%p120_p2), 195584   ;;  %vm848_vm4 = vcmask (!%p120_p2), 261120  }
   0x7   : > { %954 = vmatprep.subr.mxu1 (!%p120_p2), %v1037_v0  ;;  %956 = vmatprep.mubr.msk.f32.mxu1 (!%p120_p2), %vm1038_vm0, %v1037_v0  ;;  %s1041_s17 = smov (!%p120_p2), 88   ;;  %s1042_s18 = smov (!%p120_p2), 120   ;;  %v238_v6 = vshrl.u32 (!%p120_p2), %v237_v3, 7 }
   0x8   : > { %s1043_s19 = smov (!%p120_p2), 80   ;;  %s1044_s20 = smov (!%p120_p2), 112  }
   0x9   : > { %s1045_s21 = smov (!%p120_p2), 72   ;;  %s1046_s22 = smov (!%p120_p2), 104   ;;  %v239_v8 = vsub.s32 (!%p120_p2), 0, %v238_v6 }
   0xa   : > { %s1047_s26 = smov (!%p120_p2), 56   ;;  %s1048_s27 = smov (!%p120_p2), 48  }
   0xb   : > { %s1049_s28 = smov (!%p120_p2), 40   ;;  %s1050_s29 = smov (!%p120_p2), 8  }
   0xc   : > { %s1051_s30 = smov (!%p120_p2), 16   ;;  %s1052_s3 = smov (!%p120_p2), 24  }
   0xd   : > { %s1166_s10 = smov (!%p142_p3, %s912_s10), 1 }
   0xe   : > { %s917_s11 = sshll.u32 %s1166_s10, 3  ;;  %s148_s25 = scalar_lea.vmem %s1163_s1, %s1166_s10 }
   0xf   : > { %s145_s14 = scalar_lea.vmem %s1162_s0, %s917_s11  ;;  %v154_v4 = vld [vmem:[%s148_s25] sm:$0x1]  ;;  %s152_s6 = scalar_lea.vmem %s1164_s2, %s917_s11 }
  0x10   : > { %v1090_v1 = vld [vmem:[%s145_s14] sm:$0xff]  ;;  %v155_v5 = vsub.f32 1.0, %v154_v4 }
  0x11   : > { %158 = vrot.lane.b32.xlu0 %v1090_v1, %s1039_s15  ;;  %252 = vrot.lane.b32.xlu1 %v1090_v1, %s1040_s16 }
  0x12   : > { %v156_v7 = vmul.f32 -1e+09, %v155_v5 }
  0x14   : > { %v240_v9 = vrot.slane %v156_v7, %v239_v8 }
  0x15   : > { %332 = vrot.lane.b32.xlu1 %v1090_v1, %s1041_s17 }
  0x19   : > { %330 = vrot.lane.b32.xlu1 %v1090_v1, %s1042_s18 }
  0x1d   : > { %499 = vrot.lane.b32.xlu1 %v1090_v1, %s1043_s19 }
  0x21   : > { %497 = vrot.lane.b32.xlu1 %v1090_v1, %s1044_s20 }
  0x25   : > { %666 = vrot.lane.b32.xlu1 %v1090_v1, %s1045_s21 }
  0x29   : > { %664 = vrot.lane.b32.xlu1 %v1090_v1, %s1046_s22 }
  0x83   : > { %v159_v2 = vpop.permute.xlu0 %158  ;;  %v253_v15 = vpop.permute.xlu1 %252 }
  0x84   : > { %950 = vmatpush3.xpose.msk.msra.mxu0 %vm160_vm1, %v159_v2  ;;  %955 = vmatpush3.msra.mxu1 %v253_v15 }
  0x85   : > { %964 = vmatprep.subr.mxu0 %v1037_v0  ;;  %959 = vmatprep.subr.mxu1 %v1037_v0 }
  0x87   : > { %952 = vmatmul.mubr.msk.f32.vlgmr.msra.gmra.mrb[0].mxu0 %vm160_vm1, %v1090_v1  ;;  %v333_v16 = vpop.permute.xlu1 %332 }
  0x88   : > { %966 = vmatprep.mubr.msk.f32.mxu0 %vm1038_vm0, %v1037_v0 }
  0x8b   : > { %v331_v19 = vpop.permute.xlu1 %330 }
  0x8f   : > { %v500_v21 = vpop.permute.xlu1 %499 }
  0x93   : > { %v498_v22 = vpop.permute.xlu1 %497 }
  0x97   : > { %v667_v24 = vpop.permute.xlu1 %666 }
  0x9b   : > { %v665_v25 = vpop.permute.xlu1 %664 }
 0x15a   : > { %v231_v10 = vpop.f32.mrb[0].mxu0 }
 0x15b   : > { %v235_v11 = vmul.f32 0.35355338, %v231_v10  ;;  %v953_v12 = vpop.f32.mrb[1].mxu0 }
 0x15d   : > { %v242_v13 = vadd.f32 %v240_v9, %v235_v11 }
 0x15f   : > { %v243_v14 = vsel %vm160_vm1, %v242_v13, -inf }
 0x160   : > { %244 = vmax.xlane.f32.xlu0 %v243_v14 }
 0x176   : > { %419 = vrot.lane.b32.xlu0 %v1090_v1, %s1047_s26 }
 0x1ed   : > { %v245_v17 = vpop.xlane.xlu0 %244 }
 0x1ee   : > { %v246_v18 = vsub.f32 %v242_v13, %v245_v17 }
 0x1f0   : > { %v247_v20 = vmul.f32 1.442695, %v246_v18 }
 0x1f1   : > { %v420_v26 = vpop.permute.xlu0 %419 }
 0x1f2   : > { %1013 = vpow2.f32 %v247_v20  ;;  %965 = vmatpush3.msra.mxu0 %v420_v26 }
 0x1f3   : > { %974 = vmatprep.subr.mxu0 %v1037_v0 }
 0x1fc   : > { %v1113_v23 = vpop.eup %1013 }
 0x1fd   : > { %957 = vmatmul.mubr.msk.f32.vlgmr.msra.gmra.mrb[0].mxu1 %vm160_vm1, %v1113_v23  ;;  %v249_v61 = vsel %vm160_vm1, %v1113_v23, 0.0 }
 0x1fe   : > { %960 = vmatpush3.xpose.msk.msra.mxu1 %vm160_vm1, %v333_v16  ;;  %961 = vmatprep.mubr.msk.f32.mxu1 %vm1038_vm0, %v1037_v0 }
 0x1ff   : > { %969 = vmatprep.subr.mxu1 %v1037_v0 }
 0x201   : > { %962 = vmatmul.mubr.msk.f32.vlgmr.msra.gmra.mrb[2].mxu1 %vm160_vm1, %v331_v19 }
 0x202   : > { %970 = vmatpush3.xpose.msk.msra.mxu1 %vm160_vm1, %v500_v21  ;;  %971 = vmatprep.mubr.msk.f32.mxu1 %vm1038_vm0, %v1037_v0 }
 0x203   : > { %979 = vmatprep.subr.mxu1 %v1037_v0 }
 0x205   : > { %972 = vmatmul.mubr.msk.f32.vlgmr.msra.gmra.mrb[4].mxu1 %vm160_vm1, %v498_v22 }
 0x206   : > { %980 = vmatpush3.xpose.msk.msra.mxu1 %vm160_vm1, %v667_v24  ;;  %981 = vmatprep.mubr.msk.f32.mxu1 %vm1038_vm0, %v1037_v0 }
 0x209   : > { %982 = vmatmul.mubr.msk.f32.vlgmr.msra.gmra.mrb[6].mxu1 %vm160_vm1, %v665_v25 }
 0x2d0   : > { %v1132_v27 = vpop.f32.mrb[0].mxu1 }
 0x2d1   : > { %v958_v28 = vpop.f32.mrb[1].mxu1 }
 0x2d4   : > { %v404_v29 = vpop.f32.mrb[2].mxu1 }
 0x2d5   : > { %v408_v30 = vmul.f32 0.35355338, %v404_v29  ;;  %v963_v31 = vpop.f32.mrb[3].mxu1 }
 0x2d7   : > { %v409_v32 = vadd.f32 %v408_v30, %v240_v9 }
 0x2d8   : > { %v571_v33 = vpop.f32.mrb[4].mxu1 }
 0x2d9   : > { %v575_v34 = vmul.f32 0.35355338, %v571_v33  ;;  %v973_v35 = vpop.f32.mrb[5].mxu1  ;;  %v410_v36 = vsel %vm160_vm1, %v409_v32, -inf }
 0x2da   : > { %411 = vmax.xlane.f32.xlu1 %v410_v36 }
 0x2db   : > { %v576_v37 = vadd.f32 %v575_v34, %v240_v9 }
 0x2dc   : > { %v738_v38 = vpop.f32.mrb[6].mxu1 }
 0x2dd   : > { %v742_v39 = vmul.f32 0.35355338, %v738_v38  ;;  %v983_v40 = vpop.f32.mrb[7].mxu1  ;;  %v577_v41 = vsel %vm160_vm1, %v576_v37, -inf }
 0x2de   : > { %578 = vmax.xlane.f32.xlu0 %v577_v41 }
 0x2df   : > { %v743_v42 = vadd.f32 %v742_v39, %v240_v9 }
 0x2e1   : > { %v744_v43 = vsel %vm160_vm1, %v743_v42, -inf }
 0x2e2   : > { %745 = vmax.xlane.f32.xlu0 %v744_v43 }
 0x2eb   : > { %586 = vrot.lane.b32.xlu1 %v1090_v1, %s1048_s27 }
 0x2f8   : > { %753 = vrot.lane.b32.xlu0 %v1090_v1, %s1049_s28 }
 0x367   : > { %v412_v44 = vpop.xlane.xlu1 %411 }
 0x368   : > { %v413_v45 = vsub.f32 %v409_v32, %v412_v44 }
 0x36a   : > { %v414_v46 = vmul.f32 1.442695, %v413_v45 }
 0x36b   : > { %v579_v47 = vpop.xlane.xlu0 %578  ;;  %v587_v53 = vpop.permute.xlu1 %586 }
 0x36c   : > { %1015 = vpow2.f32 %v414_v46  ;;  %v580_v48 = vsub.f32 %v576_v37, %v579_v47 }
 0x36e   : > { %v581_v49 = vmul.f32 1.442695, %v580_v48 }
 0x36f   : > { %v746_v50 = vpop.xlane.xlu0 %745 }
 0x370   : > { %1017 = vpow2.f32 %v581_v49  ;;  %v747_v51 = vsub.f32 %v743_v42, %v746_v50 }
 0x372   : > { %v748_v52 = vmul.f32 1.442695, %v747_v51 }
 0x373   : > { %v754_v56 = vpop.permute.xlu0 %753 }
 0x374   : > { %1019 = vpow2.f32 %v748_v52 }
 0x376   : > { %v1016_v54 = vpop.eup %1015 }
 0x377   : > { %967 = vmatmul.mubr.msk.f32.vlgmr.msra.gmra.mrb[2].mxu0 %vm160_vm1, %v1016_v54  ;;  %v416_v55 = vsel %vm160_vm1, %v1016_v54, 0.0 }
 0x378   : > { %975 = vmatpush3.msra.mxu0 %v587_v53  ;;  %417 = vadd.xlane.f32.xlu0 %v416_v55 }
 0x379   : > { %976 = vmatprep.mubr.msk.f32.mxu0 %vm1038_vm0, %v1037_v0  ;;  %984 = vmatprep.subr.mxu0 %v1037_v0 }
 0x37a   : > { %v1018_v57 = vpop.eup %1017 }
 0x37b   : > { %977 = vmatmul.mubr.msk.f32.vlgmr.msra.gmra.mrb[4].mxu0 %vm160_vm1, %v1018_v57  ;;  %v583_v58 = vsel %vm160_vm1, %v1018_v57, 0.0 }
 0x37c   : > { %985 = vmatpush3.msra.mxu0 %v754_v56  ;;  %584 = vadd.xlane.f32.xlu1 %v583_v58 }
 0x37d   : > { %986 = vmatprep.mubr.msk.f32.mxu0 %vm1038_vm0, %v1037_v0 }
 0x37e   : > { %v1020_v59 = vpop.eup %1019 }
 0x37f   : > { %987 = vmatmul.mubr.msk.f32.vlgmr.msra.gmra.mrb[6].mxu0 %vm160_vm1, %v1020_v59  ;;  %v750_v60 = vsel %vm160_vm1, %v1020_v59, 0.0 }
 0x380   : > { %751 = vadd.xlane.f32.xlu0 %v750_v60 }
 0x384   : > { %250 = vadd.xlane.f32.xlu0 %v249_v61 }
 0x405   : > { %v418_v62 = vpop.xlane.xlu0 %417 }
 0x406   : > { %1021 = vrcp.f32 %v418_v62 }
 0x409   : > { %v585_v63 = vpop.xlane.xlu1 %584 }
 0x40a   : > { %1023 = vrcp.f32 %v585_v63 }
 0x40d   : > { %v752_v1 = vpop.xlane.xlu0 %751 }
 0x40e   : > { %1025 = vrcp.f32 %v752_v1 }
 0x410   : > { %v1022_v2 = vpop.eup %1021 }
 0x411   : > { %v251_v13 = vpop.xlane.xlu0 %250 }
 0x412   : > { %1027 = vrcp.f32 %v251_v13 }
 0x414   : > { %v1024_v5 = vpop.eup %1023 }
 0x418   : > { %v1026_v9 = vpop.eup %1025 }
 0x41c   : > { %v1028_v14 = vpop.eup %1027 }
 0x41d   : > { %v329_v16 = vmul.f32 %v1028_v14, %v1132_v27 }
 0x44a   : > { %v491_v3 = vpop.f32.mrb[2].mxu0 }
 0x44b   : > { %v496_v4 = vmul.f32 %v1022_v2, %v491_v3  ;;  %v968_v0 = vpop.f32.mrb[3].mxu0 }
 0x44d   : > { %832 = vrot.lane.b32.xlu0 %v496_v4, %s1050_s29 }
 0x44e   : > { %v658_v6 = vpop.f32.mrb[4].mxu0 }
 0x44f   : > { %v663_v7 = vmul.f32 %v1024_v5, %v658_v6  ;;  %v978_v8 = vpop.f32.mrb[5].mxu0 }
 0x451   : > { %836 = vrot.lane.b32.xlu1 %v663_v7, %s1051_s30 }
 0x452   : > { %v825_v10 = vpop.f32.mrb[6].mxu0 }
 0x453   : > { %v830_v11 = vmul.f32 %v1026_v9, %v825_v10  ;;  %v988_v12 = vpop.f32.mrb[7].mxu0 }
 0x455   : > { %840 = vrot.lane.b32.xlu0 %v830_v11, %s1052_s3 }
 0x4bf   : > { %v833_v15 = vpop.permute.xlu0 %832 }
 0x4c0   : > { %v843_v18 = vsel %vm160_vm1, %v329_v16, %v833_v15 }
 0x4c3   : > { %v837_v17 = vpop.permute.xlu1 %836 }
 0x4c4   : > { %v845_v19 = vsel %vm844_vm2, %v843_v18, %v837_v17 }
 0x4c7   : > { %v841_v20 = vpop.permute.xlu0 %840 }
 0x4c8   : > { %v847_v21 = vsel %vm846_vm3, %v845_v19, %v841_v20 }
 0x4c9   : > { %849 = vst.msk [vmem:[%s152_s6] sm:$0xff] %vm848_vm4, %v847_v21 }
 0x4ca PF: > { %s12_s9 = sadd.s32 1, %s1035_s9  }
 0x4cb   : > { %p9_p4 = scmp.ge.s32.totalorder %s12_s9, 4  }
 0x4cd   :  { %11 = sbr.rel (!%p9_p4) target bundleno = 1 (0x1), region = 61 }

// kernel: cmcad_forward.28
= control target key start
LH: loop header
LB: loop body
LE: loop exit
PB: predicated region body
PF: predicated region fallthrough
CT: control target
= control target key end

     0   :  { %vm27_vm0 = vcmask 1043456   ;;  %vm23_vm1 = vcmask 31744   ;;  %v119_v0 = vmov 0.0   ;;  %vm120_vm2 = vmmov 0   ;;  %s153_s1 = inlined_call_operand.vmem [shape: f32[4,32], index: 1, kind: input, shape index: {}]   ;;  %s154_s0 = inlined_call_operand.vmem [shape: f32[2,4], index: 0, kind: input, shape index: {}]   ;;  %s155_s2 = inlined_call_operand.vmem [shape: f32[1,32], index: 2, kind: input, shape index: {}]   ;;  %s156_s3 = inlined_call_operand.vmem [shape: f32[2,32], index: 3, kind: output, shape index: {}]  }
   0x1   :  { %112 = vmatprep.subr.mxu0 %v119_v0  ;;  %v15_v1 = vld [vmem:[%s153_s1] sm:$0xf]  ;;  %114 = vmatprep.mubr.msk.f32.mxu0 %vm120_vm2, %v119_v0  ;;  %vm101_vm3 = vcmask 254976  }
   0x2   :  { %v14_v2 = vld [vmem:[%s154_s0] sm:$0x3]  ;;  %113 = vmatpush3.msk.msra.mxu0 %vm27_vm0, %v15_v1 }
   0x3   :  { %115 = vmatmul.mubr.msk.f32.vlgmr.msra.gmra.mrb[0].mxu0 %vm23_vm1, %v14_v2  ;;  %v107_v3 = vld [vmem:[%s155_s2] ss:$0 sm:$0xff] }
  0xd6   :  { %v97_v4 = vpop.f32.mrb[0].mxu0 }
  0xd7   :  { %v98_v5 = vadd.f32 %v107_v3, %v97_v4  ;;  %v116_v6 = vpop.f32.mrb[1].mxu0 }
  0xd9   :  { %102 = vst.msk [vmem:[%s156_s3] sm:$0x3] %vm101_vm3, %v98_v5 }

// kernel: cmcad_forward.33
= control target key start
LH: loop header
LB: loop body
LE: loop exit
PB: predicated region body
PF: predicated region fallthrough
CT: control target
= control target key end

     0   :  { %v677_v3 = vmov 0.0   ;;  %vm66_vm0 = vcmask 261120   ;;  %s1006_s1 = inlined_call_operand.vmem [shape: f32[32,512], index: 1, kind: input, shape index: {}]   ;;  %s1007_s0 = inlined_call_operand.vmem [shape: f32[16,32], index: 0, kind: input, shape index: {}]   ;;  %s1008_s3 = inlined_call_operand.vmem [shape: f32[512,32], index: 3, kind: input, shape index: {}]   ;;  %s1009_s2 = inlined_call_operand.vmem [shape: f32[1,512], index: 2, kind: input, shape index: {}]   ;;  %s1010_s4 = inlined_call_operand.vmem [shape: f32[1,32], index: 4, kind: input, shape index: {}]   ;;  %s1011_s5 = inlined_call_operand.vmem [shape: f32[1,32], index: 5, kind: input, shape index: {}]   ;;  %s1012_s6 = inlined_call_operand.vmem [shape: f32[1,32], index: 6, kind: input, shape index: {}]   ;;  %s1013_s7 = inlined_call_operand.vmem [shape: f32[16,32], index: 7, kind: output, shape index: {}]  }
   0x1   :  { %v29_v0 = vld [vmem:[%s1006_s1 + $0x8] sm:$0xff]  ;;  %v31_v2 = vld [vmem:[%s1006_s1 + $0x18] sm:$0xff]  ;;  %137 = vmatprep.mubr.f32.mxu0 %v677_v3  ;;  %214 = vmatprep.mubr.f32.mxu1 %v677_v3  ;;  %v28_v6 = vld [vmem:[%s1006_s1] sm:$0xff] }
   0x2   :  { %v33_v1 = vld [vmem:[%s1006_s1 + $0x28] sm:$0xff]  ;;  %v35_v5 = vld [vmem:[%s1006_s1 + $0x38] sm:$0xff]  ;;  %v32_v7 = vld [vmem:[%s1006_s1 + $0x20] sm:$0xff] }
   0x3   :  { %v592_v4 = vpack.c.bf16 %v33_v1, %v29_v0  ;;  %v600_v8 = vpack.c.bf16 %v35_v5, %v31_v2  ;;  %v594_v9 = vpack.c.bf16 %v32_v7, %v28_v6  ;;  %v30_v10 = vld [vmem:[%s1006_s1 + $0x10] sm:$0xff]  ;;  %v37_v12 = vld [vmem:[%s1006_s1 + $0x48] sm:$0xff]  ;;  %v39_v15 = vld [vmem:[%s1006_s1 + $0x58] sm:$0xff] }
   0x4   :  { %v34_v11 = vld [vmem:[%s1006_s1 + $0x30] sm:$0xff]  ;;  %v41_v14 = vld [vmem:[%s1006_s1 + $0x68] sm:$0xff]  ;;  %v43_v16 = vld [vmem:[%s1006_s1 + $0x78] sm:$0xff] }
   0x5   :  { %593 = vmatprep.subr.bf16.mxu0 %v592_v4  ;;  %v602_v13 = vpack.c.bf16 %v34_v11, %v30_v10  ;;  %601 = vmatprep.subr.bf16.mxu1 %v600_v8  ;;  %v596_v17 = vpack.c.bf16 %v41_v14, %v37_v12  ;;  %v604_v18 = vpack.c.bf16 %v43_v16, %v39_v15  ;;  %v36_v19 = vld [vmem:[%s1006_s1 + $0x40] sm:$0xff]  ;;  %v38_v21 = vld [vmem:[%s1006_s1 + $0x50] sm:$0xff]  ;;  %v252_v27 = vld [vmem:[%s1008_s3 + $0x88] sm:$0xff] }
   0x6   :  { %595 = vmatpush1.bf16.msra.mxu0 %v594_v9  ;;  %v40_v20 = vld [vmem:[%s1006_s1 + $0x60] sm:$0xff]  ;;  %v42_v23 = vld [vmem:[%s1006_s1 + $0x70] sm:$0xff]  ;;  %v284_v30 = vld [vmem:[%s1008_s3 + $0x188] sm:$0xff] }
   0x7   :  { %603 = vmatpush1.bf16.msra.mxu1 %v602_v13  ;;  %v598_v22 = vpack.c.bf16 %v40_v20, %v36_v19  ;;  %597 = vmatprep.subr.bf16.mxu0 %v596_v17  ;;  %v606_v24 = vpack.c.bf16 %v42_v23, %v38_v21  ;;  %v771_v25 = vld [vmem:[%s1007_s0] sm:$0xff]  ;;  %v236_v32 = vld [vmem:[%s1008_s3 + $0x8] sm:$0xff]  ;;  %v253_v36 = vld [vmem:[%s1008_s3 + $0x90] sm:$0xff] }
   0x8   :  { %605 = vmatprep.subr.bf16.mxu1 %v604_v18  ;;  %v251_v26 = vld [vmem:[%s1008_s3 + $0x80] sm:$0xff]  ;;  %v268_v35 = vld [vmem:[%s1008_s3 + $0x108] sm:$0xff]  ;;  %v254_v38 = vld [vmem:[%s1008_s3 + $0x98] sm:$0xff] }
   0x9   :  { %v283_v28 = vld [vmem:[%s1008_s3 + $0x180] sm:$0xff]  ;;  %v608_v29 = vpack.c.bf16 %v252_v27, %v251_v26  ;;  %v285_v39 = vld [vmem:[%s1008_s3 + $0x190] sm:$0xff]  ;;  %v286_v40 = vld [vmem:[%s1008_s3 + $0x198] sm:$0xff]  ;;  %v612_v42 = vpack.c.bf16 %v254_v38, %v253_v36 }
   0xa   :  { %v235_v31 = vld [vmem:[%s1008_s3] sm:$0xff]  ;;  %599 = vmatpush1.bf16.msra.mxu0 %v598_v22  ;;  %v640_v33 = vpack.c.bf16 %v284_v30, %v283_v28  ;;  %v237_v43 = vld [vmem:[%s1008_s3 + $0x10] sm:$0xff]  ;;  %v238_v44 = vld [vmem:[%s1008_s3 + $0x18] sm:$0xff]  ;;  %v644_v46 = vpack.c.bf16 %v286_v40, %v285_v39 }
   0xb   :  { %v267_v34 = vld [vmem:[%s1008_s3 + $0x100] sm:$0xff]  ;;  %607 = vmatpush1.bf16.msra.mxu1 %v606_v24  ;;  %609 = vmatprep.subr.bf16.mxu0 %v608_v29  ;;  %v610_v37 = vpack.c.bf16 %v236_v32, %v235_v31  ;;  %v269_v45 = vld [vmem:[%s1008_s3 + $0x110] sm:$0xff]  ;;  %v270_v47 = vld [vmem:[%s1008_s3 + $0x118] sm:$0xff]  ;;  %v614_v53 = vpack.c.bf16 %v238_v44, %v237_v43 }
   0xc   :  { %641 = vmatprep.subr.bf16.mxu1 %v640_v33  ;;  %v642_v41 = vpack.c.bf16 %v268_v35, %v267_v34  ;;  %v255_v48 = vld [vmem:[%s1008_s3 + $0xa0] sm:$0xff]  ;;  %v256_v49 = vld [vmem:[%s1008_s3 + $0xa8] sm:$0xff]  ;;  %v646_v54 = vpack.c.bf16 %v270_v47, %v269_v45  ;;  %v257_v61 = vld [vmem:[%s1008_s3 + $0xb0] sm:$0xff] }
   0xd   :  { %509 = vmatmul.mubr.msk.f32.vlgmr.msra.gmra.mrb[0].mxu0 %vm66_vm0, %v771_v25  ;;  %v835_v50 = vld [vmem:[%s1007_s0 + $0x8] sm:$0xff]  ;;  %v287_v51 = vld [vmem:[%s1008_s3 + $0x1a0] sm:$0xff]  ;;  %v616_v55 = vpack.c.bf16 %v256_v49, %v255_v48  ;;  %v258_v62 = vld [vmem:[%s1008_s3 + $0xb8] sm:$0xff] }
   0xe   :  { %511 = vmatmul.mubr.msk.f32.vlgmr.msra.gmra.mrb[0].mxu1 %vm66_vm0, %v771_v25  ;;  %143 = vmatprep.mubr.f32.mxu0 %v677_v3  ;;  %v288_v52 = vld [vmem:[%s1008_s3 + $0x1a8] sm:$0xff]  ;;  %v239_v56 = vld [vmem:[%s1008_s3 + $0x20] sm:$0xff]  ;;  %v289_v63 = vld [vmem:[%s1008_s3 + $0x1b0] sm:$0xff] }
   0xf   :  { %220 = vmatprep.mubr.f32.mxu1 %v677_v3  ;;  %611 = vmatpush3.bf16.msra.mxu0 %v610_v37  ;;  %v240_v57 = vld [vmem:[%s1008_s3 + $0x28] sm:$0xff]  ;;  %v271_v58 = vld [vmem:[%s1008_s3 + $0x120] sm:$0xff]  ;;  %v648_v59 = vpack.c.bf16 %v288_v52, %v287_v51  ;;  %v290_v0 = vld [vmem:[%s1008_s3 + $0x1b8] sm:$0xff]  ;;  %v620_v3 = vpack.c.bf16 %v258_v62, %v257_v61  ;;  %v46_v61 = vlaneseq }
  0x10   :  { %643 = vmatpush3.bf16.msra.mxu1 %v642_v41  ;;  %613 = vmatprep.subr.bf16.mxu0 %v612_v42  ;;  %v272_v60 = vld [vmem:[%s1008_s3 + $0x128] sm:$0xff]  ;;  %v618_v1 = vpack.c.bf16 %v240_v57, %v239_v56  ;;  %v241_v4 = vld [vmem:[%s1008_s3 + $0x30] sm:$0xff]  ;;  %v242_v5 = vld [vmem:[%s1008_s3 + $0x38] sm:$0xff]  ;;  %v652_v7 = vpack.c.bf16 %v290_v0, %v289_v63 }
  0x11   :  { %510 = vmatmul.mubr.msk.f32.gmra.mrb[2].mxu0 %vm66_vm0, %v835_v50  ;;  %645 = vmatprep.subr.bf16.mxu1 %v644_v46  ;;  %v650_v2 = vpack.c.bf16 %v272_v60, %v271_v58  ;;  %v273_v6 = vld [vmem:[%s1008_s3 + $0x130] sm:$0xff]  ;;  %v274_v8 = vld [vmem:[%s1008_s3 + $0x138] sm:$0xff]  ;;  %v259_v9 = vld [vmem:[%s1008_s3 + $0xc0] sm:$0xff]  ;;  %v622_v13 = vpack.c.bf16 %v242_v5, %v241_v4  ;;  %v47_v62 = vshrl.u32 %v46_v61, 7 }
  0x12   :  { %512 = vmatmul.mubr.msk.f32.gmra.mrb[2].mxu1 %vm66_vm0, %v835_v50  ;;  %v260_v10 = vld [vmem:[%s1008_s3 + $0xc8] sm:$0xff]  ;;  %v291_v11 = vld [vmem:[%s1008_s3 + $0x1c0] sm:$0xff]  ;;  %v654_v14 = vpack.c.bf16 %v274_v8, %v273_v6  ;;  %v261_v21 = vld [vmem:[%s1008_s3 + $0xd0] sm:$0xff] }
  0x13   :  { %615 = vmatpush3.bf16.msra.mxu0 %v614_v53  ;;  %v292_v12 = vld [vmem:[%s1008_s3 + $0x1c8] sm:$0xff]  ;;  %v624_v15 = vpack.c.bf16 %v260_v10, %v259_v9  ;;  %v243_v16 = vld [vmem:[%s1008_s3 + $0x40] sm:$0xff]  ;;  %v262_v22 = vld [vmem:[%s1008_s3 + $0xd8] sm:$0xff]  ;;  %v48_v63 = vsub.s32 0, %v47_v62 }
  0x14   :  { %647 = vmatpush3.bf16.msra.mxu1 %v646_v54  ;;  %617 = vmatprep.subr.bf16.mxu0 %v616_v55  ;;  %v244_v17 = vld [vmem:[%s1008_s3 + $0x48] sm:$0xff]  ;;  %v275_v18 = vld [vmem:[%s1008_s3 + $0x140] sm:$0xff]  ;;  %v656_v19 = vpack.c.bf16 %v292_v12, %v291_v11  ;;  %v293_v23 = vld [vmem:[%s1008_s3 + $0x1d0] sm:$0xff]  ;;  %v628_v28 = vpack.c.bf16 %v262_v22, %v261_v21 }
  0x15   :  { %649 = vmatprep.subr.bf16.mxu1 %v648_v59  ;;  %v276_v20 = vld [vmem:[%s1008_s3 + $0x148] sm:$0xff]  ;;  %v294_v24 = vld [vmem:[%s1008_s3 + $0x1d8] sm:$0xff]  ;;  %v626_v26 = vpack.c.bf16 %v244_v17, %v243_v16  ;;  %v245_v29 = vld [vmem:[%s1008_s3 + $0x50] sm:$0xff] }
  0x16   :  { %v658_v27 = vpack.c.bf16 %v276_v20, %v275_v18  ;;  %v246_v30 = vld [vmem:[%s1008_s3 + $0x58] sm:$0xff]  ;;  %v277_v31 = vld [vmem:[%s1008_s3 + $0x150] sm:$0xff]  ;;  %v660_v32 = vpack.c.bf16 %v294_v24, %v293_v23  ;;  %v263_v34 = vld [vmem:[%s1008_s3 + $0xe0] sm:$0xff] }
  0x17   :  { %619 = vmatpush3.bf16.msra.mxu0 %v618_v1  ;;  %v278_v33 = vld [vmem:[%s1008_s3 + $0x158] sm:$0xff]  ;;  %v264_v35 = vld [vmem:[%s1008_s3 + $0xe8] sm:$0xff]  ;;  %v295_v36 = vld [vmem:[%s1008_s3 + $0x1e0] sm:$0xff]  ;;  %v630_v38 = vpack.c.bf16 %v246_v30, %v245_v29  ;;  %v56_v1 = vsub.s32 2, %v47_v62 }
  0x18   :  { %651 = vmatpush3.bf16.msra.mxu1 %v650_v2  ;;  %621 = vmatprep.subr.bf16.mxu0 %v620_v3  ;;  %v296_v37 = vld [vmem:[%s1008_s3 + $0x1e8] sm:$0xff]  ;;  %v662_v39 = vpack.c.bf16 %v278_v33, %v277_v31  ;;  %v632_v40 = vpack.c.bf16 %v264_v35, %v263_v34  ;;  %v247_v42 = vld [vmem:[%s1008_s3 + $0x60] sm:$0xff]  ;;  %v265_v48 = vld [vmem:[%s1008_s3 + $0xf0] sm:$0xff]  ;;  %v52_v2 = vsub.s32 1, %v47_v62  ;;  %v60_v3 = vsub.s32 3, %v47_v62 }
  0x19   :  { %653 = vmatprep.subr.bf16.mxu1 %v652_v7  ;;  %v664_v41 = vpack.c.bf16 %v296_v37, %v295_v36  ;;  %v248_v43 = vld [vmem:[%s1008_s3 + $0x68] sm:$0xff]  ;;  %v279_v44 = vld [vmem:[%s1008_s3 + $0x160] sm:$0xff]  ;;  %v266_v49 = vld [vmem:[%s1008_s3 + $0xf8] sm:$0xff] }
  0x1a   :  { %v634_v45 = vpack.c.bf16 %v248_v43, %v247_v42  ;;  %v280_v46 = vld [vmem:[%s1008_s3 + $0x168] sm:$0xff]  ;;  %v297_v51 = vld [vmem:[%s1008_s3 + $0x1f0] sm:$0xff]  ;;  %v636_v52 = vpack.c.bf16 %v266_v49, %v265_v48  ;;  %v298_v53 = vld [vmem:[%s1008_s3 + $0x1f8] sm:$0xff] }
  0x1b   :  { %623 = vmatpush3.bf16.msra.mxu0 %v622_v13  ;;  %v666_v47 = vpack.c.bf16 %v280_v46, %v279_v44  ;;  %v249_v54 = vld [vmem:[%s1008_s3 + $0x70] sm:$0xff]  ;;  %v250_v55 = vld [vmem:[%s1008_s3 + $0x78] sm:$0xff]  ;;  %v668_v56 = vpack.c.bf16 %v298_v53, %v297_v51  ;;  %v44_v0 = vld [vmem:[%s1009_s2] sm:$0xf] }
  0x1c   :  { %655 = vmatpush3.bf16.msra.mxu1 %v654_v14  ;;  %625 = vmatprep.subr.bf16.mxu0 %v624_v15  ;;  %v638_v57 = vpack.c.bf16 %v250_v55, %v249_v54  ;;  %v281_v58 = vld [vmem:[%s1008_s3 + $0x170] sm:$0xff]  ;;  %v282_v59 = vld [vmem:[%s1008_s3 + $0x178] sm:$0xff]  ;;  %v49_v4 = vrot.slane %v44_v0, %v48_v63  ;;  %v57_v5 = vrot.slane %v44_v0, %v56_v1  ;;  %v513_v35 = vld [vmem:[%s1010_s4] ss:$0 sm:$0xff] }
  0x1d   :  { %657 = vmatprep.subr.bf16.mxu1 %v656_v19  ;;  %v670_v60 = vpack.c.bf16 %v282_v59, %v281_v58  ;;  %v53_v6 = vrot.slane %v44_v0, %v52_v2  ;;  %v61_v7 = vrot.slane %v44_v0, %v60_v3 }
  0x1f   :  { %627 = vmatpush3.bf16.msra.mxu0 %v626_v26 }
  0x20   :  { %659 = vmatpush3.bf16.msra.mxu1 %v658_v27  ;;  %629 = vmatprep.subr.bf16.mxu0 %v628_v28 }
  0x21   :  { %661 = vmatprep.subr.bf16.mxu1 %v660_v32 }
  0x23   :  { %631 = vmatpush3.bf16.msra.mxu0 %v630_v38 }
  0x24   :  { %663 = vmatpush3.bf16.msra.mxu1 %v662_v39  ;;  %633 = vmatprep.subr.bf16.mxu0 %v632_v40 }
  0x25   :  { %665 = vmatprep.subr.bf16.mxu1 %v664_v41 }
  0x27   :  { %635 = vmatpush3.bf16.msra.mxu0 %v634_v45 }
  0x28   :  { %667 = vmatpush3.bf16.msra.mxu1 %v666_v47  ;;  %637 = vmatprep.subr.bf16.mxu0 %v636_v52 }
  0x29   :  { %669 = vmatprep.subr.bf16.mxu1 %v668_v56 }
  0x2b   :  { %639 = vmatpush3.bf16.msra.mxu0 %v638_v57 }
  0x2c   :  { %671 = vmatpush3.bf16.msra.mxu1 %v670_v60 }
  0xe0   :  { %v139_v8 = vpop.f32.mrb[0].mxu0 }
  0xe1   :  { %v140_v9 = vadd.f32 %v139_v8, %v49_v4  ;;  %v216_v10 = vpop.f32.mrb[0].mxu1  ;;  %v141_v11 = vpop.f32.mrb[1].mxu0  ;;  %v515_v8 = vld [vmem:[%s1012_s6] ss:$0 sm:$0xff] }
  0xe2   :  { %v217_v12 = vadd.f32 %v216_v10, %v57_v5  ;;  %v142_v13 = vadd.f32 %v141_v11, %v53_v6  ;;  %v218_v14 = vpop.f32.mrb[1].mxu1 }
  0xe3   :  { %v219_v15 = vadd.f32 %v218_v14, %v61_v7  ;;  %v227_v19 = vmax.f32 %v140_v9, 0.0 }
  0xe4   :  { %v229_v16 = vmax.f32 %v217_v12, 0.0  ;;  %v228_v17 = vmax.f32 %v142_v13, 0.0  ;;  %v145_v18 = vpop.f32.mrb[2].mxu0 }
  0xe5   :  { %v230_v20 = vmax.f32 %v219_v15, 0.0  ;;  %v146_v21 = vadd.f32 %v145_v18, %v49_v4  ;;  %v222_v22 = vpop.f32.mrb[2].mxu1  ;;  %v147_v23 = vpop.f32.mrb[3].mxu0 }
  0xe6   :  { %v223_v24 = vadd.f32 %v222_v22, %v57_v5  ;;  %v148_v26 = vadd.f32 %v147_v23, %v53_v6  ;;  %v224_v27 = vpop.f32.mrb[3].mxu1  ;;  %370 = vmatprep.mubr.f32.mxu0 %v228_v17  ;;  %v514_v6 = vld [vmem:[%s1011_s5] ss:$0 sm:$0xff] }
  0xe7   :  { %v225_v28 = vadd.f32 %v224_v27, %v61_v7  ;;  %445 = vmatprep.mubr.f32.mxu1 %v230_v20  ;;  %371 = vmatmul.mubr.f32.vlgmr.msra.gmra.mrb[4].mxu0 %v227_v19  ;;  %v231_v31 = vmax.f32 %v146_v21, 0.0 }
  0xe8   :  { %v233_v29 = vmax.f32 %v223_v24, 0.0  ;;  %v232_v30 = vmax.f32 %v148_v26, 0.0  ;;  %446 = vmatmul.mubr.f32.vlgmr.msra.gmra.mrb[4].mxu1 %v229_v16 }
  0xe9   :  { %v234_v32 = vmax.f32 %v225_v28, 0.0 }
  0xea   :  { %375 = vmatprep.mubr.f32.mxu0 %v232_v30 }
  0xeb   :  { %450 = vmatprep.mubr.f32.mxu1 %v234_v32  ;;  %376 = vmatmul.mubr.f32.gmra.mrb[6].mxu0 %v231_v31 }
  0xec   :  { %451 = vmatmul.mubr.f32.gmra.mrb[6].mxu1 %v233_v29 }
 0x1ba   :  { %v548_v33 = vpop.f32.mrb[4].mxu0 }
 0x1bb   :  { %v586_v34 = vpop.f32.mrb[4].mxu1  ;;  %v549_v36 = vpop.f32.mrb[5].mxu0 }
 0x1bc   :  { %v550_v37 = vadd.f32 %v549_v36, %v548_v33  ;;  %v587_v38 = vpop.f32.mrb[5].mxu1 }
 0x1bd   :  { %v588_v39 = vadd.f32 %v587_v38, %v586_v34 }
 0x1be   :  { %v373_v40 = vadd.f32 %v550_v37, %v513_v35  ;;  %v551_v41 = vpop.f32.mrb[6].mxu0 }
 0x1bf   :  { %v589_v42 = vpop.f32.mrb[6].mxu1  ;;  %v552_v43 = vpop.f32.mrb[7].mxu0 }
 0x1c0   :  { %v448_v44 = vadd.f32 %v588_v39, %v373_v40  ;;  %v553_v45 = vadd.f32 %v552_v43, %v551_v41  ;;  %v590_v46 = vpop.f32.mrb[7].mxu1 }
 0x1c1   :  { %v591_v47 = vadd.f32 %v590_v46, %v589_v42 }
 0x1c2   :  { %v378_v48 = vadd.f32 %v553_v45, %v513_v35  ;;  %v456_v49 = vadd.f32 %v448_v44, %v771_v25 }
 0x1c4   :  { %v453_v51 = vadd.f32 %v591_v47, %v378_v48  ;;  %v460_v52 = vsel %vm66_vm0, %v456_v49, 0.0 }
 0x1c5   :  { %461 = vadd.xlane.f32.xlu0 %v460_v52 }
 0x1c6   :  { %v457_v53 = vadd.f32 %v453_v51, %v835_v50 }
 0x1c8   :  { %v463_v54 = vsel %vm66_vm0, %v457_v53, 0.0 }
 0x1c9   :  { %464 = vadd.xlane.f32.xlu0 %v463_v54 }
 0x252   :  { %v462_v55 = vpop.xlane.xlu0 %461 }
 0x253   :  { %v467_v56 = vmul.f32 0.03125, %v462_v55 }
 0x255   :  { %v469_v57 = vsub.f32 %v456_v49, %v467_v56 }
 0x256   :  { %v465_v58 = vpop.xlane.xlu0 %464 }
 0x257   :  { %v468_v59 = vmul.f32 0.03125, %v465_v58  ;;  %v471_v60 = vmul.f32 %v469_v57, %v469_v57 }
 0x259   :  { %v470_v61 = vsub.f32 %v457_v53, %v468_v59  ;;  %v473_v62 = vsel %vm66_vm0, %v471_v60, 0.0 }
 0x25a   :  { %474 = vadd.xlane.f32.xlu1 %v473_v62 }
 0x25b   :  { %v472_v25 = vmul.f32 %v470_v61, %v470_v61 }
 0x25d   :  { %v476_v63 = vsel %vm66_vm0, %v472_v25, 0.0 }
 0x25e   :  { %477 = vadd.xlane.f32.xlu1 %v476_v63 }
 0x2e7   :  { %v475_v0 = vpop.xlane.xlu1 %474 }
 0x2e8   :  { %v479_v1 = vmul.f32 0.03125, %v475_v0 }
 0x2ea   :  { %v481_v50 = vadd.f32 1e-05, %v479_v1 }
 0x2eb   :  { %v478_v2 = vpop.xlane.xlu1 %477 }
 0x2ec   :  { %673 = vrsqrt.f32 %v481_v50  ;;  %v480_v3 = vmul.f32 0.03125, %v478_v2 }
 0x2ee   :  { %v482_v4 = vadd.f32 1e-05, %v480_v3 }
 0x2f0   :  { %675 = vrsqrt.f32 %v482_v4 }
 0x2f6   :  { %v674_v5 = vpop.eup %673 }
 0x2f7   :  { %v485_v7 = vmul.f32 %v674_v5, %v469_v57 }
 0x2f9   :  { %v493_v9 = vmul.f32 %v514_v6, %v485_v7 }
 0x2fa   :  { %v676_v10 = vpop.eup %675 }
 0x2fb   :  { %v501_v11 = vadd.f32 %v515_v8, %v493_v9  ;;  %v486_v12 = vmul.f32 %v676_v10, %v470_v61 }
 0x2fd   :  { %503 = vst.msk [vmem:[%s1013_s7] sm:$0xff] %vm66_vm0, %v501_v11  ;;  %v494_v13 = vmul.f32 %v514_v6, %v486_v12 }
 0x2ff   :  { %v502_v14 = vadd.f32 %v515_v8, %v494_v13 }
 0x301   :  { %504 = vst.msk [vmem:[%s1013_s7 + $0x8] sm:$0xff] %vm66_vm0, %v502_v14 }

// kernel: cmcad_forward.46
= control target key start
LH: loop header
LB: loop body
LE: loop exit
PB: predicated region body
PF: predicated region fallthrough
CT: control target
= control target key end

     0   :  { %v133_v0 = vmov 0.0|0.0   ;;  %vm134_vm0 = vmmov 0   ;;  %v135_v4 = vmov 0.0   ;;  %vm26_vm1 = vcmask 261120   ;;  %s177_s1 = inlined_call_operand.vmem [shape: f32[32,64], index: 1, kind: input, shape index: {}]   ;;  %s178_s0 = inlined_call_operand.vmem [shape: f32[2,32], index: 0, kind: input, shape index: {}]   ;;  %s179_s2 = inlined_call_operand.vmem [shape: f32[1,64], index: 2, kind: input, shape index: {}]   ;;  %s180_s3 = inlined_call_operand.vmem [shape: f32[2,64], index: 3, kind: output, shape index: {}]  }
   0x1   :  { %124 = vmatprep.subr.bf16.mxu0 %v133_v0  ;;  %v15_v1 = vld [vmem:[%s177_s1] sm:$0xff]  ;;  %v16_v2 = vld [vmem:[%s177_s1 + $0x8] sm:$0xff]  ;;  %v17_v3 = vld [vmem:[%s177_s1 + $0x10] sm:$0xff]  ;;  %121 = vmatprep.mubr.msk.f32.mxu0 %vm134_vm0, %v135_v4  ;;  %vm100_vm2 = vcmask 517120  }
   0x2   :  { %v125_v5 = vpack.c.bf16 %v16_v2, %v15_v1  ;;  %v18_v6 = vld [vmem:[%s177_s1 + $0x18] sm:$0xff]  ;;  %v14_v8 = vld [vmem:[%s178_s0] sm:$0x3] }
   0x3   :  { %v128_v7 = vpack.c.bf16 %v18_v6, %v17_v3  ;;  %v106_v9 = vld [vmem:[%s179_s2] ss:$0 sm:$0xff] }
   0x4   :  { %126 = vmatpush3.bf16.msra.mxu0 %v125_v5 }
   0x5   :  { %127 = vmatprep.subr.bf16.mxu0 %v133_v0 }
   0x8   :  { %129 = vmatpush3.bf16.msra.mxu0 %v128_v7 }
   0xb   :  { %122 = vmatmul.mubr.msk.f32.vlgmr.msra.gmra.mrb[0].mxu0 %vm26_vm1, %v14_v8 }
  0xde   :  { %v96_v10 = vpop.f32.mrb[0].mxu0 }
  0xdf   :  { %v97_v11 = vadd.f32 %v106_v9, %v96_v10  ;;  %v123_v12 = vpop.f32.mrb[1].mxu0 }
  0xe1   :  { %101 = vst.msk [vmem:[%s180_s3] sm:$0x3] %vm100_vm2, %v97_v11 }

// kernel: cmcad_forward.47
= control target key start
LH: loop header
LB: loop body
LE: loop exit
PB: predicated region body
PF: predicated region fallthrough
CT: control target
= control target key end

     0   :  { %vm24_vm0 = vcmask 261120   ;;  %vm28_vm1 = vcmask 259072   ;;  %vm163_vm2 = vcmask 783360   ;;  %vm161_vm3 = vcmask 785408   ;;  %s270_s0 = inlined_call_operand.vmem [shape: f32[14,32], index: 0, kind: input, shape index: {}]   ;;  %s271_s1 = inlined_call_operand.vmem [shape: f32[32,96], index: 1, kind: input, shape index: {}]   ;;  %s272_s3 = inlined_call_operand.vmem [shape: f32[1,32], index: 3, kind: input, shape index: {}]   ;;  %s273_s4 = inlined_call_operand.vmem [shape: f32[1,32], index: 4, kind: input, shape index: {}]   ;;  %s274_s2 = inlined_call_operand.vmem [shape: f32[1,96], index: 2, kind: input, shape index: {}]   ;;  %s275_s5 = inlined_call_operand.vmem [shape: f32[14,96], index: 5, kind: output, shape index: {}]  }
   0x1   :  { %v20_v0 = vld [vmem:[%s270_s0] sm:$0xff]  ;;  %v21_v1 = vld [vmem:[%s270_s0 + $0x8] sm:$0x3f]  ;;  %v71_v16 = vld [vmem:[%s271_s1 + $0x10] sm:$0xff] }
   0x2   :  { %v25_v2 = vsel %vm24_vm0, %v20_v0, 0.0  ;;  %v29_v3 = vsel %vm28_vm1, %v21_v1, 0.0  ;;  %v69_v14 = vld [vmem:[%s271_s1] sm:$0xff]  ;;  %v70_v15 = vld [vmem:[%s271_s1 + $0x8] sm:$0xff]  ;;  %v72_v18 = vld [vmem:[%s271_s1 + $0x18] sm:$0xff] }
   0x3   :  { %26 = vadd.xlane.f32.xlu0 %v25_v2  ;;  %v191_v17 = vpack.c.bf16 %v70_v15, %v69_v14  ;;  %v195_v19 = vpack.c.bf16 %v72_v18, %v71_v16  ;;  %v169_v27 = vld [vmem:[%s272_s3] ss:$0 sm:$0xff] }
   0x4   :  { %v170_v29 = vld [vmem:[%s273_s4] ss:$0 sm:$0xff] }
   0x5   :  { %192 = vmatprep.subr.bf16.mxu0 %v191_v17  ;;  %v171_v36 = vld [vmem:[%s274_s2] ss:$0 sm:$0xff] }
   0x6   :  { %194 = vmatpush3.bf16.msra.mxu0 %v191_v17 }
   0x7   :  { %30 = vadd.xlane.f32.xlu0 %v29_v3  ;;  %196 = vmatprep.subr.bf16.mxu0 %v195_v19 }
   0xa   :  { %198 = vmatpush3.bf16.msra.mxu0 %v195_v19 }
  0x90   :  { %v27_v4 = vpop.xlane.xlu0 %26 }
  0x91   :  { %v33_v5 = vmul.f32 0.03125, %v27_v4 }
  0x93   :  { %v35_v6 = vsub.f32 %v20_v0, %v33_v5 }
  0x94   :  { %v31_v7 = vpop.xlane.xlu0 %30 }
  0x95   :  { %v34_v8 = vmul.f32 0.03125, %v31_v7  ;;  %v37_v9 = vmul.f32 %v35_v6, %v35_v6 }
  0x97   :  { %v36_v10 = vsub.f32 %v21_v1, %v34_v8  ;;  %v39_v11 = vsel %vm24_vm0, %v37_v9, 0.0 }
  0x98   :  { %40 = vadd.xlane.f32.xlu1 %v39_v11 }
  0x99   :  { %v38_v12 = vmul.f32 %v36_v10, %v36_v10 }
  0x9b   :  { %v42_v13 = vsel %vm28_vm1, %v38_v12, 0.0 }
  0x9c   :  { %43 = vadd.xlane.f32.xlu1 %v42_v13 }
 0x125   :  { %v41_v20 = vpop.xlane.xlu1 %40 }
 0x126   :  { %v45_v21 = vmul.f32 0.03125, %v41_v20 }
 0x128   :  { %v47_v22 = vadd.f32 1e-05, %v45_v21 }
 0x129   :  { %v44_v23 = vpop.xlane.xlu1 %43 }
 0x12a   :  { %199 = vrsqrt.f32 %v47_v22  ;;  %v46_v24 = vmul.f32 0.03125, %v44_v23 }
 0x12c   :  { %v48_v25 = vadd.f32 1e-05, %v46_v24 }
 0x12e   :  { %201 = vrsqrt.f32 %v48_v25 }
 0x134   :  { %v200_v26 = vpop.eup %199 }
 0x135   :  { %v51_v28 = vmul.f32 %v200_v26, %v35_v6 }
 0x137   :  { %v59_v30 = vmul.f32 %v169_v27, %v51_v28 }
 0x138   :  { %v202_v31 = vpop.eup %201 }
 0x139   :  { %v52_v32 = vmul.f32 %v202_v31, %v36_v10  ;;  %v67_v33 = vadd.f32 %v170_v29, %v59_v30 }
 0x13b   :  { %v60_v34 = vmul.f32 %v169_v27, %v52_v32  ;;  %188 = vmatprep.mubr.msk.f32.mxu0 %vm24_vm0, %v67_v33 }
 0x13d   :  { %v68_v35 = vadd.f32 %v170_v29, %v60_v34 }
 0x13f   :  { %189 = vmatmul.mubr.msk.f32.vlgmr.msra.gmra.mrb[0].mxu0 %vm24_vm0, %v68_v35 }
 0x212   :  { %v190_v37 = vpop.f32.mrb[0].mxu0 }
 0x213   :  { %v158_v38 = vadd.f32 %v190_v37, %v171_v36  ;;  %v152_v39 = vpop.f32.mrb[1].mxu0 }
 0x214   :  { %v153_v40 = vadd.f32 %v171_v36, %v152_v39 }
 0x215   :  { %164 = vst.msk [vmem:[%s275_s5 + $0x8] sm:$0x3f] %vm163_vm2, %v158_v38 }
 0x216   :  { %162 = vst.msk [vmem:[%s275_s5] sm:$0xff] %vm161_vm3, %v153_v40 }

// kernel: cmcad_forward.49
= control target key start
LH: loop header
LB: loop body
LE: loop exit
PB: predicated region body
PF: predicated region fallthrough
CT: control target
= control target key end

     0   :  { %vm30_vm0 = vcmask 261120   ;;  %vm117_vm1 = vcmask 259072   ;;  %s212_s1 = inlined_call_operand.vmem [shape: f32[32,32], index: 1, kind: input, shape index: {}]   ;;  %s213_s0 = inlined_call_operand.vmem [shape: f32[14,32], index: 0, kind: input, shape index: {}]   ;;  %s214_s2 = inlined_call_operand.vmem [shape: f32[1,32], index: 2, kind: input, shape index: {}]   ;;  %s215_s3 = inlined_call_operand.vmem [shape: f32[14,32], index: 3, kind: input, shape index: {}]   ;;  %s216_s4 = inlined_call_operand.vmem [shape: f32[14,32], index: 4, kind: output, shape index: {}]  }
   0x1   :  { %v19_v0 = vld [vmem:[%s212_s1] sm:$0xff]  ;;  %v20_v1 = vld [vmem:[%s212_s1 + $0x8] sm:$0xff]  ;;  %v21_v2 = vld [vmem:[%s212_s1 + $0x10] sm:$0xff] }
   0x2   :  { %v143_v3 = vpack.c.bf16 %v20_v1, %v19_v0  ;;  %v22_v4 = vld [vmem:[%s212_s1 + $0x18] sm:$0xff]  ;;  %v17_v5 = vld [vmem:[%s213_s0] sm:$0xff]  ;;  %v18_v7 = vld [vmem:[%s213_s0 + $0x8] sm:$0x3f] }
   0x3   :  { %v147_v6 = vpack.c.bf16 %v22_v4, %v21_v2  ;;  %140 = vmatprep.mubr.msk.f32.mxu0 %vm30_vm0, %v17_v5  ;;  %v123_v8 = vld [vmem:[%s214_s2] ss:$0 sm:$0xff]  ;;  %v113_v10 = vld [vmem:[%s215_s3 + $0x8] sm:$0x3f] }
   0x4   :  { %144 = vmatprep.subr.bf16.mxu0 %v143_v3  ;;  %v112_v13 = vld [vmem:[%s215_s3] sm:$0xff] }
   0x5   :  { %146 = vmatpush3.bf16.msra.mxu0 %v143_v3 }
   0x6   :  { %148 = vmatprep.subr.bf16.mxu0 %v147_v6 }
   0x9   :  { %150 = vmatpush3.bf16.msra.mxu0 %v147_v6 }
   0xc   :  { %141 = vmatmul.mubr.msk.f32.vlgmr.msra.gmra.mrb[0].mxu0 %vm30_vm0, %v18_v7 }
  0xdf   :  { %v142_v9 = vpop.f32.mrb[0].mxu0 }
  0xe0   :  { %v109_v11 = vadd.f32 %v142_v9, %v123_v8  ;;  %v103_v12 = vpop.f32.mrb[1].mxu0 }
  0xe1   :  { %v104_v14 = vadd.f32 %v123_v8, %v103_v12 }
  0xe2   :  { %v115_v15 = vadd.f32 %v113_v10, %v109_v11 }
  0xe3   :  { %v114_v16 = vadd.f32 %v112_v13, %v104_v14 }
  0xe4   :  { %118 = vst.msk [vmem:[%s216_s4 + $0x8] sm:$0x3f] %vm117_vm1, %v115_v15 }
  0xe5   :  { %116 = vst.msk [vmem:[%s216_s4] sm:$0xff] %vm30_vm0, %v114_v16 }

// kernel: cmcad_forward.48
= control target key start
LH: loop header
LB: loop body
LE: loop exit
PB: predicated region body
PF: predicated region fallthrough
CT: control target
= control target key end

     0   :  { %s1011_s6 = smov 0   ;;  %s1105_s0 = inlined_call_operand.vmem [shape: f32[2,7,96], index: 0, kind: input, shape index: {}]   ;;  %s1106_s1 = inlined_call_operand.vmem [shape: f32[2,7,32], index: 1, kind: output, shape index: {}]  }
   0x1 LB: > { %s856_s7 = sadd.s32 4294967295, %s983_s6   ;;  %p860_p0 = scmp.ge.s32.totalorder %s983_s6, 1  ;;  %s983_s6 = sphi %s1011_s6, %s11_s6  }
   0x2   : > { %p86_p1 = scmp.lt.s32.totalorder %s983_s6, 3 }
   0x4   : > { %p87_p2 = pnand %p860_p0, %p86_p1 }
   0x5   : > { %p104_p3 = scmp.lt.s32.totalorder (!%p87_p2), %s856_s7, 1  ;;  %v985_v0 = vmov (!%p87_p2), 0.0   ;;  %vm986_vm0 = vmmov (!%p87_p2), 0   ;;  %s987_s12 = smov (!%p87_p2), 96   ;;  %vm116_vm1 = vcmask (!%p87_p2), 64512   ;;  %vm192_vm2 = vcmask (!%p87_p2), 55296  }
   0x6   : > { %90 = sbr.rel (%p87_p2) target bundleno = 1222 (0x4c6), region = 24  ;;  %897 = vmatprep.subr.mxu0 (!%p87_p2), %v985_v0  ;;  %899 = vmatprep.mubr.msk.f32.mxu0 (!%p87_p2), %vm986_vm0, %v985_v0  ;;  %s988_s13 = smov (!%p87_p2), 64   ;;  %vm208_vm3 = vcmask (!%p87_p2), 1046528   ;;  %vm204_vm4 = vcmask (!%p87_p2), 56320   ;;  %vm797_vm5 = vcmask (!%p87_p2), 130048   ;;  %vm799_vm6 = vcmask (!%p87_p2), 195584  }
   0x7   : > { %902 = vmatprep.subr.mxu1 (!%p87_p2), %v985_v0  ;;  %904 = vmatprep.mubr.msk.f32.mxu1 (!%p87_p2), %vm986_vm0, %v985_v0  ;;  %s989_s14 = smov (!%p87_p2), 88   ;;  %s990_s15 = smov (!%p87_p2), 120   ;;  %vm801_vm7 = vcmask (!%p87_p2), 260096  }
   0x8   : > { %s991_s16 = smov (!%p87_p2), 80   ;;  %s992_s17 = smov (!%p87_p2), 112  }
   0x9   : > { %s993_s18 = smov (!%p87_p2), 72   ;;  %s994_s19 = smov (!%p87_p2), 104  }
   0xa   : > { %s995_s20 = smov (!%p87_p2), 56   ;;  %s996_s21 = smov (!%p87_p2), 48  }
   0xb   : > { %s997_s22 = smov (!%p87_p2), 40   ;;  %s998_s23 = smov (!%p87_p2), 8  }
   0xc   : > { %s999_s24 = smov (!%p87_p2), 16   ;;  %s1000_s25 = smov (!%p87_p2), 24  }
   0xd   : > { %s1108_s7 = smov (!%p104_p3, %s856_s7), 1 }
   0xe   : > { %s861_s8 = sshll.u32 %s1108_s7, 3 }
   0xf   : > { %s107_s11 = scalar_lea.vmem %s1105_s0, %s861_s8  ;;  %s111_s28 = scalar_lea.vmem %s1106_s1, %s861_s8 }
  0x10   : > { %v1033_v1 = vld [vmem:[%s107_s11] sm:$0x7f] }
  0x11   : > { %114 = vrot.lane.b32.xlu0 %v1033_v1, %s987_s12  ;;  %202 = vrot.lane.b32.xlu1 %v1033_v1, %s988_s13 }
  0x15   : > { %285 = vrot.lane.b32.xlu1 %v1033_v1, %s989_s14 }
  0x19   : > { %283 = vrot.lane.b32.xlu1 %v1033_v1, %s990_s15 }
  0x1d   : > { %452 = vrot.lane.b32.xlu1 %v1033_v1, %s991_s16 }
  0x21   : > { %450 = vrot.lane.b32.xlu1 %v1033_v1, %s992_s17 }
  0x25   : > { %619 = vrot.lane.b32.xlu1 %v1033_v1, %s993_s18 }
  0x29   : > { %617 = vrot.lane.b32.xlu1 %v1033_v1, %s994_s19 }
  0x83   : > { %v115_v2 = vpop.permute.xlu0 %114  ;;  %v203_v7 = vpop.permute.xlu1 %202 }
  0x84   : > { %898 = vmatpush3.xpose.msk.msra.mxu0 %vm116_vm1, %v115_v2  ;;  %903 = vmatpush3.msk.msra.mxu1 %vm208_vm3, %v203_v7 }
  0x85   : > { %912 = vmatprep.subr.mxu0 %v985_v0  ;;  %907 = vmatprep.subr.mxu1 %v985_v0 }
  0x87   : > { %900 = vmatmul.mubr.msk.f32.vlgmr.msra.gmra.mrb[0].mxu0 %vm116_vm1, %v1033_v1  ;;  %v286_v8 = vpop.permute.xlu1 %285 }
  0x88   : > { %914 = vmatprep.mubr.msk.f32.mxu0 %vm986_vm0, %v985_v0 }
  0x8b   : > { %v284_v11 = vpop.permute.xlu1 %283 }
  0x8f   : > { %v453_v13 = vpop.permute.xlu1 %452 }
  0x93   : > { %v451_v14 = vpop.permute.xlu1 %450 }
  0x97   : > { %v620_v16 = vpop.permute.xlu1 %619 }
  0x9b   : > { %v618_v17 = vpop.permute.xlu1 %617 }
 0x15a   : > { %v187_v3 = vpop.f32.mrb[0].mxu0 }
 0x15b   : > { %v191_v4 = vmul.f32 0.35355338, %v187_v3  ;;  %v901_v5 = vpop.f32.mrb[1].mxu0 }
 0x15d   : > { %v193_v6 = vsel %vm192_vm2, %v191_v4, -inf }
 0x15e   : > { %194 = vmax.xlane.f32.xlu0 %v193_v6 }
 0x174   : > { %371 = vrot.lane.b32.xlu0 %v1033_v1, %s995_s20 }
 0x1eb   : > { %v195_v9 = vpop.xlane.xlu0 %194 }
 0x1ec   : > { %v196_v10 = vsub.f32 %v191_v4, %v195_v9 }
 0x1ee   : > { %v197_v12 = vmul.f32 1.442695, %v196_v10 }
 0x1ef   : > { %v372_v18 = vpop.permute.xlu0 %371 }
 0x1f0   : > { %961 = vpow2.f32 %v197_v12  ;;  %913 = vmatpush3.msk.msra.mxu0 %vm208_vm3, %v372_v18 }
 0x1f1   : > { %922 = vmatprep.subr.mxu0 %v985_v0 }
 0x1fa   : > { %v1053_v15 = vpop.eup %961 }
 0x1fb   : > { %905 = vmatmul.mubr.msk.f32.vlgmr.msra.gmra.mrb[0].mxu1 %vm204_vm4, %v1053_v15  ;;  %v199_v50 = vsel %vm192_vm2, %v1053_v15, 0.0 }
 0x1fc   : > { %908 = vmatpush3.xpose.msk.msra.mxu1 %vm116_vm1, %v286_v8  ;;  %909 = vmatprep.mubr.msk.f32.mxu1 %vm986_vm0, %v985_v0 }
 0x1fd   : > { %917 = vmatprep.subr.mxu1 %v985_v0 }
 0x1ff   : > { %910 = vmatmul.mubr.msk.f32.vlgmr.msra.gmra.mrb[2].mxu1 %vm116_vm1, %v284_v11 }
 0x200   : > { %918 = vmatpush3.xpose.msk.msra.mxu1 %vm116_vm1, %v453_v13  ;;  %919 = vmatprep.mubr.msk.f32.mxu1 %vm986_vm0, %v985_v0 }
 0x201   : > { %927 = vmatprep.subr.mxu1 %v985_v0 }
 0x203   : > { %920 = vmatmul.mubr.msk.f32.vlgmr.msra.gmra.mrb[4].mxu1 %vm116_vm1, %v451_v14 }
 0x204   : > { %928 = vmatpush3.xpose.msk.msra.mxu1 %vm116_vm1, %v620_v16  ;;  %929 = vmatprep.mubr.msk.f32.mxu1 %vm986_vm0, %v985_v0 }
 0x207   : > { %930 = vmatmul.mubr.msk.f32.vlgmr.msra.gmra.mrb[6].mxu1 %vm116_vm1, %v618_v17 }
 0x2ce   : > { %v1073_v19 = vpop.f32.mrb[0].mxu1 }
 0x2cf   : > { %v906_v20 = vpop.f32.mrb[1].mxu1 }
 0x2d2   : > { %v357_v21 = vpop.f32.mrb[2].mxu1 }
 0x2d3   : > { %v361_v22 = vmul.f32 0.35355338, %v357_v21  ;;  %v911_v23 = vpop.f32.mrb[3].mxu1 }
 0x2d5   : > { %v362_v24 = vsel %vm192_vm2, %v361_v22, -inf }
 0x2d6   : > { %363 = vmax.xlane.f32.xlu1 %v362_v24  ;;  %v524_v25 = vpop.f32.mrb[4].mxu1 }
 0x2d7   : > { %v528_v26 = vmul.f32 0.35355338, %v524_v25  ;;  %v921_v27 = vpop.f32.mrb[5].mxu1 }
 0x2d9   : > { %v529_v28 = vsel %vm192_vm2, %v528_v26, -inf }
 0x2da   : > { %530 = vmax.xlane.f32.xlu0 %v529_v28  ;;  %v691_v29 = vpop.f32.mrb[6].mxu1 }
 0x2db   : > { %v695_v30 = vmul.f32 0.35355338, %v691_v29  ;;  %v931_v31 = vpop.f32.mrb[7].mxu1 }
 0x2dd   : > { %v696_v32 = vsel %vm192_vm2, %v695_v30, -inf }
 0x2de   : > { %697 = vmax.xlane.f32.xlu0 %v696_v32 }
 0x2e7   : > { %538 = vrot.lane.b32.xlu1 %v1033_v1, %s996_s21 }
 0x2f4   : > { %705 = vrot.lane.b32.xlu0 %v1033_v1, %s997_s22 }
 0x363   : > { %v364_v33 = vpop.xlane.xlu1 %363 }
 0x364   : > { %v365_v34 = vsub.f32 %v361_v22, %v364_v33 }
 0x366   : > { %v366_v35 = vmul.f32 1.442695, %v365_v34 }
 0x367   : > { %v531_v36 = vpop.xlane.xlu0 %530  ;;  %v539_v42 = vpop.permute.xlu1 %538 }
 0x368   : > { %963 = vpow2.f32 %v366_v35  ;;  %v532_v37 = vsub.f32 %v528_v26, %v531_v36 }
 0x36a   : > { %v533_v38 = vmul.f32 1.442695, %v532_v37 }
 0x36b   : > { %v698_v39 = vpop.xlane.xlu0 %697 }
 0x36c   : > { %965 = vpow2.f32 %v533_v38  ;;  %v699_v40 = vsub.f32 %v695_v30, %v698_v39 }
 0x36e   : > { %v700_v41 = vmul.f32 1.442695, %v699_v40 }
 0x36f   : > { %v706_v45 = vpop.permute.xlu0 %705 }
 0x370   : > { %967 = vpow2.f32 %v700_v41 }
 0x372   : > { %v964_v43 = vpop.eup %963 }
 0x373   : > { %915 = vmatmul.mubr.msk.f32.vlgmr.msra.gmra.mrb[2].mxu0 %vm204_vm4, %v964_v43  ;;  %v368_v44 = vsel %vm192_vm2, %v964_v43, 0.0 }
 0x374   : > { %923 = vmatpush3.msk.msra.mxu0 %vm208_vm3, %v539_v42  ;;  %369 = vadd.xlane.f32.xlu0 %v368_v44 }
 0x375   : > { %924 = vmatprep.mubr.msk.f32.mxu0 %vm986_vm0, %v985_v0  ;;  %932 = vmatprep.subr.mxu0 %v985_v0 }
 0x376   : > { %v966_v46 = vpop.eup %965 }
 0x377   : > { %925 = vmatmul.mubr.msk.f32.vlgmr.msra.gmra.mrb[4].mxu0 %vm204_vm4, %v966_v46  ;;  %v535_v47 = vsel %vm192_vm2, %v966_v46, 0.0 }
 0x378   : > { %933 = vmatpush3.msk.msra.mxu0 %vm208_vm3, %v706_v45  ;;  %536 = vadd.xlane.f32.xlu1 %v535_v47 }
 0x379   : > { %934 = vmatprep.mubr.msk.f32.mxu0 %vm986_vm0, %v985_v0 }
 0x37a   : > { %v968_v48 = vpop.eup %967 }
 0x37b   : > { %935 = vmatmul.mubr.msk.f32.vlgmr.msra.gmra.mrb[6].mxu0 %vm204_vm4, %v968_v48  ;;  %v702_v49 = vsel %vm192_vm2, %v968_v48, 0.0 }
 0x37c   : > { %703 = vadd.xlane.f32.xlu0 %v702_v49 }
 0x380   : > { %200 = vadd.xlane.f32.xlu0 %v199_v50 }
 0x401   : > { %v370_v51 = vpop.xlane.xlu0 %369 }
 0x402   : > { %969 = vrcp.f32 %v370_v51 }
 0x405   : > { %v537_v52 = vpop.xlane.xlu1 %536 }
 0x406   : > { %971 = vrcp.f32 %v537_v52 }
 0x409   : > { %v704_v53 = vpop.xlane.xlu0 %703 }
 0x40a   : > { %973 = vrcp.f32 %v704_v53 }
 0x40c   : > { %v970_v54 = vpop.eup %969 }
 0x40d   : > { %v201_v2 = vpop.xlane.xlu0 %200 }
 0x40e   : > { %975 = vrcp.f32 %v201_v2 }
 0x410   : > { %v972_v58 = vpop.eup %971 }
 0x414   : > { %v974_v62 = vpop.eup %973 }
 0x418   : > { %v976_v3 = vpop.eup %975 }
 0x419   : > { %v282_v5 = vmul.f32 %v976_v3, %v1073_v19 }
 0x446   : > { %v444_v55 = vpop.f32.mrb[2].mxu0 }
 0x447   : > { %v449_v56 = vmul.f32 %v970_v54, %v444_v55  ;;  %v916_v57 = vpop.f32.mrb[3].mxu0 }
 0x449   : > { %785 = vrot.lane.b32.xlu0 %v449_v56, %s998_s23 }
 0x44a   : > { %v611_v59 = vpop.f32.mrb[4].mxu0 }
 0x44b   : > { %v616_v60 = vmul.f32 %v972_v58, %v611_v59  ;;  %v926_v61 = vpop.f32.mrb[5].mxu0 }
 0x44d   : > { %789 = vrot.lane.b32.xlu1 %v616_v60, %s999_s24 }
 0x44e   : > { %v778_v63 = vpop.f32.mrb[6].mxu0 }
 0x44f   : > { %v783_v0 = vmul.f32 %v974_v62, %v778_v63  ;;  %v936_v1 = vpop.f32.mrb[7].mxu0 }
 0x451   : > { %793 = vrot.lane.b32.xlu0 %v783_v0, %s1000_s25 }
 0x4bb   : > { %v786_v4 = vpop.permute.xlu0 %785 }
 0x4bc   : > { %v796_v7 = vsel %vm116_vm1, %v282_v5, %v786_v4 }
 0x4bf   : > { %v790_v6 = vpop.permute.xlu1 %789 }
 0x4c0   : > { %v798_v8 = vsel %vm797_vm5, %v796_v7, %v790_v6 }
 0x4c3   : > { %v794_v9 = vpop.permute.xlu0 %793 }
 0x4c4   : > { %v800_v10 = vsel %vm799_vm6, %v798_v8, %v794_v9 }
 0x4c5   : > { %802 = vst.msk [vmem:[%s111_s28] sm:$0x7f] %vm801_vm7, %v800_v10 }
 0x4c6 PF: > { %s11_s6 = sadd.s32 1, %s983_s6  }
 0x4c7   : > { %p8_p4 = scmp.ge.s32.totalorder %s11_s6, 4  }
 0x4c9   :  { %10 = sbr.rel (!%p8_p4) target bundleno = 1 (0x1), region = 54 }

// kernel: cmcad_forward.55
= control target key start
LH: loop header
LB: loop body
LE: loop exit
PB: predicated region body
PF: predicated region fallthrough
CT: control target
= control target key end

     0   :  { %vm27_vm0 = vcmask 261120   ;;  %vm111_vm1 = vcmask 603136   ;;  %vm109_vm2 = vcmask 605184   ;;  %s192_s1 = inlined_call_operand.vmem [shape: f32[32,74], index: 1, kind: input, shape index: {}]   ;;  %s193_s0 = inlined_call_operand.vmem [shape: f32[14,32], index: 0, kind: input, shape index: {}]   ;;  %s194_s2 = inlined_call_operand.vmem [shape: f32[1,74], index: 2, kind: input, shape index: {}]   ;;  %s195_s3 = inlined_call_operand.vmem [shape: f32[14,74], index: 3, kind: output, shape index: {}]  }
   0x1   :  { %v16_v0 = vld [vmem:[%s192_s1] sm:$0xff]  ;;  %v17_v1 = vld [vmem:[%s192_s1 + $0x8] sm:$0xff]  ;;  %v18_v2 = vld [vmem:[%s192_s1 + $0x10] sm:$0xff] }
   0x2   :  { %v137_v3 = vpack.c.bf16 %v17_v1, %v16_v0  ;;  %v19_v4 = vld [vmem:[%s192_s1 + $0x18] sm:$0xff]  ;;  %v14_v5 = vld [vmem:[%s193_s0] sm:$0xff]  ;;  %v15_v7 = vld [vmem:[%s193_s0 + $0x8] sm:$0x3f] }
   0x3   :  { %v141_v6 = vpack.c.bf16 %v19_v4, %v18_v2  ;;  %134 = vmatprep.mubr.msk.f32.mxu0 %vm27_vm0, %v14_v5  ;;  %v117_v8 = vld [vmem:[%s194_s2] ss:$0 sm:$0xff] }
   0x4   :  { %138 = vmatprep.subr.bf16.mxu0 %v137_v3 }
   0x5   :  { %140 = vmatpush3.bf16.msra.mxu0 %v137_v3 }
   0x6   :  { %142 = vmatprep.subr.bf16.mxu0 %v141_v6 }
   0x9   :  { %144 = vmatpush3.bf16.msra.mxu0 %v141_v6 }
   0xc   :  { %135 = vmatmul.mubr.msk.f32.vlgmr.msra.gmra.mrb[0].mxu0 %vm27_vm0, %v15_v7 }
  0xdf   :  { %v136_v9 = vpop.f32.mrb[0].mxu0 }
  0xe0   :  { %v106_v10 = vadd.f32 %v136_v9, %v117_v8  ;;  %v100_v11 = vpop.f32.mrb[1].mxu0 }
  0xe1   :  { %v101_v12 = vadd.f32 %v117_v8, %v100_v11 }
  0xe2   :  { %112 = vst.msk [vmem:[%s195_s3 + $0x8] sm:$0x3f] %vm111_vm1, %v106_v10 }
  0xe3   :  { %110 = vst.msk [vmem:[%s195_s3] sm:$0xff] %vm109_vm2, %v101_v12 }

// kernel: cmcad_forward.50
= control target key start
LH: loop header
LB: loop body
LE: loop exit
PB: predicated region body
PF: predicated region fallthrough
CT: control target
= control target key end

     0   :  { %s1324_s24 = smov 0   ;;  %s1326_s25 = smov 0   ;;  %s1558_s0 = inlined_call_operand.vmem [shape: f32[14,32], index: 0, kind: input, shape index: {}]   ;;  %s1559_s1 = inlined_call_operand.vmem [shape: f32[32,2048], index: 1, kind: input, shape index: {}]   ;;  %s1560_s2 = inlined_call_operand.vmem [shape: f32[1,2048], index: 2, kind: input, shape index: {}]   ;;  %s1561_s3 = inlined_call_operand.vmem [shape: f32[2048,32], index: 3, kind: input, shape index: {}]   ;;  %s1562_s4 = inlined_call_operand.vmem [shape: f32[1,32], index: 4, kind: input, shape index: {}]   ;;  %s1563_s5 = inlined_call_operand.vmem [shape: f32[1,32], index: 5, kind: input, shape index: {}]   ;;  %s1564_s6 = inlined_call_operand.vmem [shape: f32[1,32], index: 6, kind: input, shape index: {}]   ;;  %s1565_s7 = inlined_call_operand.vmem [shape: f32[14,32], index: 7, kind: output, shape index: {}]  }
   0x1   :  { %s1328_s26 = smov 0   ;;  %s1330_s27 = smov 0  }
   0x2   :  { %s1332_s28 = smov 0  }
   0x3 LB: > { %s26_s29 = sadd.s32 1, %s1276_s27  ;;  %p69_p1 = scmp.ne.s32.totalorder %s1268_s25, %s1264_s24  ;;  %s1280_s28 = sphi %s1332_s28, %s17_s28   ;;  %s1276_s27 = sphi %s1330_s27, %s1569_s27   ;;  %s1272_s26 = sphi %s1328_s26, %s1568_s26   ;;  %s1268_s25 = sphi %s1326_s25, %s1567_s25   ;;  %s1264_s24 = sphi %s1324_s24, %s1566_s24  }
   0x4   : > { %p27_p0 = scmp.ge.s32.totalorder %s26_s29, 4  ;;  %p70_p2 = scmp.eq.s32.totalorder %s1280_s28, 0 }
   0x5   : > { %s62_s8 = sadd.s32 1, %s1268_s25  ;;  %p1017_p5 = scmp.ge.s32.totalorder %s1280_s28, 4 }
   0x6   : > { %s1571_s29 = smov (%p27_p0, %s26_s29), 0  ;;  %p71_p3 = por %p70_p2, %p69_p1 }
   0x7   : > { %s59_s30 = ssub.s32 %s1276_s27, %s1571_s29  ;;  %254 = sbr.rel (%p1017_p5) target bundleno = 26 (0x1a), region = 32 }
   0x8   : > { %p60_p4 = scmp.eq.s32.totalorder %s59_s30, 0 }
   0xa   : > { %s1359_s9 = scalar_select %p60_p4, %s1268_s25, %s62_s8  }
   0xe   : > { %257 = sbr.rel (!%p71_p3) target bundleno = 26 (0x1a), region = 36  ;;  %s259_s10 = sand.u32 (%p71_p3), 1, %s1268_s25  }
   0xf   : > { %s1039_s11 = sshll.u32 (%p71_p3), %s1276_s27, 5  ;;  %s1018_s12 = sshll.u32 (%p71_p3), %s259_s10, 7 }
  0x10   : > { %s1367_s15 = scalar_lea.vmem (%p71_p3), %s1559_s1, %s1039_s11  ;;  %s261_s16 = scalar_lea.vmem (%p71_p3), [#allocation3], %s1018_s12 }
  0x11   : > { %v277_v0 = vld [vmem:[%s1367_s15] sm:$0xff] (%p71_p3)  ;;  %v279_v1 = vld [vmem:[%s1367_s15 + $0x8] sm:$0xff] (%p71_p3)  ;;  %v281_v2 = vld [vmem:[%s1367_s15 + $0x10] sm:$0xff] (%p71_p3) }
  0x12   : > { %278 = vst [vmem:[%s261_s16] sm:$0xff] (%p71_p3), %v277_v0  ;;  %280 = vst [vmem:[%s261_s16 + $0x8] sm:$0xff] (%p71_p3), %v279_v1  ;;  %v283_v3 = vld [vmem:[%s1367_s15 + $0x18] sm:$0xff] (%p71_p3)  ;;  %v285_v4 = vld [vmem:[%s1367_s15 + $0x80] sm:$0xff] (%p71_p3) }
  0x13   : > { %282 = vst [vmem:[%s261_s16 + $0x10] sm:$0xff] (%p71_p3), %v281_v2  ;;  %v287_v5 = vld [vmem:[%s1367_s15 + $0x88] sm:$0xff] (%p71_p3)  ;;  %284 = vst [vmem:[%s261_s16 + $0x18] sm:$0xff] (%p71_p3), %v283_v3  ;;  %v289_v6 = vld [vmem:[%s1367_s15 + $0x90] sm:$0xff] (%p71_p3) }
  0x14   : > { %286 = vst [vmem:[%s261_s16 + $0x20] sm:$0xff] (%p71_p3), %v285_v4  ;;  %288 = vst [vmem:[%s261_s16 + $0x28] sm:$0xff] (%p71_p3), %v287_v5  ;;  %v291_v7 = vld [vmem:[%s1367_s15 + $0x98] sm:$0xff] (%p71_p3)  ;;  %v293_v8 = vld [vmem:[%s1367_s15 + $0x100] sm:$0xff] (%p71_p3) }
  0x15   : > { %290 = vst [vmem:[%s261_s16 + $0x30] sm:$0xff] %v289_v6  ;;  %292 = vst [vmem:[%s261_s16 + $0x38] sm:$0xff] %v291_v7  ;;  %v295_v9 = vld [vmem:[%s1367_s15 + $0x108] sm:$0xff]  ;;  %v297_v10 = vld [vmem:[%s1367_s15 + $0x110] sm:$0xff] }
  0x16   : > { %294 = vst [vmem:[%s261_s16 + $0x40] sm:$0xff] %v293_v8  ;;  %v299_v11 = vld [vmem:[%s1367_s15 + $0x118] sm:$0xff]  ;;  %296 = vst [vmem:[%s261_s16 + $0x48] sm:$0xff] %v295_v9  ;;  %v301_v12 = vld [vmem:[%s1367_s15 + $0x180] sm:$0xff] }
  0x17   : > { %298 = vst [vmem:[%s261_s16 + $0x50] sm:$0xff] %v297_v10  ;;  %300 = vst [vmem:[%s261_s16 + $0x58] sm:$0xff] %v299_v11  ;;  %v303_v13 = vld [vmem:[%s1367_s15 + $0x188] sm:$0xff]  ;;  %v305_v14 = vld [vmem:[%s1367_s15 + $0x190] sm:$0xff] }
  0x18   : > { %302 = vst [vmem:[%s261_s16 + $0x60] sm:$0xff] %v301_v12  ;;  %304 = vst [vmem:[%s261_s16 + $0x68] sm:$0xff] %v303_v13  ;;  %v307_v15 = vld [vmem:[%s1367_s15 + $0x198] sm:$0xff] }
  0x19   : > { %306 = vst [vmem:[%s261_s16 + $0x70] sm:$0xff] %v305_v14  ;;  %308 = vst [vmem:[%s261_s16 + $0x78] sm:$0xff] %v307_v15 }
  0x1a PF: > { %p1021_p6 = scmp.ge.s32.totalorder %s1280_s28, 1  ;;  %p330_p7 = scmp.lt.s32.totalorder %s1280_s28, 5 }
  0x1c   : > { %p331_p8 = pnand %p1021_p6, %p330_p7 }
  0x1d   : > { %s337_s17 = sand.u32 (!%p331_p8), 1, %s1264_s24   ;;  %s1023_s18 = sshll.u32 (!%p331_p8), %s1272_s26, 2 }
  0x1e   : > { %334 = sbr.rel (%p331_p8) target bundleno = 814 (0x32e), region = 67  ;;  %s1022_s19 = sshll.u32 (!%p331_p8), %s337_s17, 7 }
  0x1f   : > { %p390_p9 = scmp.lt.s32.totalorder (!%p331_p8), %s1023_s18, 15  ;;  %s1024_s20 = sshll.u32 (!%p331_p8), %s1272_s26, 6 }
  0x20   : > { %p395_p10 = scmp.lt.s32.totalorder (!%p331_p8), %s1024_s20, 255  ;;  %s1401_s24 = scalar_lea.vmem (!%p331_p8), [#allocation3], %s1022_s19 }
  0x21   : > { %p1026_p11 = scmp.ne.s32.totalorder (!%p331_p8), %s1272_s26, 0 }
  0x25   : > { %s1573_s18 = smov (!%p390_p9, %s1023_s18), 15  ;;  %s1575_s20 = smov (!%p395_p10, %s1024_s20), 255 }
  0x26   : > { %s392_s23 = scalar_lea.vmem %s1560_s2, %s1573_s18  ;;  %s1025_s30 = sshll.u32 %s1575_s20, 3  ;;  %vm410_vm0 = vcmask (!%p1026_p11), 261120   ;;  %vm412_vm1 = vcmask (!%p1026_p11), 259072   ;;  %v1282_v16 = vmov (!%p1026_p11), 0.0  }
  0x27   : > { %s1399_s11 = scalar_lea.vmem %s1561_s3, %s1025_s30  ;;  %409 = sbr.rel (%p1026_p11) target bundleno = 46 (0x2e), region = 75  ;;  %411 = vst.msk [vmem:[#allocation2] sm:$0xff] (!%p1026_p11), %vm410_vm0, %v1282_v16 }
  0x28   : > { %413 = vst.msk [vmem:[#allocation2 + $0x8] sm:$0x3f] (!%p1026_p11), %vm412_vm1, %v1282_v16 }
  0x2e PF: > { %v416_v17 = vld [vmem:[%s1558_s0] sm:$0xff]  ;;  %vm420_vm2 = vcmask 261120   ;;  %v417_v18 = vld [vmem:[%s1558_s0 + $0x8] sm:$0x3f]  ;;  %vm424_vm3 = vcmask 259072   ;;  %v466_v31 = vld [vmem:[%s1401_s24 + $0x8] sm:$0xff] }
  0x2f   : > { %v421_v19 = vsel %vm420_vm2, %v416_v17, 0.0  ;;  %v425_v20 = vsel %vm424_vm3, %v417_v18, 0.0  ;;  %v470_v32 = vld [vmem:[%s1401_s24 + $0x28] sm:$0xff]  ;;  %v468_v33 = vld [vmem:[%s1401_s24 + $0x18] sm:$0xff]  ;;  %v465_v36 = vld [vmem:[%s1401_s24] sm:$0xff]  ;;  %v1283_v38 = vmov 0.0  }
  0x30   : > { %422 = vadd.xlane.f32.xlu0 %v421_v19  ;;  %v1116_v34 = vpack.c.bf16 %v470_v32, %v466_v31  ;;  %v472_v35 = vld [vmem:[%s1401_s24 + $0x38] sm:$0xff]  ;;  %v469_v37 = vld [vmem:[%s1401_s24 + $0x20] sm:$0xff]  ;;  %573 = vmatprep.mubr.f32.mxu0 %v1283_v38  ;;  %v467_v41 = vld [vmem:[%s1401_s24 + $0x10] sm:$0xff]  ;;  %p1033_p12 = scmp.ne.s32.totalorder %s1272_s26, 3 }
  0x31   : > { %650 = vmatprep.mubr.f32.mxu1 %v1283_v38  ;;  %v1124_v39 = vpack.c.bf16 %v472_v35, %v468_v33  ;;  %v1118_v40 = vpack.c.bf16 %v469_v37, %v465_v36  ;;  %v471_v42 = vld [vmem:[%s1401_s24 + $0x30] sm:$0xff]  ;;  %v474_v43 = vld [vmem:[%s1401_s24 + $0x48] sm:$0xff]  ;;  %v476_v46 = vld [vmem:[%s1401_s24 + $0x58] sm:$0xff] }
  0x32   : > { %1117 = vmatprep.subr.bf16.mxu0 %v1116_v34  ;;  %v1126_v44 = vpack.c.bf16 %v471_v42, %v467_v41  ;;  %v478_v45 = vld [vmem:[%s1401_s24 + $0x68] sm:$0xff]  ;;  %v480_v47 = vld [vmem:[%s1401_s24 + $0x78] sm:$0xff]  ;;  %v473_v50 = vld [vmem:[%s1401_s24 + $0x40] sm:$0xff] }
  0x33   : > { %1125 = vmatprep.subr.bf16.mxu1 %v1124_v39  ;;  %1119 = vmatpush1.bf16.msra.mxu0 %v1118_v40  ;;  %v1120_v48 = vpack.c.bf16 %v478_v45, %v474_v43  ;;  %v1128_v49 = vpack.c.bf16 %v480_v47, %v476_v46  ;;  %v477_v51 = vld [vmem:[%s1401_s24 + $0x60] sm:$0xff]  ;;  %v475_v52 = vld [vmem:[%s1401_s24 + $0x50] sm:$0xff]  ;;  %v688_v57 = vld [vmem:[%s1399_s11 + $0x88] sm:$0xff] }
  0x34   : > { %426 = vadd.xlane.f32.xlu0 %v425_v20  ;;  %1127 = vmatpush1.bf16.msra.mxu1 %v1126_v44  ;;  %v1122_v53 = vpack.c.bf16 %v477_v51, %v473_v50  ;;  %v479_v54 = vld [vmem:[%s1401_s24 + $0x70] sm:$0xff]  ;;  %v720_v60 = vld [vmem:[%s1399_s11 + $0x188] sm:$0xff]  ;;  %v689_v12 = vld [vmem:[%s1399_s11 + $0x90] sm:$0xff] }
  0x35   : > { %1121 = vmatprep.subr.bf16.mxu0 %v1120_v48  ;;  %1129 = vmatprep.subr.bf16.mxu1 %v1128_v49  ;;  %v1130_v55 = vpack.c.bf16 %v479_v54, %v475_v52  ;;  %v687_v56 = vld [vmem:[%s1399_s11 + $0x80] sm:$0xff]  ;;  %v672_v9 = vld [vmem:[%s1399_s11 + $0x8] sm:$0xff]  ;;  %v690_v14 = vld [vmem:[%s1399_s11 + $0x98] sm:$0xff] }
  0x36   : > { %v719_v58 = vld [vmem:[%s1399_s11 + $0x180] sm:$0xff]  ;;  %v1132_v59 = vpack.c.bf16 %v688_v57, %v687_v56  ;;  %v704_v11 = vld [vmem:[%s1399_s11 + $0x108] sm:$0xff]  ;;  %v721_v15 = vld [vmem:[%s1399_s11 + $0x190] sm:$0xff] }
  0x37   : > { %1123 = vmatpush1.bf16.msra.mxu0 %v1122_v53  ;;  %v1164_v61 = vpack.c.bf16 %v720_v60, %v719_v58  ;;  %v1027_v5 = vld [vmem:[%s1563_s5] ss:$0 sm:$0xff]  ;;  %v722_v16 = vld [vmem:[%s1399_s11 + $0x198] sm:$0xff]  ;;  %v692_v31 = vld [vmem:[%s1399_s11 + $0xa8] sm:$0xff] }
  0x38   : > { %1131 = vmatpush1.bf16.msra.mxu1 %v1130_v55  ;;  %1133 = vmatprep.subr.bf16.mxu0 %v1132_v59  ;;  %v1028_v6 = vld [vmem:[%s1564_s6] ss:$0 sm:$0xff]  ;;  %v676_v37 = vld [vmem:[%s1399_s11 + $0x28] sm:$0xff]  ;;  %v693_v43 = vld [vmem:[%s1399_s11 + $0xb0] sm:$0xff] }
  0x39   : > { %1165 = vmatprep.subr.bf16.mxu1 %v1164_v61  ;;  %v671_v8 = vld [vmem:[%s1399_s11] sm:$0xff]  ;;  %v708_v42 = vld [vmem:[%s1399_s11 + $0x128] sm:$0xff]  ;;  %v725_v44 = vld [vmem:[%s1399_s11 + $0x1b0] sm:$0xff] }
  0x3a   : > { %v703_v10 = vld [vmem:[%s1399_s11 + $0x100] sm:$0xff]  ;;  %v1134_v20 = vpack.c.bf16 %v672_v9, %v671_v8  ;;  %v726_v45 = vld [vmem:[%s1399_s11 + $0x1b8] sm:$0xff]  ;;  %v677_v48 = vld [vmem:[%s1399_s11 + $0x30] sm:$0xff] }
  0x3b   : > { %v723_v32 = vld [vmem:[%s1399_s11 + $0x1a0] sm:$0xff]  ;;  %v678_v49 = vld [vmem:[%s1399_s11 + $0x38] sm:$0xff]  ;;  %v1176_v51 = vpack.c.bf16 %v726_v45, %v725_v44  ;;  %v709_v52 = vld [vmem:[%s1399_s11 + $0x130] sm:$0xff] }
  0x3c   : > { %v675_v36 = vld [vmem:[%s1399_s11 + $0x20] sm:$0xff]  ;;  %v710_v53 = vld [vmem:[%s1399_s11 + $0x138] sm:$0xff]  ;;  %v696_v55 = vld [vmem:[%s1399_s11 + $0xc8] sm:$0xff]  ;;  %v1146_v58 = vpack.c.bf16 %v678_v49, %v677_v48 }
  0x3d   : > { %v707_v41 = vld [vmem:[%s1399_s11 + $0x120] sm:$0xff]  ;;  %v1142_v46 = vpack.c.bf16 %v676_v37, %v675_v36  ;;  %v728_v57 = vld [vmem:[%s1399_s11 + $0x1c8] sm:$0xff]  ;;  %v1178_v59 = vpack.c.bf16 %v710_v53, %v709_v52  ;;  %v681_v8 = vld [vmem:[%s1399_s11 + $0x50] sm:$0xff] }
  0x3e   : > { %v1174_v47 = vpack.c.bf16 %v708_v42, %v707_v41  ;;  %v695_v54 = vld [vmem:[%s1399_s11 + $0xc0] sm:$0xff]  ;;  %v680_v61 = vld [vmem:[%s1399_s11 + $0x48] sm:$0xff]  ;;  %v682_v9 = vld [vmem:[%s1399_s11 + $0x58] sm:$0xff]  ;;  %v483_v41 = vlaneseq }
  0x3f   : > { %v727_v56 = vld [vmem:[%s1399_s11 + $0x1c0] sm:$0xff]  ;;  %v717_v37 = vld [vmem:[%s1399_s11 + $0x170] sm:$0xff] }
  0x40   : > { %v679_v60 = vld [vmem:[%s1399_s11 + $0x40] sm:$0xff]  ;;  %v484_v42 = vshrl.u32 %v483_v41, 7 }
  0x41   : > { %v481_v44 = vld [vmem:[%s392_s23] sm:$0xf] }
  0x42   : > { %v489_v45 = vsub.s32 1, %v484_v42 }
  0x44   : > { %v490_v49 = vrot.slane %v481_v44, %v489_v45 }
  0xbd   : > { %v423_v21 = vpop.xlane.xlu0 %422 }
  0xbe   : > { %v429_v22 = vmul.f32 0.03125, %v423_v21  ;;  %v1166_v21 = vpack.c.bf16 %v704_v11, %v703_v10 }
  0xc0   : > { %v1412_v23 = vsub.f32 %v416_v17, %v429_v22  ;;  %v673_v22 = vld [vmem:[%s1399_s11 + $0x10] sm:$0xff] }
  0xc1   : > { %v427_v24 = vpop.xlane.xlu0 %426 }
  0xc2   : > { %v430_v25 = vmul.f32 0.03125, %v427_v24  ;;  %v433_v26 = vmul.f32 %v1412_v23, %v1412_v23  ;;  %v1136_v24 = vpack.c.bf16 %v690_v14, %v689_v12  ;;  %v713_v12 = vld [vmem:[%s1399_s11 + $0x150] sm:$0xff]  ;;  %v699_v14 = vld [vmem:[%s1399_s11 + $0xe0] sm:$0xff] }
  0xc4   : > { %v1416_v27 = vsub.f32 %v417_v18, %v430_v25  ;;  %v435_v28 = vsel %vm420_vm2, %v433_v26, 0.0  ;;  %v1168_v25 = vpack.c.bf16 %v722_v16, %v721_v15  ;;  %v705_v26 = vld [vmem:[%s1399_s11 + $0x110] sm:$0xff]  ;;  %v700_v15 = vld [vmem:[%s1399_s11 + $0xe8] sm:$0xff]  ;;  %v731_v16 = vld [vmem:[%s1399_s11 + $0x1e0] sm:$0xff] }
  0xc5   : > { %436 = vadd.xlane.f32.xlu1 %v435_v28  ;;  %v706_v28 = vld [vmem:[%s1399_s11 + $0x118] sm:$0xff] }
  0xc6   : > { %v434_v29 = vmul.f32 %v1416_v27, %v1416_v27  ;;  %v1170_v35 = vpack.c.bf16 %v706_v28, %v705_v26  ;;  %v716_v26 = vld [vmem:[%s1399_s11 + $0x168] sm:$0xff] }
  0xc8   : > { %v438_v30 = vsel %vm424_vm3, %v434_v29, 0.0  ;;  %v691_v29 = vld [vmem:[%s1399_s11 + $0xa0] sm:$0xff] }
  0xc9   : > { %439 = vadd.xlane.f32.xlu1 %v438_v30  ;;  %v1140_v39 = vpack.c.bf16 %v692_v31, %v691_v29  ;;  %v701_v29 = vld [vmem:[%s1399_s11 + $0xf0] sm:$0xff] }
  0xca   : > { %v733_v31 = vld [vmem:[%s1399_s11 + $0x1f0] sm:$0xff] }
 0x152   : > { %v437_v62 = vpop.xlane.xlu1 %436 }
 0x153   : > { %v441_v63 = vmul.f32 0.03125, %v437_v62  ;;  %v1148_v62 = vpack.c.bf16 %v696_v55, %v695_v54 }
 0x155   : > { %v443_v0 = vadd.f32 1e-05, %v441_v63  ;;  %v1180_v63 = vpack.c.bf16 %v728_v57, %v727_v56 }
 0x156   : > { %v440_v1 = vpop.xlane.xlu1 %439 }
 0x157   : > { %1238 = vrsqrt.f32 %v443_v0  ;;  %v442_v2 = vmul.f32 0.03125, %v440_v1  ;;  %v711_v0 = vld [vmem:[%s1399_s11 + $0x140] sm:$0xff]  ;;  %v712_v1 = vld [vmem:[%s1399_s11 + $0x148] sm:$0xff] }
 0x159   : > { %v444_v3 = vadd.f32 1e-05, %v442_v2  ;;  %v697_v2 = vld [vmem:[%s1399_s11 + $0xd0] sm:$0xff] }
 0x15b   : > { %1240 = vrsqrt.f32 %v444_v3  ;;  %v698_v3 = vld [vmem:[%s1399_s11 + $0xd8] sm:$0xff] }
 0x15c   : > { %v1152_v10 = vpack.c.bf16 %v698_v3, %v697_v2 }
 0x161   : > { %v1239_v4 = vpop.eup %1238 }
 0x162   : > { %v447_v7 = vmul.f32 %v1239_v4, %v1412_v23  ;;  %v674_v23 = vld [vmem:[%s1399_s11 + $0x18] sm:$0xff]  ;;  %v729_v4 = vld [vmem:[%s1399_s11 + $0x1d0] sm:$0xff] }
 0x163   : > { %v1138_v34 = vpack.c.bf16 %v674_v23, %v673_v22  ;;  %v683_v22 = vld [vmem:[%s1399_s11 + $0x60] sm:$0xff]  ;;  %v684_v23 = vld [vmem:[%s1399_s11 + $0x68] sm:$0xff] }
 0x164   : > { %v455_v13 = vmul.f32 %v1027_v5, %v447_v7  ;;  %v1182_v7 = vpack.c.bf16 %v712_v1, %v711_v0 }
 0x165   : > { %v1241_v17 = vpop.eup %1240 }
 0x166   : > { %v463_v18 = vadd.f32 %v1028_v6, %v455_v13  ;;  %v448_v19 = vmul.f32 %v1241_v17, %v1416_v27  ;;  %v724_v27 = vld [vmem:[%s1399_s11 + $0x1a8] sm:$0xff]  ;;  %v714_v13 = vld [vmem:[%s1399_s11 + $0x158] sm:$0xff] }
 0x167   : > { %v1172_v40 = vpack.c.bf16 %v724_v27, %v723_v32  ;;  %v732_v17 = vld [vmem:[%s1399_s11 + $0x1e8] sm:$0xff]  ;;  %v734_v27 = vld [vmem:[%s1399_s11 + $0x1f8] sm:$0xff] }
 0x168   : > { %1029 = vmatmul.mubr.msk.f32.vlgmr.msra.gmra.mrb[0].mxu0 %vm420_vm2, %v463_v18  ;;  %1031 = vmatmul.mubr.msk.f32.vlgmr.msra.gmra.mrb[0].mxu1 %vm420_vm2, %v463_v18  ;;  %v456_v30 = vmul.f32 %v1027_v5, %v448_v19  ;;  %v730_v5 = vld [vmem:[%s1399_s11 + $0x1d8] sm:$0xff]  ;;  %v1154_v18 = vpack.c.bf16 %v682_v9, %v681_v8  ;;  %v1186_v19 = vpack.c.bf16 %v714_v13, %v713_v12 }
 0x169   : > { %579 = vmatprep.mubr.f32.mxu0 %v1283_v38  ;;  %656 = vmatprep.mubr.f32.mxu1 %v1283_v38  ;;  %v694_v38 = vld [vmem:[%s1399_s11 + $0xb8] sm:$0xff]  ;;  %v1184_v11 = vpack.c.bf16 %v730_v5, %v729_v4 }
 0x16a   : > { %v464_v33 = vadd.f32 %v1028_v6, %v456_v30  ;;  %1135 = vmatpush3.bf16.msra.mxu0 %v1134_v20  ;;  %1167 = vmatpush3.bf16.msra.mxu1 %v1166_v21  ;;  %v1144_v50 = vpack.c.bf16 %v694_v38, %v693_v43  ;;  %v1150_v6 = vpack.c.bf16 %v680_v61, %v679_v60  ;;  %v702_v30 = vld [vmem:[%s1399_s11 + $0xf8] sm:$0xff]  ;;  %v485_v43 = vsub.s32 0, %v484_v42 }
 0x16b   : > { %1137 = vmatprep.subr.bf16.mxu0 %v1136_v24  ;;  %1169 = vmatprep.subr.bf16.mxu1 %v1168_v25  ;;  %v1156_v20 = vpack.c.bf16 %v700_v15, %v699_v14  ;;  %v1188_v21 = vpack.c.bf16 %v732_v17, %v731_v16  ;;  %v715_v24 = vld [vmem:[%s1399_s11 + $0x160] sm:$0xff]  ;;  %v1158_v25 = vpack.c.bf16 %v684_v23, %v683_v22  ;;  %v493_v38 = vsub.s32 2, %v484_v42 }
 0x16c   : > { %1030 = vmatmul.mubr.msk.f32.gmra.mrb[2].mxu0 %vm420_vm2, %v464_v33  ;;  %1032 = vmatmul.mubr.msk.f32.gmra.mrb[2].mxu1 %vm420_vm2, %v464_v33  ;;  %v1190_v28 = vpack.c.bf16 %v716_v26, %v715_v24  ;;  %v1160_v32 = vpack.c.bf16 %v702_v30, %v701_v29  ;;  %v685_v33 = vld [vmem:[%s1399_s11 + $0x70] sm:$0xff]  ;;  %v414_v17 = vld [vmem:[#allocation2] sm:$0xff]  ;;  %v415_v26 = vld [vmem:[#allocation2 + $0x8] sm:$0x3f] }
 0x16d   : > { %v494_v48 = vrot.slane %v481_v44, %v493_v38 }
 0x16e   : > { %1139 = vmatpush3.bf16.msra.mxu0 %v1138_v34  ;;  %1171 = vmatpush3.bf16.msra.mxu1 %v1170_v35  ;;  %v686_v34 = vld [vmem:[%s1399_s11 + $0x78] sm:$0xff]  ;;  %v1192_v35 = vpack.c.bf16 %v734_v27, %v733_v31  ;;  %v1034_v31 = vld [vmem:[%s1562_s4] ss:$0 sm:$0xff] (!%p1033_p12) }
 0x16f   : > { %1141 = vmatprep.subr.bf16.mxu0 %v1140_v39  ;;  %1173 = vmatprep.subr.bf16.mxu1 %v1172_v40  ;;  %v1162_v36 = vpack.c.bf16 %v686_v34, %v685_v33  ;;  %v718_v39 = vld [vmem:[%s1399_s11 + $0x178] sm:$0xff]  ;;  %v905_v34 = vld [vmem:[%s1558_s0 + $0x8] sm:$0x3f] (!%p1033_p12) }
 0x170   : > { %v1194_v40 = vpack.c.bf16 %v718_v39, %v717_v37 }
 0x172   : > { %1143 = vmatpush3.bf16.msra.mxu0 %v1142_v46  ;;  %1175 = vmatpush3.bf16.msra.mxu1 %v1174_v47  ;;  %v497_v46 = vsub.s32 3, %v484_v42  ;;  %v486_v47 = vrot.slane %v481_v44, %v485_v43 }
 0x173   : > { %1145 = vmatprep.subr.bf16.mxu0 %v1144_v50  ;;  %1177 = vmatprep.subr.bf16.mxu1 %v1176_v51 }
 0x174   : > { %v498_v50 = vrot.slane %v481_v44, %v497_v46 }
 0x176   : > { %1147 = vmatpush3.bf16.msra.mxu0 %v1146_v58  ;;  %1179 = vmatpush3.bf16.msra.mxu1 %v1178_v59 }
 0x177   : > { %1149 = vmatprep.subr.bf16.mxu0 %v1148_v62  ;;  %1181 = vmatprep.subr.bf16.mxu1 %v1180_v63 }
 0x17a   : > { %1151 = vmatpush3.bf16.msra.mxu0 %v1150_v6  ;;  %1183 = vmatpush3.bf16.msra.mxu1 %v1182_v7 }
 0x17b   : > { %1153 = vmatprep.subr.bf16.mxu0 %v1152_v10  ;;  %1185 = vmatprep.subr.bf16.mxu1 %v1184_v11 }
 0x17e   : > { %1155 = vmatpush3.bf16.msra.mxu0 %v1154_v18  ;;  %1187 = vmatpush3.bf16.msra.mxu1 %v1186_v19 }
 0x17f   : > { %1157 = vmatprep.subr.bf16.mxu0 %v1156_v20  ;;  %1189 = vmatprep.subr.bf16.mxu1 %v1188_v21 }
 0x182   : > { %1159 = vmatpush3.bf16.msra.mxu0 %v1158_v25  ;;  %1191 = vmatpush3.bf16.msra.mxu1 %v1190_v28 }
 0x183   : > { %1161 = vmatprep.subr.bf16.mxu0 %v1160_v32  ;;  %1193 = vmatprep.subr.bf16.mxu1 %v1192_v35  ;;  %v904_v32 = vld [vmem:[%s1558_s0] sm:$0xff] (!%p1033_p12) }
 0x186   : > { %1163 = vmatpush3.bf16.msra.mxu0 %v1162_v36  ;;  %1195 = vmatpush3.bf16.msra.mxu1 %v1194_v40 }
 0x23b   : > { %v575_v51 = vpop.f32.mrb[0].mxu0  ;;  %v652_v52 = vpop.f32.mrb[0].mxu1 }
 0x23c   : > { %v576_v53 = vadd.f32 %v575_v51, %v486_v47  ;;  %v653_v54 = vadd.f32 %v652_v52, %v494_v48  ;;  %v577_v55 = vpop.f32.mrb[1].mxu0  ;;  %v654_v56 = vpop.f32.mrb[1].mxu1 }
 0x23d   : > { %v578_v57 = vadd.f32 %v577_v55, %v490_v49  ;;  %v655_v58 = vadd.f32 %v654_v56, %v498_v50 }
 0x23e   : > { %v663_v63 = vmax.f32 %v576_v53, 0.0  ;;  %v665_v0 = vmax.f32 %v653_v54, 0.0 }
 0x23f   : > { %v664_v59 = vmax.f32 %v578_v57, 0.0  ;;  %v666_v60 = vmax.f32 %v655_v58, 0.0  ;;  %v581_v61 = vpop.f32.mrb[2].mxu0  ;;  %v658_v62 = vpop.f32.mrb[2].mxu1 }
 0x240   : > { %v582_v1 = vadd.f32 %v581_v61, %v486_v47  ;;  %v659_v2 = vadd.f32 %v658_v62, %v494_v48  ;;  %v583_v3 = vpop.f32.mrb[3].mxu0  ;;  %v660_v4 = vpop.f32.mrb[3].mxu1 }
 0x241   : > { %v584_v5 = vadd.f32 %v583_v3, %v490_v49  ;;  %v661_v6 = vadd.f32 %v660_v4, %v498_v50  ;;  %799 = vmatprep.mubr.f32.mxu0 %v664_v59  ;;  %874 = vmatprep.mubr.f32.mxu1 %v666_v60 }
 0x242   : > { %800 = vmatmul.mubr.f32.vlgmr.msra.gmra.mrb[4].mxu0 %v663_v63  ;;  %875 = vmatmul.mubr.f32.vlgmr.msra.gmra.mrb[4].mxu1 %v665_v0  ;;  %v667_v9 = vmax.f32 %v582_v1, 0.0  ;;  %v669_v10 = vmax.f32 %v659_v2, 0.0 }
 0x243   : > { %v668_v7 = vmax.f32 %v584_v5, 0.0  ;;  %v670_v8 = vmax.f32 %v661_v6, 0.0 }
 0x245   : > { %804 = vmatprep.mubr.f32.mxu0 %v668_v7  ;;  %879 = vmatprep.mubr.f32.mxu1 %v670_v8 }
 0x246   : > { %805 = vmatmul.mubr.f32.gmra.mrb[6].mxu0 %v667_v9  ;;  %880 = vmatmul.mubr.f32.gmra.mrb[6].mxu1 %v669_v10 }
 0x315   : > { %v1072_v11 = vpop.f32.mrb[4].mxu0  ;;  %v1110_v12 = vpop.f32.mrb[4].mxu1 }
 0x316   : > { %v1073_v13 = vpop.f32.mrb[5].mxu0  ;;  %v1111_v14 = vpop.f32.mrb[5].mxu1 }
 0x317   : > { %v1074_v15 = vadd.f32 %v1073_v13, %v1072_v11  ;;  %v1112_v16 = vadd.f32 %v1111_v14, %v1110_v12 }
 0x319   : > { %v877_v18 = vadd.f32 %v1112_v16, %v1074_v15  ;;  %v1075_v19 = vpop.f32.mrb[6].mxu0  ;;  %v1113_v20 = vpop.f32.mrb[6].mxu1 }
 0x31a   : > { %v1076_v21 = vpop.f32.mrb[7].mxu0  ;;  %v1114_v22 = vpop.f32.mrb[7].mxu1 }
 0x31b   : > { %v885_v23 = vadd.f32 %v877_v18, %v414_v17  ;;  %v1077_v24 = vadd.f32 %v1076_v21, %v1075_v19  ;;  %v1115_v25 = vadd.f32 %v1114_v22, %v1113_v20  ;;  %892 = sbr.rel (%p1033_p12) target bundleno = 814 (0x32e), region = 79 }
 0x31d   : > { %887 = vst.msk [vmem:[#allocation2] sm:$0xff] %vm420_vm2, %v885_v23  ;;  %v882_v28 = vadd.f32 %v1115_v25, %v1077_v24 }
 0x31f   : > { %v886_v29 = vadd.f32 %v882_v28, %v415_v26 }
 0x321   : > { %888 = vst.msk [vmem:[#allocation2 + $0x8] sm:$0x3f] %vm424_vm3, %v886_v29 }
 0x324   : > { %v893_v30 = vld [vmem:[#allocation2] sm:$0xff] }
 0x325   : > { %v902_v27 = vadd.f32 %v1034_v31, %v893_v30 }
 0x327   : > { %v906_v36 = vadd.f32 %v904_v32, %v902_v27 }
 0x328   : > { %v894_v33 = vld [vmem:[#allocation2 + $0x8] sm:$0x3f] }
 0x329   : > { %v903_v35 = vadd.f32 %v1034_v31, %v894_v33  ;;  %908 = vst.msk [vmem:[%s1565_s7] sm:$0xff] %vm420_vm2, %v906_v36 }
 0x32b   : > { %v907_v37 = vadd.f32 %v905_v34, %v903_v35 }
 0x32d   : > { %909 = vst.msk [vmem:[%s1565_s7 + $0x8] sm:$0x3f] %vm424_vm3, %v907_v37 }
 0x32e PF: > { %s17_s28 = sadd.s32 1, %s1280_s28   ;;  %s1566_s24 = smov %s1268_s25 }
 0x32f   : > { %p14_p13 = scmp.ge.s32.totalorder %s17_s28, 6   ;;  %s1567_s25 = smov %s1359_s9 }
 0x330   : > { %s1568_s26 = smov %s1276_s27  ;;  %s1569_s27 = smov %s1571_s29 }
 0x331   :  { %16 = sbr.rel (!%p14_p13) target bundleno = 3 (0x3), region = 123 }

</bundles_post_ra>
